<compile_context>
chip_gen: v7x
topology: tpu7x:2x2x1
jax: 0.10.0
libtpu: 0.0.40
codegen_flags: <defaults>
</compile_context>

<pallas_src>
import functools

import jax
import jax.numpy as jnp
import numpy as np
from jax.experimental import pallas as pl
from jax.experimental.pallas import tpu as pltpu

_ALIGN = 8  # sublane alignment for the padded W axis of the VMEM scratches


# ----------------------------------------------------------------------------
# Fused kernel (one batch element per grid step)
# ----------------------------------------------------------------------------
def _basic_block_kernel(x_ref, w1_ref, b1_ref, w2_ref, b2_ref, out_ref,
                        xp1_ref, xp2_ref):
    """conv1+bn1+relu -> conv2(dil=2)+bn2 -> +residual -> relu, fully in VMEM.

    x_ref   : (1, H, W, C)   input (also the residual)
    w1_ref  : (9, C, C)      conv1 weights * bn1_scale, tap-major (dy*3+dx)
    b1_ref  : (1, C)         bn1 bias  (beta - mean*scale)
    w2_ref  : (9, C, C)      conv2 weights * bn2_scale
    b2_ref  : (1, C)         bn2 bias
    out_ref : (1, H, W, C)
    xp1_ref : VMEM (H + 2, W + 2*_ALIGN, C) f32  zero-padded conv1 input
    xp2_ref : VMEM (H + 4, W + 2*_ALIGN, C) f32  zero-padded conv2 input
    """
    _, H, W, C = out_ref.shape

    def conv3x3(xp_ref_, w_ref_, pad, dil):
        acc = jnp.zeros((H * W, C), jnp.float32)
        for dy in range(3):
            for dx in range(3):
                r0 = dy * dil                     # row offset (outer dim)
                c0 = _ALIGN - pad + dx * dil      # col offset (sublane dim)
                patch = xp_ref_[r0:r0 + H, c0:c0 + W, :].reshape(H * W, C)
                acc = acc + jnp.dot(patch, w_ref_[dy * 3 + dx],
                                    preferred_element_type=jnp.float32)
        return acc

    x = x_ref[0].astype(jnp.float32)                       # (H, W, C)

    # ---- conv1 (pad=1, dil=1) + bn1 bias + relu ----
    xp1_ref[...] = jnp.zeros_like(xp1_ref)                 # zero borders
    xp1_ref[1:1 + H, _ALIGN:_ALIGN + W, :] = x             # aligned interior
    y1 = jnp.maximum(conv3x3(xp1_ref, w1_ref, pad=1, dil=1) + b1_ref[0], 0.0)

    # ---- conv2 (pad=2, dil=2) + bn2 bias + residual + relu ----
    xp2_ref[...] = jnp.zeros_like(xp2_ref)
    xp2_ref[2:2 + H, _ALIGN:_ALIGN + W, :] = y1.reshape(H, W, C)
    y2 = conv3x3(xp2_ref, w2_ref, pad=2, dil=2) + b2_ref[0]
    y2 = jnp.maximum(y2 + x.reshape(H * W, C), 0.0)

    out_ref[...] = y2.reshape(1, H, W, C).astype(out_ref.dtype)


# ----------------------------------------------------------------------------
# Wrapper: layout plumbing + BN folding (one-time parameter transform)
# ----------------------------------------------------------------------------
def basic_block_dilated(x_nchw, params, eps=1e-5):
    """Forward pass of BasicBlock_Dilated (stride=1, downsample=None)."""
    N, C, H, W = x_nchw.shape
    x = jnp.transpose(x_nchw, (0, 2, 3, 1))                # NCHW -> NHWC

    s1 = params["bn1_gamma"] * jax.lax.rsqrt(params["bn1_var"] + eps)
    b1 = params["bn1_beta"] - params["bn1_mean"] * s1
    s2 = params["bn2_gamma"] * jax.lax.rsqrt(params["bn2_var"] + eps)
    b2 = params["bn2_beta"] - params["bn2_mean"] * s2

    # Fold BN scale into the conv weights (HWIO: scale over the O axis),
    # flatten to tap-major (9, Cin, Cout).
    w1f = (params["w1"] * s1[None, None, None, :]).reshape(9, C, C)
    w2f = (params["w2"] * s2[None, None, None, :]).reshape(9, C, C)

    out = pl.pallas_call(
        _basic_block_kernel,
        out_shape=jax.ShapeDtypeStruct((N, H, W, C), x_nchw.dtype),
        grid_spec=pltpu.PrefetchScalarGridSpec(
            num_scalar_prefetch=0,
            grid=(N,),
            in_specs=[
                pl.BlockSpec((1, H, W, C), lambda n: (n, 0, 0, 0)),  # x / residual
                pl.BlockSpec((9, C, C), lambda n: (0, 0, 0)),        # w1 (folded)
                pl.BlockSpec((1, C), lambda n: (0, 0)),              # b1
                pl.BlockSpec((9, C, C), lambda n: (0, 0, 0)),        # w2 (folded)
                pl.BlockSpec((1, C), lambda n: (0, 0)),              # b2
            ],
            out_specs=pl.BlockSpec((1, H, W, C), lambda n: (n, 0, 0, 0)),
            scratch_shapes=[
                pltpu.VMEM((H + 2, W + 2 * _ALIGN, C), jnp.float32),
                pltpu.VMEM((H + 4, W + 2 * _ALIGN, C), jnp.float32),
            ],
        ),
        compiler_params=pltpu.CompilerParams(
            dimension_semantics=("parallel",)),
    )(x, w1f, b1.reshape(1, C), w2f, b2.reshape(1, C))

    return jnp.transpose(out, (0, 3, 1, 2))                # NHWC -> NCHW


# ----------------------------------------------------------------------------
# Pure-JAX reference (for verification)
# ----------------------------------------------------------------------------
def _ref_forward(x_nchw, params):
    def conv(x, w_hwio, pad, dil):
        return jax.lax.conv_general_dilated(
            x, w_hwio, window_strides=(1, 1),
            padding=((pad, pad), (pad, pad)),
            rhs_dilation=(dil, dil),
            dimension_numbers=("NCHW", "HWIO", "NCHW"))

    def bn(x, g, b, m, v, eps=1e-5):
        g, b, m, v = (a.reshape(1, -1, 1, 1) for a in (g, b, m, v))
        return (x - m) / jnp.sqrt(v + eps) * g + b

    out = conv(x_nchw, params["w1"], 1, 1)
    out = jax.nn.relu(bn(out, params["bn1_gamma"], params["bn1_beta"],
                         params["bn1_mean"], params["bn1_var"]))
    out = conv(out, params["w2"], 2, 2)
    out = bn(out, params["bn2_gamma"], params["bn2_beta"],
             params["bn2_mean"], params["bn2_var"])
    return jax.nn.relu(out + x_nchw)


# ----------------------------------------------------------------------------
# Main
# ----------------------------------------------------------------------------
if __name__ == "__main__":
    N, C, H, W = 2, 8, 16, 16          # inplanes == planes == 8 (downsample=None)
    key = jax.random.PRNGKey(0)
    ks = jax.random.split(key, 10)

    x = jax.random.normal(ks[0], (N, C, H, W), jnp.float32)

    params = {
        # weights stored HWIO (3,3,Cin,Cout)
        "w1": jax.random.normal(ks[1], (3, 3, C, C), jnp.float32) * 0.1,
        "w2": jax.random.normal(ks[2], (3, 3, C, C), jnp.float32) * 0.1,
        "bn1_gamma": 1.0 + 0.1 * jax.random.normal(ks[3], (C,), jnp.float32),
        "bn1_beta": 0.1 * jax.random.normal(ks[4], (C,), jnp.float32),
        "bn1_mean": 0.1 * jax.random.normal(ks[5], (C,), jnp.float32),
        "bn1_var": 0.5 + jnp.abs(jax.random.normal(ks[6], (C,), jnp.float32)),
        "bn2_gamma": 1.0 + 0.1 * jax.random.normal(ks[7], (C,), jnp.float32),
        "bn2_beta": 0.1 * jax.random.normal(ks[8], (C,), jnp.float32),
        "bn2_mean": jnp.zeros((C,), jnp.float32),
        "bn2_var": jnp.ones((C,), jnp.float32),
    }

    out = jax.block_until_ready(basic_block_dilated(x, params))
    ref = jax.block_until_ready(_ref_forward(x, params))

    assert out.shape == (N, C, H, W), out.shape
    np.testing.assert_allclose(np.asarray(out), np.asarray(ref),
                               rtol=1e-4, atol=1e-4)
    print("KERNEL_OK")
</pallas_src>

<mosaic_0001>
module attributes {stable_mosaic.version = 11 : i64} {
  func.func @_basic_block_kernel(%arg0: i32, %arg1: memref<1x16x16x8xf32, #tpu.memory_space<vmem>>, %arg2: memref<9x8x8xf32, #tpu.memory_space<vmem>>, %arg3: memref<1x8xf32, #tpu.memory_space<vmem>>, %arg4: memref<9x8x8xf32, #tpu.memory_space<vmem>>, %arg5: memref<1x8xf32, #tpu.memory_space<vmem>>, %arg6: memref<1x16x16x8xf32, #tpu.memory_space<vmem>>, %arg7: memref<18x32x8xf32, #tpu.memory_space<vmem>>, %arg8: memref<20x32x8xf32, #tpu.memory_space<vmem>>) attributes {dimension_semantics = [#tpu.dimension_semantics<parallel>], iteration_bounds = array<i64: 2>, scalar_prefetch = 0 : i64, scratch_operands = 2 : i64, tpu.core_type = #tpu.core_type<tc>, window_params = [{transform_indices = @transform_0, window_bounds = array<i64: 1, 16, 16, 8>}, {pipeline_mode = #tpu.pipeline_mode<synchronous>, transform_indices = @transform_1, window_bounds = array<i64: 9, 8, 8>}, {pipeline_mode = #tpu.pipeline_mode<synchronous>, transform_indices = @transform_2, window_bounds = array<i64: 1, 8>}, {pipeline_mode = #tpu.pipeline_mode<synchronous>, transform_indices = @transform_3, window_bounds = array<i64: 9, 8, 8>}, {pipeline_mode = #tpu.pipeline_mode<synchronous>, transform_indices = @transform_4, window_bounds = array<i64: 1, 8>}, {transform_indices = @transform_5, window_bounds = array<i64: 1, 16, 16, 8>}]} {
    %c0 = arith.constant 0 : index
    %c0_0 = arith.constant 0 : index
    %c0_1 = arith.constant 0 : index
    %c0_2 = arith.constant 0 : index
    %0 = vector.load %arg1[%c0, %c0_0, %c0_1, %c0_2] : memref<1x16x16x8xf32, #tpu.memory_space<vmem>>, vector<1x16x16x8xf32>
    %1 = vector.shape_cast %0 : vector<1x16x16x8xf32> to vector<16x16x8xf32>
    %cst = arith.constant 0.000000e+00 : f32
    %2 = vector.broadcast %cst : f32 to vector<18x32x8xf32>
    %c0_3 = arith.constant 0 : index
    %c0_4 = arith.constant 0 : index
    %c0_5 = arith.constant 0 : index
    %3 = vector.load %arg7[%c0_3, %c0_4, %c0_5] : memref<18x32x8xf32, #tpu.memory_space<vmem>>, vector<18x32x8xf32>
    tpu.vector_store %arg7[%c0_3, %c0_4, %c0_5], %2 {strides = array<i32>} : memref<18x32x8xf32, #tpu.memory_space<vmem>>, vector<18x32x8xf32>,
    %c1 = arith.constant 1 : index
    %c8 = arith.constant 8 : index
    %c0_6 = arith.constant 0 : index
    %4 = vector.load %arg7[%c1, %c8, %c0_6] : memref<18x32x8xf32, #tpu.memory_space<vmem>>, vector<16x16x8xf32>
    tpu.vector_store %arg7[%c1, %c8, %c0_6], %1 {strides = array<i32>} : memref<18x32x8xf32, #tpu.memory_space<vmem>>, vector<16x16x8xf32>,
    %cst_7 = arith.constant 0.000000e+00 : f32
    %5 = vector.broadcast %cst_7 : f32 to vector<256x8xf32>
    %c0_8 = arith.constant 0 : index
    %c7 = arith.constant 7 : index
    %c0_9 = arith.constant 0 : index
    %6 = vector.load %arg7[%c0_8, %c7, %c0_9] : memref<18x32x8xf32, #tpu.memory_space<vmem>>, vector<16x16x8xf32>
    %7 = vector.shape_cast %6 : vector<16x16x8xf32> to vector<256x8xf32>
    %c0_10 = arith.constant 0 : index
    %c0_11 = arith.constant 0 : index
    %c0_12 = arith.constant 0 : index
    %8 = vector.load %arg2[%c0_10, %c0_11, %c0_12] : memref<9x8x8xf32, #tpu.memory_space<vmem>>, vector<1x8x8xf32>
    %9 = vector.shape_cast %8 : vector<1x8x8xf32> to vector<8x8xf32>
    %cst_13 = arith.constant dense<0.000000e+00> : vector<256x8xf32>
    %10 = tpu.matmul %7, %9, %cst_13 {dimension_numbers = #tpu.dot_dimension_numbers<[1], [0], [0], [1], [0, 0, 1, 1], [], []>} : vector<256x8xf32>, vector<8x8xf32>, vector<256x8xf32> -> vector<256x8xf32>
    %11 = arith.addf %5, %10 : vector<256x8xf32>
    %c0_14 = arith.constant 0 : index
    %c8_15 = arith.constant 8 : index
    %c0_16 = arith.constant 0 : index
    %12 = vector.load %arg7[%c0_14, %c8_15, %c0_16] : memref<18x32x8xf32, #tpu.memory_space<vmem>>, vector<16x16x8xf32>
    %13 = vector.shape_cast %12 : vector<16x16x8xf32> to vector<256x8xf32>
    %c1_17 = arith.constant 1 : index
    %c0_18 = arith.constant 0 : index
    %c0_19 = arith.constant 0 : index
    %14 = vector.load %arg2[%c1_17, %c0_18, %c0_19] : memref<9x8x8xf32, #tpu.memory_space<vmem>>, vector<1x8x8xf32>
    %15 = vector.shape_cast %14 : vector<1x8x8xf32> to vector<8x8xf32>
    %cst_20 = arith.constant dense<0.000000e+00> : vector<256x8xf32>
    %16 = tpu.matmul %13, %15, %cst_20 {dimension_numbers = #tpu.dot_dimension_numbers<[1], [0], [0], [1], [0, 0, 1, 1], [], []>} : vector<256x8xf32>, vector<8x8xf32>, vector<256x8xf32> -> vector<256x8xf32>
    %17 = arith.addf %11, %16 : vector<256x8xf32>
    %c0_21 = arith.constant 0 : index
    %c9 = arith.constant 9 : index
    %c0_22 = arith.constant 0 : index
    %18 = vector.load %arg7[%c0_21, %c9, %c0_22] : memref<18x32x8xf32, #tpu.memory_space<vmem>>, vector<16x16x8xf32>
    %19 = vector.shape_cast %18 : vector<16x16x8xf32> to vector<256x8xf32>
    %c2 = arith.constant 2 : index
    %c0_23 = arith.constant 0 : index
    %c0_24 = arith.constant 0 : index
    %20 = vector.load %arg2[%c2, %c0_23, %c0_24] : memref<9x8x8xf32, #tpu.memory_space<vmem>>, vector<1x8x8xf32>
    %21 = vector.shape_cast %20 : vector<1x8x8xf32> to vector<8x8xf32>
    %cst_25 = arith.constant dense<0.000000e+00> : vector<256x8xf32>
    %22 = tpu.matmul %19, %21, %cst_25 {dimension_numbers = #tpu.dot_dimension_numbers<[1], [0], [0], [1], [0, 0, 1, 1], [], []>} : vector<256x8xf32>, vector<8x8xf32>, vector<256x8xf32> -> vector<256x8xf32>
    %23 = arith.addf %17, %22 : vector<256x8xf32>
    %c1_26 = arith.constant 1 : index
    %c7_27 = arith.constant 7 : index
    %c0_28 = arith.constant 0 : index
    %24 = vector.load %arg7[%c1_26, %c7_27, %c0_28] : memref<18x32x8xf32, #tpu.memory_space<vmem>>, vector<16x16x8xf32>
    %25 = vector.shape_cast %24 : vector<16x16x8xf32> to vector<256x8xf32>
    %c3 = arith.constant 3 : index
    %c0_29 = arith.constant 0 : index
    %c0_30 = arith.constant 0 : index
    %26 = vector.load %arg2[%c3, %c0_29, %c0_30] : memref<9x8x8xf32, #tpu.memory_space<vmem>>, vector<1x8x8xf32>
    %27 = vector.shape_cast %26 : vector<1x8x8xf32> to vector<8x8xf32>
    %cst_31 = arith.constant dense<0.000000e+00> : vector<256x8xf32>
    %28 = tpu.matmul %25, %27, %cst_31 {dimension_numbers = #tpu.dot_dimension_numbers<[1], [0], [0], [1], [0, 0, 1, 1], [], []>} : vector<256x8xf32>, vector<8x8xf32>, vector<256x8xf32> -> vector<256x8xf32>
    %29 = arith.addf %23, %28 : vector<256x8xf32>
    %c1_32 = arith.constant 1 : index
    %c8_33 = arith.constant 8 : index
    %c0_34 = arith.constant 0 : index
    %30 = vector.load %arg7[%c1_32, %c8_33, %c0_34] : memref<18x32x8xf32, #tpu.memory_space<vmem>>, vector<16x16x8xf32>
    %31 = vector.shape_cast %30 : vector<16x16x8xf32> to vector<256x8xf32>
    %c4 = arith.constant 4 : index
    %c0_35 = arith.constant 0 : index
    %c0_36 = arith.constant 0 : index
    %32 = vector.load %arg2[%c4, %c0_35, %c0_36] : memref<9x8x8xf32, #tpu.memory_space<vmem>>, vector<1x8x8xf32>
    %33 = vector.shape_cast %32 : vector<1x8x8xf32> to vector<8x8xf32>
    %cst_37 = arith.constant dense<0.000000e+00> : vector<256x8xf32>
    %34 = tpu.matmul %31, %33, %cst_37 {dimension_numbers = #tpu.dot_dimension_numbers<[1], [0], [0], [1], [0, 0, 1, 1], [], []>} : vector<256x8xf32>, vector<8x8xf32>, vector<256x8xf32> -> vector<256x8xf32>
    %35 = arith.addf %29, %34 : vector<256x8xf32>
    %c1_38 = arith.constant 1 : index
    %c9_39 = arith.constant 9 : index
    %c0_40 = arith.constant 0 : index
    %36 = vector.load %arg7[%c1_38, %c9_39, %c0_40] : memref<18x32x8xf32, #tpu.memory_space<vmem>>, vector<16x16x8xf32>
    %37 = vector.shape_cast %36 : vector<16x16x8xf32> to vector<256x8xf32>
    %c5 = arith.constant 5 : index
    %c0_41 = arith.constant 0 : index
    %c0_42 = arith.constant 0 : index
    %38 = vector.load %arg2[%c5, %c0_41, %c0_42] : memref<9x8x8xf32, #tpu.memory_space<vmem>>, vector<1x8x8xf32>
    %39 = vector.shape_cast %38 : vector<1x8x8xf32> to vector<8x8xf32>
    %cst_43 = arith.constant dense<0.000000e+00> : vector<256x8xf32>
    %40 = tpu.matmul %37, %39, %cst_43 {dimension_numbers = #tpu.dot_dimension_numbers<[1], [0], [0], [1], [0, 0, 1, 1], [], []>} : vector<256x8xf32>, vector<8x8xf32>, vector<256x8xf32> -> vector<256x8xf32>
    %41 = arith.addf %35, %40 : vector<256x8xf32>
    %c2_44 = arith.constant 2 : index
    %c7_45 = arith.constant 7 : index
    %c0_46 = arith.constant 0 : index
    %42 = vector.load %arg7[%c2_44, %c7_45, %c0_46] : memref<18x32x8xf32, #tpu.memory_space<vmem>>, vector<16x16x8xf32>
    %43 = vector.shape_cast %42 : vector<16x16x8xf32> to vector<256x8xf32>
    %c6 = arith.constant 6 : index
    %c0_47 = arith.constant 0 : index
    %c0_48 = arith.constant 0 : index
    %44 = vector.load %arg2[%c6, %c0_47, %c0_48] : memref<9x8x8xf32, #tpu.memory_space<vmem>>, vector<1x8x8xf32>
    %45 = vector.shape_cast %44 : vector<1x8x8xf32> to vector<8x8xf32>
    %cst_49 = arith.constant dense<0.000000e+00> : vector<256x8xf32>
    %46 = tpu.matmul %43, %45, %cst_49 {dimension_numbers = #tpu.dot_dimension_numbers<[1], [0], [0], [1], [0, 0, 1, 1], [], []>} : vector<256x8xf32>, vector<8x8xf32>, vector<256x8xf32> -> vector<256x8xf32>
    %47 = arith.addf %41, %46 : vector<256x8xf32>
    %c2_50 = arith.constant 2 : index
    %c8_51 = arith.constant 8 : index
    %c0_52 = arith.constant 0 : index
    %48 = vector.load %arg7[%c2_50, %c8_51, %c0_52] : memref<18x32x8xf32, #tpu.memory_space<vmem>>, vector<16x16x8xf32>
    %49 = vector.shape_cast %48 : vector<16x16x8xf32> to vector<256x8xf32>
    %c7_53 = arith.constant 7 : index
    %c0_54 = arith.constant 0 : index
    %c0_55 = arith.constant 0 : index
    %50 = vector.load %arg2[%c7_53, %c0_54, %c0_55] : memref<9x8x8xf32, #tpu.memory_space<vmem>>, vector<1x8x8xf32>
    %51 = vector.shape_cast %50 : vector<1x8x8xf32> to vector<8x8xf32>
    %cst_56 = arith.constant dense<0.000000e+00> : vector<256x8xf32>
    %52 = tpu.matmul %49, %51, %cst_56 {dimension_numbers = #tpu.dot_dimension_numbers<[1], [0], [0], [1], [0, 0, 1, 1], [], []>} : vector<256x8xf32>, vector<8x8xf32>, vector<256x8xf32> -> vector<256x8xf32>
    %53 = arith.addf %47, %52 : vector<256x8xf32>
    %c2_57 = arith.constant 2 : index
    %c9_58 = arith.constant 9 : index
    %c0_59 = arith.constant 0 : index
    %54 = vector.load %arg7[%c2_57, %c9_58, %c0_59] : memref<18x32x8xf32, #tpu.memory_space<vmem>>, vector<16x16x8xf32>
    %55 = vector.shape_cast %54 : vector<16x16x8xf32> to vector<256x8xf32>
    %c8_60 = arith.constant 8 : index
    %c0_61 = arith.constant 0 : index
    %c0_62 = arith.constant 0 : index
    %56 = vector.load %arg2[%c8_60, %c0_61, %c0_62] : memref<9x8x8xf32, #tpu.memory_space<vmem>>, vector<1x8x8xf32>
    %57 = vector.shape_cast %56 : vector<1x8x8xf32> to vector<8x8xf32>
    %cst_63 = arith.constant dense<0.000000e+00> : vector<256x8xf32>
    %58 = tpu.matmul %55, %57, %cst_63 {dimension_numbers = #tpu.dot_dimension_numbers<[1], [0], [0], [1], [0, 0, 1, 1], [], []>} : vector<256x8xf32>, vector<8x8xf32>, vector<256x8xf32> -> vector<256x8xf32>
    %59 = arith.addf %53, %58 : vector<256x8xf32>
    %c0_64 = arith.constant 0 : index
    %c0_65 = arith.constant 0 : index
    %60 = vector.load %arg3[%c0_64, %c0_65] : memref<1x8xf32, #tpu.memory_space<vmem>>, vector<1x8xf32>
    %61 = vector.shape_cast %60 : vector<1x8xf32> to vector<8xf32>
    %62 = vector.shape_cast %61 : vector<8xf32> to vector<1x8xf32>
    %63 = vector.broadcast %62 : vector<1x8xf32> to vector<256x8xf32>
    %64 = arith.addf %59, %63 : vector<256x8xf32>
    %cst_66 = arith.constant 0.000000e+00 : f32
    %65 = vector.broadcast %cst_66 : f32 to vector<256x8xf32>
    %66 = arith.maximumf %64, %65 : vector<256x8xf32>
    %cst_67 = arith.constant 0.000000e+00 : f32
    %67 = vector.broadcast %cst_67 : f32 to vector<20x32x8xf32>
    %c0_68 = arith.constant 0 : index
    %c0_69 = arith.constant 0 : index
    %c0_70 = arith.constant 0 : index
    %68 = vector.load %arg8[%c0_68, %c0_69, %c0_70] : memref<20x32x8xf32, #tpu.memory_space<vmem>>, vector<20x32x8xf32>
    tpu.vector_store %arg8[%c0_68, %c0_69, %c0_70], %67 {strides = array<i32>} : memref<20x32x8xf32, #tpu.memory_space<vmem>>, vector<20x32x8xf32>,
    %69 = vector.shape_cast %66 : vector<256x8xf32> to vector<16x16x8xf32>
    %c2_71 = arith.constant 2 : index
    %c8_72 = arith.constant 8 : index
    %c0_73 = arith.constant 0 : index
    %70 = vector.load %arg8[%c2_71, %c8_72, %c0_73] : memref<20x32x8xf32, #tpu.memory_space<vmem>>, vector<16x16x8xf32>
    tpu.vector_store %arg8[%c2_71, %c8_72, %c0_73], %69 {strides = array<i32>} : memref<20x32x8xf32, #tpu.memory_space<vmem>>, vector<16x16x8xf32>,
    %cst_74 = arith.constant 0.000000e+00 : f32
    %71 = vector.broadcast %cst_74 : f32 to vector<256x8xf32>
    %c0_75 = arith.constant 0 : index
    %c6_76 = arith.constant 6 : index
    %c0_77 = arith.constant 0 : index
    %72 = vector.load %arg8[%c0_75, %c6_76, %c0_77] : memref<20x32x8xf32, #tpu.memory_space<vmem>>, vector<16x16x8xf32>
    %73 = vector.shape_cast %72 : vector<16x16x8xf32> to vector<256x8xf32>
    %c0_78 = arith.constant 0 : index
    %c0_79 = arith.constant 0 : index
    %c0_80 = arith.constant 0 : index
    %74 = vector.load %arg4[%c0_78, %c0_79, %c0_80] : memref<9x8x8xf32, #tpu.memory_space<vmem>>, vector<1x8x8xf32>
    %75 = vector.shape_cast %74 : vector<1x8x8xf32> to vector<8x8xf32>
    %cst_81 = arith.constant dense<0.000000e+00> : vector<256x8xf32>
    %76 = tpu.matmul %73, %75, %cst_81 {dimension_numbers = #tpu.dot_dimension_numbers<[1], [0], [0], [1], [0, 0, 1, 1], [], []>} : vector<256x8xf32>, vector<8x8xf32>, vector<256x8xf32> -> vector<256x8xf32>
    %77 = arith.addf %71, %76 : vector<256x8xf32>
    %c0_82 = arith.constant 0 : index
    %c8_83 = arith.constant 8 : index
    %c0_84 = arith.constant 0 : index
    %78 = vector.load %arg8[%c0_82, %c8_83, %c0_84] : memref<20x32x8xf32, #tpu.memory_space<vmem>>, vector<16x16x8xf32>
    %79 = vector.shape_cast %78 : vector<16x16x8xf32> to vector<256x8xf32>
    %c1_85 = arith.constant 1 : index
    %c0_86 = arith.constant 0 : index
    %c0_87 = arith.constant 0 : index
    %80 = vector.load %arg4[%c1_85, %c0_86, %c0_87] : memref<9x8x8xf32, #tpu.memory_space<vmem>>, vector<1x8x8xf32>
    %81 = vector.shape_cast %80 : vector<1x8x8xf32> to vector<8x8xf32>
    %cst_88 = arith.constant dense<0.000000e+00> : vector<256x8xf32>
    %82 = tpu.matmul %79, %81, %cst_88 {dimension_numbers = #tpu.dot_dimension_numbers<[1], [0], [0], [1], [0, 0, 1, 1], [], []>} : vector<256x8xf32>, vector<8x8xf32>, vector<256x8xf32> -> vector<256x8xf32>
    %83 = arith.addf %77, %82 : vector<256x8xf32>
    %c0_89 = arith.constant 0 : index
    %c10 = arith.constant 10 : index
    %c0_90 = arith.constant 0 : index
    %84 = vector.load %arg8[%c0_89, %c10, %c0_90] : memref<20x32x8xf32, #tpu.memory_space<vmem>>, vector<16x16x8xf32>
    %85 = vector.shape_cast %84 : vector<16x16x8xf32> to vector<256x8xf32>
    %c2_91 = arith.constant 2 : index
    %c0_92 = arith.constant 0 : index
    %c0_93 = arith.constant 0 : index
    %86 = vector.load %arg4[%c2_91, %c0_92, %c0_93] : memref<9x8x8xf32, #tpu.memory_space<vmem>>, vector<1x8x8xf32>
    %87 = vector.shape_cast %86 : vector<1x8x8xf32> to vector<8x8xf32>
    %cst_94 = arith.constant dense<0.000000e+00> : vector<256x8xf32>
    %88 = tpu.matmul %85, %87, %cst_94 {dimension_numbers = #tpu.dot_dimension_numbers<[1], [0], [0], [1], [0, 0, 1, 1], [], []>} : vector<256x8xf32>, vector<8x8xf32>, vector<256x8xf32> -> vector<256x8xf32>
    %89 = arith.addf %83, %88 : vector<256x8xf32>
    %c2_95 = arith.constant 2 : index
    %c6_96 = arith.constant 6 : index
    %c0_97 = arith.constant 0 : index
    %90 = vector.load %arg8[%c2_95, %c6_96, %c0_97] : memref<20x32x8xf32, #tpu.memory_space<vmem>>, vector<16x16x8xf32>
    %91 = vector.shape_cast %90 : vector<16x16x8xf32> to vector<256x8xf32>
    %c3_98 = arith.constant 3 : index
    %c0_99 = arith.constant 0 : index
    %c0_100 = arith.constant 0 : index
    %92 = vector.load %arg4[%c3_98, %c0_99, %c0_100] : memref<9x8x8xf32, #tpu.memory_space<vmem>>, vector<1x8x8xf32>
    %93 = vector.shape_cast %92 : vector<1x8x8xf32> to vector<8x8xf32>
    %cst_101 = arith.constant dense<0.000000e+00> : vector<256x8xf32>
    %94 = tpu.matmul %91, %93, %cst_101 {dimension_numbers = #tpu.dot_dimension_numbers<[1], [0], [0], [1], [0, 0, 1, 1], [], []>} : vector<256x8xf32>, vector<8x8xf32>, vector<256x8xf32> -> vector<256x8xf32>
    %95 = arith.addf %89, %94 : vector<256x8xf32>
    %c2_102 = arith.constant 2 : index
    %c8_103 = arith.constant 8 : index
    %c0_104 = arith.constant 0 : index
    %96 = vector.load %arg8[%c2_102, %c8_103, %c0_104] : memref<20x32x8xf32, #tpu.memory_space<vmem>>, vector<16x16x8xf32>
    %97 = vector.shape_cast %96 : vector<16x16x8xf32> to vector<256x8xf32>
    %c4_105 = arith.constant 4 : index
    %c0_106 = arith.constant 0 : index
    %c0_107 = arith.constant 0 : index
    %98 = vector.load %arg4[%c4_105, %c0_106, %c0_107] : memref<9x8x8xf32, #tpu.memory_space<vmem>>, vector<1x8x8xf32>
    %99 = vector.shape_cast %98 : vector<1x8x8xf32> to vector<8x8xf32>
    %cst_108 = arith.constant dense<0.000000e+00> : vector<256x8xf32>
    %100 = tpu.matmul %97, %99, %cst_108 {dimension_numbers = #tpu.dot_dimension_numbers<[1], [0], [0], [1], [0, 0, 1, 1], [], []>} : vector<256x8xf32>, vector<8x8xf32>, vector<256x8xf32> -> vector<256x8xf32>
    %101 = arith.addf %95, %100 : vector<256x8xf32>
    %c2_109 = arith.constant 2 : index
    %c10_110 = arith.constant 10 : index
    %c0_111 = arith.constant 0 : index
    %102 = vector.load %arg8[%c2_109, %c10_110, %c0_111] : memref<20x32x8xf32, #tpu.memory_space<vmem>>, vector<16x16x8xf32>
    %103 = vector.shape_cast %102 : vector<16x16x8xf32> to vector<256x8xf32>
    %c5_112 = arith.constant 5 : index
    %c0_113 = arith.constant 0 : index
    %c0_114 = arith.constant 0 : index
    %104 = vector.load %arg4[%c5_112, %c0_113, %c0_114] : memref<9x8x8xf32, #tpu.memory_space<vmem>>, vector<1x8x8xf32>
    %105 = vector.shape_cast %104 : vector<1x8x8xf32> to vector<8x8xf32>
    %cst_115 = arith.constant dense<0.000000e+00> : vector<256x8xf32>
    %106 = tpu.matmul %103, %105, %cst_115 {dimension_numbers = #tpu.dot_dimension_numbers<[1], [0], [0], [1], [0, 0, 1, 1], [], []>} : vector<256x8xf32>, vector<8x8xf32>, vector<256x8xf32> -> vector<256x8xf32>
    %107 = arith.addf %101, %106 : vector<256x8xf32>
    %c4_116 = arith.constant 4 : index
    %c6_117 = arith.constant 6 : index
    %c0_118 = arith.constant 0 : index
    %108 = vector.load %arg8[%c4_116, %c6_117, %c0_118] : memref<20x32x8xf32, #tpu.memory_space<vmem>>, vector<16x16x8xf32>
    %109 = vector.shape_cast %108 : vector<16x16x8xf32> to vector<256x8xf32>
    %c6_119 = arith.constant 6 : index
    %c0_120 = arith.constant 0 : index
    %c0_121 = arith.constant 0 : index
    %110 = vector.load %arg4[%c6_119, %c0_120, %c0_121] : memref<9x8x8xf32, #tpu.memory_space<vmem>>, vector<1x8x8xf32>
    %111 = vector.shape_cast %110 : vector<1x8x8xf32> to vector<8x8xf32>
    %cst_122 = arith.constant dense<0.000000e+00> : vector<256x8xf32>
    %112 = tpu.matmul %109, %111, %cst_122 {dimension_numbers = #tpu.dot_dimension_numbers<[1], [0], [0], [1], [0, 0, 1, 1], [], []>} : vector<256x8xf32>, vector<8x8xf32>, vector<256x8xf32> -> vector<256x8xf32>
    %113 = arith.addf %107, %112 : vector<256x8xf32>
    %c4_123 = arith.constant 4 : index
    %c8_124 = arith.constant 8 : index
    %c0_125 = arith.constant 0 : index
    %114 = vector.load %arg8[%c4_123, %c8_124, %c0_125] : memref<20x32x8xf32, #tpu.memory_space<vmem>>, vector<16x16x8xf32>
    %115 = vector.shape_cast %114 : vector<16x16x8xf32> to vector<256x8xf32>
    %c7_126 = arith.constant 7 : index
    %c0_127 = arith.constant 0 : index
    %c0_128 = arith.constant 0 : index
    %116 = vector.load %arg4[%c7_126, %c0_127, %c0_128] : memref<9x8x8xf32, #tpu.memory_space<vmem>>, vector<1x8x8xf32>
    %117 = vector.shape_cast %116 : vector<1x8x8xf32> to vector<8x8xf32>
    %cst_129 = arith.constant dense<0.000000e+00> : vector<256x8xf32>
    %118 = tpu.matmul %115, %117, %cst_129 {dimension_numbers = #tpu.dot_dimension_numbers<[1], [0], [0], [1], [0, 0, 1, 1], [], []>} : vector<256x8xf32>, vector<8x8xf32>, vector<256x8xf32> -> vector<256x8xf32>
    %119 = arith.addf %113, %118 : vector<256x8xf32>
    %c4_130 = arith.constant 4 : index
    %c10_131 = arith.constant 10 : index
    %c0_132 = arith.constant 0 : index
    %120 = vector.load %arg8[%c4_130, %c10_131, %c0_132] : memref<20x32x8xf32, #tpu.memory_space<vmem>>, vector<16x16x8xf32>
    %121 = vector.shape_cast %120 : vector<16x16x8xf32> to vector<256x8xf32>
    %c8_133 = arith.constant 8 : index
    %c0_134 = arith.constant 0 : index
    %c0_135 = arith.constant 0 : index
    %122 = vector.load %arg4[%c8_133, %c0_134, %c0_135] : memref<9x8x8xf32, #tpu.memory_space<vmem>>, vector<1x8x8xf32>
    %123 = vector.shape_cast %122 : vector<1x8x8xf32> to vector<8x8xf32>
    %cst_136 = arith.constant dense<0.000000e+00> : vector<256x8xf32>
    %124 = tpu.matmul %121, %123, %cst_136 {dimension_numbers = #tpu.dot_dimension_numbers<[1], [0], [0], [1], [0, 0, 1, 1], [], []>} : vector<256x8xf32>, vector<8x8xf32>, vector<256x8xf32> -> vector<256x8xf32>
    %125 = arith.addf %119, %124 : vector<256x8xf32>
    %c0_137 = arith.constant 0 : index
    %c0_138 = arith.constant 0 : index
    %126 = vector.load %arg5[%c0_137, %c0_138] : memref<1x8xf32, #tpu.memory_space<vmem>>, vector<1x8xf32>
    %127 = vector.shape_cast %126 : vector<1x8xf32> to vector<8xf32>
    %128 = vector.shape_cast %127 : vector<8xf32> to vector<1x8xf32>
    %129 = vector.broadcast %128 : vector<1x8xf32> to vector<256x8xf32>
    %130 = arith.addf %125, %129 : vector<256x8xf32>
    %131 = vector.shape_cast %1 : vector<16x16x8xf32> to vector<256x8xf32>
    %132 = arith.addf %130, %131 : vector<256x8xf32>
    %cst_139 = arith.constant 0.000000e+00 : f32
    %133 = vector.broadcast %cst_139 : f32 to vector<256x8xf32>
    %134 = arith.maximumf %132, %133 : vector<256x8xf32>
    %135 = vector.shape_cast %134 : vector<256x8xf32> to vector<1x16x16x8xf32>
    %c0_140 = arith.constant 0 : index
    %c0_141 = arith.constant 0 : index
    %c0_142 = arith.constant 0 : index
    %c0_143 = arith.constant 0 : index
    %136 = vector.load %arg6[%c0_140, %c0_141, %c0_142, %c0_143] : memref<1x16x16x8xf32, #tpu.memory_space<vmem>>, vector<1x16x16x8xf32>
    tpu.vector_store %arg6[%c0_140, %c0_141, %c0_142, %c0_143], %135 {strides = array<i32>} : memref<1x16x16x8xf32, #tpu.memory_space<vmem>>, vector<1x16x16x8xf32>,
    return
  }
  func.func @transform_0(%arg0: i32) -> (i32, i32, i32, i32) {
    %c0_i32 = arith.constant 0 : i32
    %c0_i32_0 = arith.constant 0 : i32
    %c0_i32_1 = arith.constant 0 : i32
    %c0_i32_2 = arith.constant 0 : i32
    return %arg0, %c0_i32, %c0_i32_0, %c0_i32_1 : i32, i32, i32, i32
  }
  func.func @transform_1(%arg0: i32) -> (i32, i32, i32) {
    %c0_i32 = arith.constant 0 : i32
    %c0_i32_0 = arith.constant 0 : i32
    %c0_i32_1 = arith.constant 0 : i32
    %c0_i32_2 = arith.constant 0 : i32
    return %c0_i32, %c0_i32_0, %c0_i32_1 : i32, i32, i32
  }
  func.func @transform_2(%arg0: i32) -> (i32, i32) {
    %c0_i32 = arith.constant 0 : i32
    %c0_i32_0 = arith.constant 0 : i32
    %c0_i32_1 = arith.constant 0 : i32
    return %c0_i32, %c0_i32_0 : i32, i32
  }
  func.func @transform_3(%arg0: i32) -> (i32, i32, i32) {
    %c0_i32 = arith.constant 0 : i32
    %c0_i32_0 = arith.constant 0 : i32
    %c0_i32_1 = arith.constant 0 : i32
    %c0_i32_2 = arith.constant 0 : i32
    return %c0_i32, %c0_i32_0, %c0_i32_1 : i32, i32, i32
  }
  func.func @transform_4(%arg0: i32) -> (i32, i32) {
    %c0_i32 = arith.constant 0 : i32
    %c0_i32_0 = arith.constant 0 : i32
    %c0_i32_1 = arith.constant 0 : i32
    return %c0_i32, %c0_i32_0 : i32, i32
  }
  func.func @transform_5(%arg0: i32) -> (i32, i32, i32, i32) {
    %c0_i32 = arith.constant 0 : i32
    %c0_i32_0 = arith.constant 0 : i32
    %c0_i32_1 = arith.constant 0 : i32
    %c0_i32_2 = arith.constant 0 : i32
    return %arg0, %c0_i32, %c0_i32_0, %c0_i32_1 : i32, i32, i32, i32
  }
}

</mosaic_0001>

<bundles_post_ra>
// kernel: tpu_custom_call.1
= control target key start
LH: loop header
LB: loop body
LE: loop exit
PB: predicated region body
PF: predicated region fallthrough
CT: control target
= control target key end

     0   :  { %s10236_s18 = smov 0   ;;  %s12516_s0 = inlined_call_operand.vmem [shape: f32[2,16,16,8], index: 0, kind: input, shape index: {}]   ;;  %s12517_s1 = inlined_call_operand.vmem [shape: f32[9,8,8], index: 1, kind: input, shape index: {}]   ;;  %s12518_s2 = inlined_call_operand.vmem [shape: f32[1,8], index: 2, kind: input, shape index: {}]   ;;  %s12519_s3 = inlined_call_operand.vmem [shape: f32[9,8,8], index: 3, kind: input, shape index: {}]   ;;  %s12520_s4 = inlined_call_operand.vmem [shape: f32[1,8], index: 4, kind: input, shape index: {}]   ;;  %s12521_s5 = inlined_call_operand.vmem [shape: f32[2,16,16,8], index: 5, kind: output, shape index: {}]  }
   0x1 LB: > { %s7575_s19 = sadd.s32 4294967295, %s10203_s18   ;;  %p7579_p0 = scmp.ge.s32.totalorder %s10203_s18, 1  ;;  %s10203_s18 = sphi %s10236_s18, %s15_s18  }
   0x2   : > { %p187_p1 = scmp.lt.s32.totalorder %s10203_s18, 3 }
   0x4   : > { %p188_p2 = pnand %p7579_p0, %p187_p1 }
   0x6   : > { %191 = sbr.rel (%p188_p2) target bundleno = 1618 (0x652), region = 40 }
   0xd   : > { %v10247_v0 = vld [vmem:[%s12517_s1 + $0x8] sm:$0xff]  ;;  %vm257_vm0 = vcmask 64512   ;;  %v10252_v1 = vld [vmem:[%s12517_s1] sm:$0xff]  ;;  %p10256_p3 = scmp.lt.s32.totalorder %s7575_s19, 1  ;;  %v10205_v2 = vmov 0.0   ;;  %v10608_v9 = vld [vmem:[%s12517_s1 + $0x10] sm:$0xff] }
   0xe   : > { %8776 = vmatprep.subr.mxu0 %v10247_v0  ;;  %259 = vst.msk [vmem:[#allocation2 + $0x8] sm:$0xff] %vm257_vm0, %v10205_v2  ;;  %258 = vst.msk [vmem:[#allocation2] sm:$0xff] %vm257_vm0, %v10205_v2 }
   0xf   : > { %260 = vst.msk [vmem:[#allocation2 + $0x10] sm:$0xff] %vm257_vm0, %v10205_v2  ;;  %261 = vst.msk [vmem:[#allocation2 + $0x18] sm:$0xff] %vm257_vm0, %v10205_v2  ;;  %8777 = vmatpush3.msra.mxu0 %v10247_v0  ;;  %s12868_s19 = smov (!%p10256_p3, %s7575_s19), 1 }
  0x10   : > { %262 = vst.msk [vmem:[#allocation2 + $0x20] sm:$0xff] %vm257_vm0, %v10205_v2  ;;  %263 = vst.msk [vmem:[#allocation2 + $0x28] sm:$0xff] %vm257_vm0, %v10205_v2  ;;  %8826 = vmatprep.subr.mxu0 %v10252_v1  ;;  %s8180_s25 = sshll.u32 %s12868_s19, 8 }
  0x11   : > { %264 = vst.msk [vmem:[#allocation2 + $0x30] sm:$0xff] %vm257_vm0, %v10205_v2  ;;  %265 = vst.msk [vmem:[#allocation2 + $0x38] sm:$0xff] %vm257_vm0, %v10205_v2  ;;  %s10579_s28 = scalar_lea.vmem %s12516_s0, %s8180_s25  ;;  %s12386_s22 = scalar_lea.vmem %s12521_s5, %s8180_s25 }
  0x12   : > { %266 = vst.msk [vmem:[#allocation2 + $0x40] sm:$0xff] %vm257_vm0, %v10205_v2  ;;  %267 = vst.msk [vmem:[#allocation2 + $0x48] sm:$0xff] %vm257_vm0, %v10205_v2  ;;  %v10582_v3 = vld [vmem:[%s10579_s28] sm:$0xff]  ;;  %v10585_v4 = vld [vmem:[%s10579_s28 + $0x8] sm:$0xff] }
  0x13   : > { %268 = vst.msk [vmem:[#allocation2 + $0x50] sm:$0xff] %vm257_vm0, %v10205_v2  ;;  %269 = vst.msk [vmem:[#allocation2 + $0x58] sm:$0xff] %vm257_vm0, %v10205_v2  ;;  %v10588_v5 = vld [vmem:[%s10579_s28 + $0x10] sm:$0xff]  ;;  %v10597_v6 = vld [vmem:[%s10579_s28 + $0x18] sm:$0xff] }
  0x14   : > { %270 = vst.msk [vmem:[#allocation2 + $0x60] sm:$0xff] %vm257_vm0, %v10205_v2  ;;  %271 = vst.msk [vmem:[#allocation2 + $0x68] sm:$0xff] %vm257_vm0, %v10205_v2  ;;  %v10600_v7 = vld [vmem:[%s10579_s28 + $0x20] sm:$0xff]  ;;  %v10603_v8 = vld [vmem:[%s10579_s28 + $0x28] sm:$0xff] }
  0x15   : > { %272 = vst.msk [vmem:[#allocation2 + $0x70] sm:$0xff] %vm257_vm0, %v10205_v2  ;;  %273 = vst.msk [vmem:[#allocation2 + $0x78] sm:$0xff] %vm257_vm0, %v10205_v2  ;;  %v396_v10 = vld [vmem:[#allocation2 + $0x8] sm:$0xff]  ;;  %v10617_v12 = vld [vmem:[%s10579_s28 + $0x30] sm:$0xff] }
  0x16   : > { %274 = vst.msk [vmem:[#allocation2 + $0x80] sm:$0xff] %vm257_vm0, %v10205_v2  ;;  %275 = vst.msk [vmem:[#allocation2 + $0x88] sm:$0xff] %vm257_vm0, %v10205_v2  ;;  %v397_v11 = vld [vmem:[#allocation2 + $0x10] sm:$0xff]  ;;  %8778 = vmatprep.mubr.msk.f32.mxu0 %vm257_vm0, %v396_v10  ;;  %v10623_v13 = vld [vmem:[%s10579_s28 + $0x38] sm:$0xff] }
  0x17   : > { %276 = vst.msk [vmem:[#allocation2 + $0x90] sm:$0xff] %vm257_vm0, %v10205_v2  ;;  %277 = vst.msk [vmem:[#allocation2 + $0x98] sm:$0xff] %vm257_vm0, %v10205_v2  ;;  %v10626_v14 = vld [vmem:[%s10579_s28 + $0x40] sm:$0xff]  ;;  %v10629_v15 = vld [vmem:[%s10579_s28 + $0x48] sm:$0xff]  ;;  %8779 = vmatmul.mubr.msk.f32.vlgmr.msra.gmra.mrb[0].mxu0 %vm257_vm0, %v397_v11 }
  0x18   : > { %278 = vst.msk [vmem:[#allocation2 + $0xa0] sm:$0xff] %vm257_vm0, %v10205_v2  ;;  %279 = vst.msk [vmem:[#allocation2 + $0xa8] sm:$0xff] %vm257_vm0, %v10205_v2  ;;  %v10639_v16 = vld [vmem:[%s10579_s28 + $0x50] sm:$0xff]  ;;  %v10642_v17 = vld [vmem:[%s10579_s28 + $0x58] sm:$0xff]  ;;  %8827 = vmatpush3.msra.mxu0 %v10252_v1 }
  0x19   : > { %280 = vst.msk [vmem:[#allocation2 + $0xb0] sm:$0xff] %vm257_vm0, %v10205_v2  ;;  %281 = vst.msk [vmem:[#allocation2 + $0xb8] sm:$0xff] %vm257_vm0, %v10205_v2  ;;  %v10645_v18 = vld [vmem:[%s10579_s28 + $0x60] sm:$0xff]  ;;  %v10655_v19 = vld [vmem:[%s10579_s28 + $0x68] sm:$0xff]  ;;  %8876 = vmatprep.subr.mxu0 %v10608_v9 }
  0x1a   : > { %282 = vst.msk [vmem:[#allocation2 + $0xc0] sm:$0xff] %vm257_vm0, %v10205_v2  ;;  %283 = vst.msk [vmem:[#allocation2 + $0xc8] sm:$0xff] %vm257_vm0, %v10205_v2  ;;  %v10658_v20 = vld [vmem:[%s10579_s28 + $0x70] sm:$0xff]  ;;  %v10661_v21 = vld [vmem:[%s10579_s28 + $0x78] sm:$0xff] }
  0x1b   : > { %284 = vst.msk [vmem:[#allocation2 + $0xd0] sm:$0xff] %vm257_vm0, %v10205_v2  ;;  %285 = vst.msk [vmem:[#allocation2 + $0xd8] sm:$0xff] %vm257_vm0, %v10205_v2  ;;  %v10670_v22 = vld [vmem:[%s10579_s28 + $0x80] sm:$0xff]  ;;  %v10673_v23 = vld [vmem:[%s10579_s28 + $0x88] sm:$0xff] }
  0x1c   : > { %286 = vst.msk [vmem:[#allocation2 + $0xe0] sm:$0xff] %vm257_vm0, %v10205_v2  ;;  %287 = vst.msk [vmem:[#allocation2 + $0xe8] sm:$0xff] %vm257_vm0, %v10205_v2  ;;  %v10676_v24 = vld [vmem:[%s10579_s28 + $0x90] sm:$0xff]  ;;  %v10686_v25 = vld [vmem:[%s10579_s28 + $0x98] sm:$0xff] }
  0x1d   : > { %288 = vst.msk [vmem:[#allocation2 + $0xf0] sm:$0xff] %vm257_vm0, %v10205_v2  ;;  %289 = vst.msk [vmem:[#allocation2 + $0xf8] sm:$0xff] %vm257_vm0, %v10205_v2  ;;  %v10689_v26 = vld [vmem:[%s10579_s28 + $0xa0] sm:$0xff]  ;;  %v10692_v27 = vld [vmem:[%s10579_s28 + $0xa8] sm:$0xff] }
  0x1e   : > { %290 = vst.msk [vmem:[#allocation2 + $0x100] sm:$0xff] %vm257_vm0, %v10205_v2  ;;  %291 = vst.msk [vmem:[#allocation2 + $0x108] sm:$0xff] %vm257_vm0, %v10205_v2  ;;  %v10711_v31 = vld [vmem:[%s10579_s28 + $0xb0] sm:$0xff]  ;;  %v10714_v32 = vld [vmem:[%s10579_s28 + $0xb8] sm:$0xff] }
  0x1f   : > { %292 = vst.msk [vmem:[#allocation2 + $0x110] sm:$0xff] %vm257_vm0, %v10205_v2  ;;  %293 = vst.msk [vmem:[#allocation2 + $0x118] sm:$0xff] %vm257_vm0, %v10205_v2  ;;  %v10735_v37 = vld [vmem:[%s10579_s28 + $0xc0] sm:$0xff]  ;;  %v10738_v38 = vld [vmem:[%s10579_s28 + $0xc8] sm:$0xff] }
  0x20   : > { %294 = vst.msk [vmem:[#allocation2 + $0x120] sm:$0xff] %vm257_vm0, %v10205_v2  ;;  %295 = vst.msk [vmem:[#allocation2 + $0x128] sm:$0xff] %vm257_vm0, %v10205_v2  ;;  %v10741_v39 = vld [vmem:[%s10579_s28 + $0xd0] sm:$0xff]  ;;  %v10750_v40 = vld [vmem:[%s10579_s28 + $0xd8] sm:$0xff] }
  0x21   : > { %296 = vst.msk [vmem:[#allocation2 + $0x130] sm:$0xff] %vm257_vm0, %v10205_v2  ;;  %297 = vst.msk [vmem:[#allocation2 + $0x138] sm:$0xff] %vm257_vm0, %v10205_v2  ;;  %v10753_v41 = vld [vmem:[%s10579_s28 + $0xe0] sm:$0xff]  ;;  %v10756_v42 = vld [vmem:[%s10579_s28 + $0xe8] sm:$0xff] }
  0x22   : > { %298 = vst.msk [vmem:[#allocation2 + $0x140] sm:$0xff] %vm257_vm0, %v10205_v2  ;;  %299 = vst.msk [vmem:[#allocation2 + $0x148] sm:$0xff] %vm257_vm0, %v10205_v2  ;;  %v364_v10 = vld [vmem:[#allocation2 + $0xf] sm:$0xff] }
  0x23   : > { %300 = vst.msk [vmem:[#allocation2 + $0x150] sm:$0xff] %vm257_vm0, %v10205_v2  ;;  %301 = vst.msk [vmem:[#allocation2 + $0x158] sm:$0xff] %vm257_vm0, %v10205_v2 }
  0x24   : > { %302 = vst.msk [vmem:[#allocation2 + $0x160] sm:$0xff] %vm257_vm0, %v10205_v2  ;;  %303 = vst.msk [vmem:[#allocation2 + $0x168] sm:$0xff] %vm257_vm0, %v10205_v2 }
  0x25   : > { %304 = vst.msk [vmem:[#allocation2 + $0x170] sm:$0xff] %vm257_vm0, %v10205_v2  ;;  %305 = vst.msk [vmem:[#allocation2 + $0x178] sm:$0xff] %vm257_vm0, %v10205_v2 }
  0x26   : > { %306 = vst.msk [vmem:[#allocation2 + $0x180] sm:$0xff] %vm257_vm0, %v10205_v2  ;;  %307 = vst.msk [vmem:[#allocation2 + $0x188] sm:$0xff] %vm257_vm0, %v10205_v2 }
  0x27   : > { %308 = vst.msk [vmem:[#allocation2 + $0x190] sm:$0xff] %vm257_vm0, %v10205_v2  ;;  %309 = vst.msk [vmem:[#allocation2 + $0x198] sm:$0xff] %vm257_vm0, %v10205_v2 }
  0x28   : > { %310 = vst.msk [vmem:[#allocation2 + $0x1a0] sm:$0xff] %vm257_vm0, %v10205_v2  ;;  %311 = vst.msk [vmem:[#allocation2 + $0x1a8] sm:$0xff] %vm257_vm0, %v10205_v2 }
  0x29   : > { %312 = vst.msk [vmem:[#allocation2 + $0x1b0] sm:$0xff] %vm257_vm0, %v10205_v2  ;;  %313 = vst.msk [vmem:[#allocation2 + $0x1b8] sm:$0xff] %vm257_vm0, %v10205_v2 }
  0x2a   : > { %314 = vst.msk [vmem:[#allocation2 + $0x1c0] sm:$0xff] %vm257_vm0, %v10205_v2  ;;  %315 = vst.msk [vmem:[#allocation2 + $0x1c8] sm:$0xff] %vm257_vm0, %v10205_v2 }
  0x2b   : > { %316 = vst.msk [vmem:[#allocation2 + $0x1d0] sm:$0xff] %vm257_vm0, %v10205_v2  ;;  %317 = vst.msk [vmem:[#allocation2 + $0x1d8] sm:$0xff] %vm257_vm0, %v10205_v2 }
  0x2c   : > { %318 = vst.msk [vmem:[#allocation2 + $0x1e0] sm:$0xff] %vm257_vm0, %v10205_v2  ;;  %319 = vst.msk [vmem:[#allocation2 + $0x1e8] sm:$0xff] %vm257_vm0, %v10205_v2 }
  0x2d   : > { %320 = vst.msk [vmem:[#allocation2 + $0x1f0] sm:$0xff] %vm257_vm0, %v10205_v2  ;;  %321 = vst.msk [vmem:[#allocation2 + $0x1f8] sm:$0xff] %vm257_vm0, %v10205_v2 }
  0x2e   : > { %322 = vst.msk [vmem:[#allocation2 + $0x200] sm:$0xff] %vm257_vm0, %v10205_v2  ;;  %323 = vst.msk [vmem:[#allocation2 + $0x208] sm:$0xff] %vm257_vm0, %v10205_v2 }
  0x2f   : > { %324 = vst.msk [vmem:[#allocation2 + $0x210] sm:$0xff] %vm257_vm0, %v10205_v2  ;;  %325 = vst.msk [vmem:[#allocation2 + $0x218] sm:$0xff] %vm257_vm0, %v10205_v2 }
  0x30   : > { %326 = vst.msk [vmem:[#allocation2 + $0x220] sm:$0xff] %vm257_vm0, %v10205_v2  ;;  %327 = vst.msk [vmem:[#allocation2 + $0x228] sm:$0xff] %vm257_vm0, %v10205_v2 }
  0x31   : > { %328 = vst.msk [vmem:[#allocation2 + $0x230] sm:$0xff] %vm257_vm0, %v10205_v2  ;;  %329 = vst.msk [vmem:[#allocation2 + $0x238] sm:$0xff] %vm257_vm0, %v10205_v2 }
  0x32   : > { %3853 = vst.msk [vmem:[#allocation3] sm:$0xff] %vm257_vm0, %v10205_v2  ;;  %3854 = vst.msk [vmem:[#allocation3 + $0x8] sm:$0xff] %vm257_vm0, %v10205_v2 }
  0x33   : > { %3855 = vst.msk [vmem:[#allocation3 + $0x10] sm:$0xff] %vm257_vm0, %v10205_v2  ;;  %3856 = vst.msk [vmem:[#allocation3 + $0x18] sm:$0xff] %vm257_vm0, %v10205_v2 }
  0x34   : > { %3857 = vst.msk [vmem:[#allocation3 + $0x20] sm:$0xff] %vm257_vm0, %v10205_v2  ;;  %3858 = vst.msk [vmem:[#allocation3 + $0x28] sm:$0xff] %vm257_vm0, %v10205_v2 }
  0x35   : > { %3859 = vst.msk [vmem:[#allocation3 + $0x30] sm:$0xff] %vm257_vm0, %v10205_v2  ;;  %3860 = vst.msk [vmem:[#allocation3 + $0x38] sm:$0xff] %vm257_vm0, %v10205_v2 }
  0x36   : > { %3861 = vst.msk [vmem:[#allocation3 + $0x40] sm:$0xff] %vm257_vm0, %v10205_v2  ;;  %3862 = vst.msk [vmem:[#allocation3 + $0x48] sm:$0xff] %vm257_vm0, %v10205_v2 }
  0x37   : > { %3863 = vst.msk [vmem:[#allocation3 + $0x50] sm:$0xff] %vm257_vm0, %v10205_v2  ;;  %3864 = vst.msk [vmem:[#allocation3 + $0x58] sm:$0xff] %vm257_vm0, %v10205_v2 }
  0x38   : > { %3865 = vst.msk [vmem:[#allocation3 + $0x60] sm:$0xff] %vm257_vm0, %v10205_v2  ;;  %3866 = vst.msk [vmem:[#allocation3 + $0x68] sm:$0xff] %vm257_vm0, %v10205_v2 }
  0x39   : > { %3867 = vst.msk [vmem:[#allocation3 + $0x70] sm:$0xff] %vm257_vm0, %v10205_v2  ;;  %3868 = vst.msk [vmem:[#allocation3 + $0x78] sm:$0xff] %vm257_vm0, %v10205_v2 }
  0x3a   : > { %3869 = vst.msk [vmem:[#allocation3 + $0x80] sm:$0xff] %vm257_vm0, %v10205_v2  ;;  %3870 = vst.msk [vmem:[#allocation3 + $0x88] sm:$0xff] %vm257_vm0, %v10205_v2 }
  0x3b   : > { %3871 = vst.msk [vmem:[#allocation3 + $0x90] sm:$0xff] %vm257_vm0, %v10205_v2  ;;  %3872 = vst.msk [vmem:[#allocation3 + $0x98] sm:$0xff] %vm257_vm0, %v10205_v2 }
  0x3c   : > { %3873 = vst.msk [vmem:[#allocation3 + $0xa0] sm:$0xff] %vm257_vm0, %v10205_v2  ;;  %3874 = vst.msk [vmem:[#allocation3 + $0xa8] sm:$0xff] %vm257_vm0, %v10205_v2 }
  0x3d   : > { %3875 = vst.msk [vmem:[#allocation3 + $0xb0] sm:$0xff] %vm257_vm0, %v10205_v2  ;;  %3876 = vst.msk [vmem:[#allocation3 + $0xb8] sm:$0xff] %vm257_vm0, %v10205_v2 }
  0x3e   : > { %3877 = vst.msk [vmem:[#allocation3 + $0xc0] sm:$0xff] %vm257_vm0, %v10205_v2  ;;  %3878 = vst.msk [vmem:[#allocation3 + $0xc8] sm:$0xff] %vm257_vm0, %v10205_v2 }
  0x3f   : > { %3879 = vst.msk [vmem:[#allocation3 + $0xd0] sm:$0xff] %vm257_vm0, %v10205_v2  ;;  %3880 = vst.msk [vmem:[#allocation3 + $0xd8] sm:$0xff] %vm257_vm0, %v10205_v2 }
  0x40   : > { %3881 = vst.msk [vmem:[#allocation3 + $0xe0] sm:$0xff] %vm257_vm0, %v10205_v2  ;;  %3882 = vst.msk [vmem:[#allocation3 + $0xe8] sm:$0xff] %vm257_vm0, %v10205_v2 }
  0x41   : > { %3883 = vst.msk [vmem:[#allocation3 + $0xf0] sm:$0xff] %vm257_vm0, %v10205_v2  ;;  %3884 = vst.msk [vmem:[#allocation3 + $0xf8] sm:$0xff] %vm257_vm0, %v10205_v2 }
  0x42   : > { %3885 = vst.msk [vmem:[#allocation3 + $0x100] sm:$0xff] %vm257_vm0, %v10205_v2  ;;  %3886 = vst.msk [vmem:[#allocation3 + $0x108] sm:$0xff] %vm257_vm0, %v10205_v2 }
  0x43   : > { %3887 = vst.msk [vmem:[#allocation3 + $0x110] sm:$0xff] %vm257_vm0, %v10205_v2  ;;  %3888 = vst.msk [vmem:[#allocation3 + $0x118] sm:$0xff] %vm257_vm0, %v10205_v2 }
  0x44   : > { %3889 = vst.msk [vmem:[#allocation3 + $0x120] sm:$0xff] %vm257_vm0, %v10205_v2  ;;  %3890 = vst.msk [vmem:[#allocation3 + $0x128] sm:$0xff] %vm257_vm0, %v10205_v2 }
  0x45   : > { %3891 = vst.msk [vmem:[#allocation3 + $0x130] sm:$0xff] %vm257_vm0, %v10205_v2  ;;  %3892 = vst.msk [vmem:[#allocation3 + $0x138] sm:$0xff] %vm257_vm0, %v10205_v2 }
  0x46   : > { %3893 = vst.msk [vmem:[#allocation3 + $0x140] sm:$0xff] %vm257_vm0, %v10205_v2  ;;  %3894 = vst.msk [vmem:[#allocation3 + $0x148] sm:$0xff] %vm257_vm0, %v10205_v2 }
  0x47   : > { %3895 = vst.msk [vmem:[#allocation3 + $0x150] sm:$0xff] %vm257_vm0, %v10205_v2  ;;  %3896 = vst.msk [vmem:[#allocation3 + $0x158] sm:$0xff] %vm257_vm0, %v10205_v2 }
  0x48   : > { %3897 = vst.msk [vmem:[#allocation3 + $0x160] sm:$0xff] %vm257_vm0, %v10205_v2  ;;  %3898 = vst.msk [vmem:[#allocation3 + $0x168] sm:$0xff] %vm257_vm0, %v10205_v2 }
  0x49   : > { %3899 = vst.msk [vmem:[#allocation3 + $0x170] sm:$0xff] %vm257_vm0, %v10205_v2  ;;  %3900 = vst.msk [vmem:[#allocation3 + $0x178] sm:$0xff] %vm257_vm0, %v10205_v2 }
  0x4a   : > { %3901 = vst.msk [vmem:[#allocation3 + $0x180] sm:$0xff] %vm257_vm0, %v10205_v2  ;;  %3902 = vst.msk [vmem:[#allocation3 + $0x188] sm:$0xff] %vm257_vm0, %v10205_v2 }
  0x4b   : > { %3903 = vst.msk [vmem:[#allocation3 + $0x190] sm:$0xff] %vm257_vm0, %v10205_v2  ;;  %3904 = vst.msk [vmem:[#allocation3 + $0x198] sm:$0xff] %vm257_vm0, %v10205_v2 }
  0x4c   : > { %3905 = vst.msk [vmem:[#allocation3 + $0x1a0] sm:$0xff] %vm257_vm0, %v10205_v2  ;;  %3906 = vst.msk [vmem:[#allocation3 + $0x1a8] sm:$0xff] %vm257_vm0, %v10205_v2 }
  0x4d   : > { %3907 = vst.msk [vmem:[#allocation3 + $0x1b0] sm:$0xff] %vm257_vm0, %v10205_v2  ;;  %3908 = vst.msk [vmem:[#allocation3 + $0x1b8] sm:$0xff] %vm257_vm0, %v10205_v2 }
  0x4e   : > { %3909 = vst.msk [vmem:[#allocation3 + $0x1c0] sm:$0xff] %vm257_vm0, %v10205_v2  ;;  %3910 = vst.msk [vmem:[#allocation3 + $0x1c8] sm:$0xff] %vm257_vm0, %v10205_v2 }
  0x4f   : > { %3911 = vst.msk [vmem:[#allocation3 + $0x1d0] sm:$0xff] %vm257_vm0, %v10205_v2  ;;  %3912 = vst.msk [vmem:[#allocation3 + $0x1d8] sm:$0xff] %vm257_vm0, %v10205_v2 }
  0x50   : > { %3913 = vst.msk [vmem:[#allocation3 + $0x1e0] sm:$0xff] %vm257_vm0, %v10205_v2  ;;  %3914 = vst.msk [vmem:[#allocation3 + $0x1e8] sm:$0xff] %vm257_vm0, %v10205_v2 }
  0x51   : > { %3915 = vst.msk [vmem:[#allocation3 + $0x1f0] sm:$0xff] %vm257_vm0, %v10205_v2  ;;  %3916 = vst.msk [vmem:[#allocation3 + $0x1f8] sm:$0xff] %vm257_vm0, %v10205_v2 }
  0x52   : > { %3917 = vst.msk [vmem:[#allocation3 + $0x200] sm:$0xff] %vm257_vm0, %v10205_v2  ;;  %3918 = vst.msk [vmem:[#allocation3 + $0x208] sm:$0xff] %vm257_vm0, %v10205_v2 }
  0x53   : > { %3919 = vst.msk [vmem:[#allocation3 + $0x210] sm:$0xff] %vm257_vm0, %v10205_v2  ;;  %3920 = vst.msk [vmem:[#allocation3 + $0x218] sm:$0xff] %vm257_vm0, %v10205_v2 }
  0x54   : > { %3921 = vst.msk [vmem:[#allocation3 + $0x220] sm:$0xff] %vm257_vm0, %v10205_v2  ;;  %3922 = vst.msk [vmem:[#allocation3 + $0x228] sm:$0xff] %vm257_vm0, %v10205_v2 }
  0x55   : > { %3923 = vst.msk [vmem:[#allocation3 + $0x230] sm:$0xff] %vm257_vm0, %v10205_v2  ;;  %3924 = vst.msk [vmem:[#allocation3 + $0x238] sm:$0xff] %vm257_vm0, %v10205_v2 }
  0x56   : > { %3925 = vst.msk [vmem:[#allocation3 + $0x240] sm:$0xff] %vm257_vm0, %v10205_v2  ;;  %3926 = vst.msk [vmem:[#allocation3 + $0x248] sm:$0xff] %vm257_vm0, %v10205_v2 }
  0x57   : > { %3927 = vst.msk [vmem:[#allocation3 + $0x250] sm:$0xff] %vm257_vm0, %v10205_v2  ;;  %3928 = vst.msk [vmem:[#allocation3 + $0x258] sm:$0xff] %vm257_vm0, %v10205_v2 }
  0x58   : > { %3929 = vst.msk [vmem:[#allocation3 + $0x260] sm:$0xff] %vm257_vm0, %v10205_v2  ;;  %3930 = vst.msk [vmem:[#allocation3 + $0x268] sm:$0xff] %vm257_vm0, %v10205_v2 }
  0x59   : > { %3931 = vst.msk [vmem:[#allocation3 + $0x270] sm:$0xff] %vm257_vm0, %v10205_v2  ;;  %3932 = vst.msk [vmem:[#allocation3 + $0x278] sm:$0xff] %vm257_vm0, %v10205_v2  ;;  %v363_v2 = vld [vmem:[#allocation2 + $0x7] sm:$0xff] }
  0x5a   : > { %12657 = vst [vmem:[#allocation4_spill] sm:$0xff] %v10582_v3  ;;  %12658 = vst [vmem:[#allocation5_spill] sm:$0xff] %v10585_v4 }
  0x5b   : > { %12659 = vst [vmem:[#allocation6_spill] sm:$0xff] %v10588_v5  ;;  %331 = vst.msk [vmem:[#allocation2 + $0x28] sm:$0xff] %vm257_vm0, %v10582_v3  ;;  %v1072_v3 = vld [vmem:[#allocation2 + $0x9] sm:$0xff] }
  0x5c   : > { %332 = vst.msk [vmem:[#allocation2 + $0x30] sm:$0xff] %vm257_vm0, %v10585_v4  ;;  %333 = vst.msk [vmem:[#allocation2 + $0x48] sm:$0xff] %vm257_vm0, %v10588_v5 }
  0x5d   : > { %12660 = vst [vmem:[#allocation7_spill] sm:$0xff] %v10597_v6  ;;  %12661 = vst [vmem:[#allocation8_spill] sm:$0xff] %v10600_v7 }
  0x5e   : > { %12662 = vst [vmem:[#allocation9_spill] sm:$0xff] %v10603_v8  ;;  %334 = vst.msk [vmem:[#allocation2 + $0x50] sm:$0xff] %vm257_vm0, %v10597_v6 }
  0x5f   : > { %335 = vst.msk [vmem:[#allocation2 + $0x68] sm:$0xff] %vm257_vm0, %v10600_v7  ;;  %336 = vst.msk [vmem:[#allocation2 + $0x70] sm:$0xff] %vm257_vm0, %v10603_v8  ;;  %v10974_v7 = vld [vmem:[%s10579_s28 + $0xf0] sm:$0xff]  ;;  %v10979_v8 = vld [vmem:[%s10579_s28 + $0xf8] sm:$0xff] }
  0x60   : > { %12663 = vst [vmem:[#allocation10_spill] sm:$0xff] %v10617_v12  ;;  %337 = vst.msk [vmem:[#allocation2 + $0x88] sm:$0xff] %vm257_vm0, %v10617_v12 }
  0x61   : > { %12664 = vst [vmem:[#allocation11_spill] sm:$0xff] %v10623_v13  ;;  %12665 = vst [vmem:[#allocation12_spill] sm:$0xff] %v10626_v14 }
  0x62   : > { %12666 = vst [vmem:[#allocation13_spill] sm:$0xff] %v10629_v15  ;;  %338 = vst.msk [vmem:[#allocation2 + $0x90] sm:$0xff] %vm257_vm0, %v10623_v13  ;;  %v10694_v28 = vld [vmem:[#allocation2 + $0x28] sm:$0xff] }
  0x63   : > { %339 = vst.msk [vmem:[#allocation2 + $0xa8] sm:$0xff] %vm257_vm0, %v10626_v14  ;;  %340 = vst.msk [vmem:[#allocation2 + $0xb0] sm:$0xff] %vm257_vm0, %v10629_v15  ;;  %v10696_v29 = vld [vmem:[#allocation2 + $0x30] sm:$0xff]  ;;  %v10698_v30 = vld [vmem:[#allocation2 + $0x48] sm:$0xff]  ;;  %8781 = vmatprep.mubr.msk.f32.mxu0 %vm257_vm0, %v10694_v28 }
  0x64   : > { %12667 = vst [vmem:[#allocation14_spill] sm:$0xff] %v10639_v16  ;;  %12668 = vst [vmem:[#allocation15_spill] sm:$0xff] %v10642_v17  ;;  %8782 = vmatmul.mubr.msk.f32.gmra.mrb[2].mxu0 %vm257_vm0, %v10696_v29  ;;  %v10861_v11 = vld [vmem:[#allocation2 + $0x27] sm:$0xff] }
  0x65   : > { %12669 = vst [vmem:[#allocation16_spill] sm:$0xff] %v10645_v18  ;;  %341 = vst.msk [vmem:[#allocation2 + $0xc8] sm:$0xff] %vm257_vm0, %v10639_v16  ;;  %8784 = vmatprep.mubr.msk.f32.mxu0 %vm257_vm0, %v10698_v30  ;;  %v10718_v33 = vld [vmem:[#allocation2 + $0x50] sm:$0xff] }
  0x66   : > { %342 = vst.msk [vmem:[#allocation2 + $0xd0] sm:$0xff] %vm257_vm0, %v10642_v17  ;;  %343 = vst.msk [vmem:[#allocation2 + $0xe8] sm:$0xff] %vm257_vm0, %v10645_v18  ;;  %v10724_v34 = vld [vmem:[#allocation2 + $0x68] sm:$0xff]  ;;  %v10730_v35 = vld [vmem:[#allocation2 + $0x70] sm:$0xff] }
  0x67   : > { %12670 = vst [vmem:[#allocation17_spill] sm:$0xff] %v10655_v19  ;;  %12671 = vst [vmem:[#allocation18_spill] sm:$0xff] %v10658_v20  ;;  %v10732_v36 = vld [vmem:[#allocation2 + $0x88] sm:$0xff] }
  0x68   : > { %12672 = vst [vmem:[#allocation19_spill] sm:$0xff] %v10661_v21  ;;  %344 = vst.msk [vmem:[#allocation2 + $0xf0] sm:$0xff] %vm257_vm0, %v10655_v19  ;;  %8785 = vmatmul.mubr.msk.f32.gmra.mrb[4].mxu0 %vm257_vm0, %v10718_v33  ;;  %v11000_v4 = vld [vmem:[#allocation2 + $0x29] sm:$0xff] }
  0x69   : > { %345 = vst.msk [vmem:[#allocation2 + $0x108] sm:$0xff] %vm257_vm0, %v10658_v20  ;;  %346 = vst.msk [vmem:[#allocation2 + $0x110] sm:$0xff] %vm257_vm0, %v10661_v21  ;;  %8787 = vmatprep.mubr.msk.f32.mxu0 %vm257_vm0, %v10724_v34  ;;  %v10768_v43 = vld [vmem:[#allocation2 + $0x90] sm:$0xff] }
  0x6a   : > { %12673 = vst [vmem:[#allocation20_spill] sm:$0xff] %v10670_v22  ;;  %12674 = vst [vmem:[#allocation21_spill] sm:$0xff] %v10673_v23  ;;  %v10770_v44 = vld [vmem:[#allocation2 + $0xa8] sm:$0xff]  ;;  %v10776_v45 = vld [vmem:[#allocation2 + $0xb0] sm:$0xff] }
  0x6b   : > { %12675 = vst [vmem:[#allocation22_spill] sm:$0xff] %v10676_v24  ;;  %347 = vst.msk [vmem:[#allocation2 + $0x128] sm:$0xff] %vm257_vm0, %v10670_v22 }
  0x6c   : > { %348 = vst.msk [vmem:[#allocation2 + $0x130] sm:$0xff] %vm257_vm0, %v10673_v23  ;;  %349 = vst.msk [vmem:[#allocation2 + $0x148] sm:$0xff] %vm257_vm0, %v10676_v24  ;;  %8788 = vmatmul.mubr.msk.f32.gmra.mrb[6].mxu0 %vm257_vm0, %v10730_v35  ;;  %v10778_v46 = vld [vmem:[#allocation2 + $0xc8] sm:$0xff] }
  0x6d   : > { %12676 = vst [vmem:[#allocation23_spill] sm:$0xff] %v10686_v25  ;;  %12677 = vst [vmem:[#allocation24_spill] sm:$0xff] %v10689_v26  ;;  %8790 = vmatprep.mubr.msk.f32.mxu0 %vm257_vm0, %v10732_v36  ;;  %v10784_v47 = vld [vmem:[#allocation2 + $0xd0] sm:$0xff]  ;;  %v10786_v48 = vld [vmem:[#allocation2 + $0xe8] sm:$0xff] }
  0x6e   : > { %12678 = vst [vmem:[#allocation25_spill] sm:$0xff] %v10692_v27  ;;  %350 = vst.msk [vmem:[#allocation2 + $0x150] sm:$0xff] %vm257_vm0, %v10686_v25 }
  0x6f   : > { %351 = vst.msk [vmem:[#allocation2 + $0x168] sm:$0xff] %vm257_vm0, %v10689_v26  ;;  %352 = vst.msk [vmem:[#allocation2 + $0x170] sm:$0xff] %vm257_vm0, %v10692_v27  ;;  %v10792_v49 = vld [vmem:[#allocation2 + $0xf0] sm:$0xff]  ;;  %v10915_v27 = vld [vmem:[#allocation2 + $0xe7] sm:$0xff] }
  0x70   : > { %12679 = vst [vmem:[#allocation26_spill] sm:$0xff] %v10711_v31  ;;  %12680 = vst [vmem:[#allocation27_spill] sm:$0xff] %v10714_v32  ;;  %8791 = vmatmul.mubr.msk.f32.gmra.mrb[8].mxu0 %vm257_vm0, %v10768_v43  ;;  %v10794_v50 = vld [vmem:[#allocation2 + $0x108] sm:$0xff]  ;;  %v10800_v51 = vld [vmem:[#allocation2 + $0x110] sm:$0xff] }
  0x71   : > { %353 = vst.msk [vmem:[#allocation2 + $0x188] sm:$0xff] %vm257_vm0, %v10711_v31  ;;  %354 = vst.msk [vmem:[#allocation2 + $0x190] sm:$0xff] %vm257_vm0, %v10714_v32  ;;  %8793 = vmatprep.mubr.msk.f32.mxu0 %vm257_vm0, %v10770_v44  ;;  %v10905_v31 = vld [vmem:[#allocation2 + $0xaf] sm:$0xff]  ;;  %v10907_v32 = vld [vmem:[#allocation2 + $0xc7] sm:$0xff] }
  0x72   : > { %12681 = vst [vmem:[#allocation28_spill] sm:$0xff] %v10735_v37  ;;  %12682 = vst [vmem:[#allocation29_spill] sm:$0xff] %v10738_v38  ;;  %v10802_v52 = vld [vmem:[#allocation2 + $0x128] sm:$0xff] }
  0x73   : > { %12683 = vst [vmem:[#allocation30_spill] sm:$0xff] %v10741_v39  ;;  %355 = vst.msk [vmem:[#allocation2 + $0x1a8] sm:$0xff] %vm257_vm0, %v10735_v37  ;;  %v10808_v53 = vld [vmem:[#allocation2 + $0x130] sm:$0xff]  ;;  %v10810_v54 = vld [vmem:[#allocation2 + $0x148] sm:$0xff] }
  0x74   : > { %356 = vst.msk [vmem:[#allocation2 + $0x1b0] sm:$0xff] %vm257_vm0, %v10738_v38  ;;  %357 = vst.msk [vmem:[#allocation2 + $0x1c8] sm:$0xff] %vm257_vm0, %v10741_v39  ;;  %8794 = vmatmul.mubr.msk.f32.gmra.mrb[10].mxu0 %vm257_vm0, %v10776_v45  ;;  %v10874_v39 = vld [vmem:[#allocation2 + $0x47] sm:$0xff]  ;;  %v10897_v37 = vld [vmem:[#allocation2 + $0x8f] sm:$0xff] }
  0x75   : > { %12684 = vst [vmem:[#allocation31_spill] sm:$0xff] %v10750_v40  ;;  %12685 = vst [vmem:[#allocation32_spill] sm:$0xff] %v10753_v41  ;;  %8796 = vmatprep.mubr.msk.f32.mxu0 %vm257_vm0, %v10778_v46  ;;  %v10816_v55 = vld [vmem:[#allocation2 + $0x150] sm:$0xff]  ;;  %v10899_v38 = vld [vmem:[#allocation2 + $0xa7] sm:$0xff] }
  0x76   : > { %12686 = vst [vmem:[#allocation33_spill] sm:$0xff] %v10756_v42  ;;  %358 = vst.msk [vmem:[#allocation2 + $0x1d0] sm:$0xff] %vm257_vm0, %v10750_v40  ;;  %v10818_v56 = vld [vmem:[#allocation2 + $0x168] sm:$0xff]  ;;  %v10824_v57 = vld [vmem:[#allocation2 + $0x170] sm:$0xff] }
  0x77   : > { %359 = vst.msk [vmem:[#allocation2 + $0x1e8] sm:$0xff] %vm257_vm0, %v10753_v41  ;;  %360 = vst.msk [vmem:[#allocation2 + $0x1f0] sm:$0xff] %vm257_vm0, %v10756_v42  ;;  %v10866_v41 = vld [vmem:[%s12517_s1 + $0x18] sm:$0xff]  ;;  %v10872_v42 = vld [vmem:[#allocation2 + $0x2f] sm:$0xff] }
  0x78   : > { %8797 = vmatmul.mubr.msk.f32.gmra.mrb[12].mxu0 %vm257_vm0, %v10784_v47  ;;  %v10826_v58 = vld [vmem:[#allocation2 + $0x188] sm:$0xff]  ;;  %v10832_v59 = vld [vmem:[#allocation2 + $0x190] sm:$0xff]  ;;  %12691 = vst [vmem:[#allocation38_spill] sm:$0xff] %v10974_v7  ;;  %361 = vst.msk [vmem:[#allocation2 + $0x208] sm:$0xff] %vm257_vm0, %v10974_v7 }
  0x79   : > { %8799 = vmatprep.mubr.msk.f32.mxu0 %vm257_vm0, %v10786_v48  ;;  %v10891_v40 = vld [vmem:[#allocation2 + $0x87] sm:$0xff]  ;;  %v10913_v26 = vld [vmem:[#allocation2 + $0xcf] sm:$0xff]  ;;  %12692 = vst [vmem:[#allocation39_spill] sm:$0xff] %v10979_v8  ;;  %362 = vst.msk [vmem:[#allocation2 + $0x210] sm:$0xff] %vm257_vm0, %v10979_v8 }
  0x7a   : > { %v10834_v60 = vld [vmem:[#allocation2 + $0x1a8] sm:$0xff]  ;;  %v1073_v8 = vld [vmem:[#allocation2 + $0x11] sm:$0xff]  ;;  %12693 = vst [vmem:[#allocation40_spill] sm:$0xff] %v11000_v4 }
  0x7b   : > { %v10840_v61 = vld [vmem:[#allocation2 + $0x1b0] sm:$0xff]  ;;  %v10842_v62 = vld [vmem:[#allocation2 + $0x1c8] sm:$0xff] }
  0x7c   : > { %8800 = vmatmul.mubr.msk.f32.gmra.mrb[14].mxu0 %vm257_vm0, %v10792_v49  ;;  %12687 = vst [vmem:[#allocation34_spill] sm:$0xff] %v10842_v62  ;;  %v10921_v24 = vld [vmem:[#allocation2 + $0xef] sm:$0xff]  ;;  %v10923_v25 = vld [vmem:[#allocation2 + $0x107] sm:$0xff] }
  0x7d   : > { %8802 = vmatprep.mubr.msk.f32.mxu0 %vm257_vm0, %v10794_v50  ;;  %v10848_v63 = vld [vmem:[#allocation2 + $0x1d0] sm:$0xff]  ;;  %v10931_v23 = vld [vmem:[#allocation2 + $0x127] sm:$0xff] }
  0x7e   : > { %12688 = vst [vmem:[#allocation35_spill] sm:$0xff] %v10848_v63  ;;  %v10850_v0 = vld [vmem:[#allocation2 + $0x1e8] sm:$0xff]  ;;  %v10856_v1 = vld [vmem:[#allocation2 + $0x1f0] sm:$0xff] }
  0x7f   : > { %12689 = vst [vmem:[#allocation36_spill] sm:$0xff] %v10850_v0  ;;  %12690 = vst [vmem:[#allocation37_spill] sm:$0xff] %v10856_v1  ;;  %v10929_v22 = vld [vmem:[#allocation2 + $0x10f] sm:$0xff]  ;;  %v10939_v21 = vld [vmem:[#allocation2 + $0x147] sm:$0xff] }
  0x80   : > { %8803 = vmatmul.mubr.msk.f32.gmra.mrb[16].mxu0 %vm257_vm0, %v10800_v51  ;;  %v10937_v20 = vld [vmem:[#allocation2 + $0x12f] sm:$0xff]  ;;  %v10947_v19 = vld [vmem:[#allocation2 + $0x167] sm:$0xff] }
  0x81   : > { %8805 = vmatprep.mubr.msk.f32.mxu0 %vm257_vm0, %v10802_v52  ;;  %v10945_v18 = vld [vmem:[#allocation2 + $0x14f] sm:$0xff]  ;;  %v10955_v17 = vld [vmem:[#allocation2 + $0x187] sm:$0xff] }
  0x82   : > { %v10953_v16 = vld [vmem:[#allocation2 + $0x16f] sm:$0xff]  ;;  %v10963_v15 = vld [vmem:[#allocation2 + $0x1a7] sm:$0xff] }
  0x83   : > { %v10961_v14 = vld [vmem:[#allocation2 + $0x18f] sm:$0xff]  ;;  %v10971_v13 = vld [vmem:[#allocation2 + $0x1c7] sm:$0xff] }
  0x84   : > { %8806 = vmatmul.mubr.msk.f32.gmra.mrb[18].mxu0 %vm257_vm0, %v10808_v53  ;;  %v10969_v12 = vld [vmem:[#allocation2 + $0x1af] sm:$0xff]  ;;  %v10989_v6 = vld [vmem:[#allocation2 + $0x1e7] sm:$0xff] }
  0x85   : > { %8808 = vmatprep.mubr.msk.f32.mxu0 %vm257_vm0, %v10810_v54  ;;  %v10987_v5 = vld [vmem:[#allocation2 + $0x1cf] sm:$0xff] }
  0x86   : > { %v10995_v7 = vld [vmem:[#allocation2 + $0x1ef] sm:$0xff] }
  0x88   : > { %8809 = vmatmul.mubr.msk.f32.gmra.mrb[20].mxu0 %vm257_vm0, %v10816_v55 }
  0x89   : > { %8811 = vmatprep.mubr.msk.f32.mxu0 %vm257_vm0, %v10818_v56 }
  0x8c   : > { %8812 = vmatmul.mubr.msk.f32.gmra.mrb[22].mxu0 %vm257_vm0, %v10824_v57 }
  0x8d   : > { %8814 = vmatprep.mubr.msk.f32.mxu0 %vm257_vm0, %v10826_v58 }
  0x90   : > { %8815 = vmatmul.mubr.msk.f32.gmra.mrb[24].mxu0 %vm257_vm0, %v10832_v59 }
  0x91   : > { %8817 = vmatprep.mubr.msk.f32.mxu0 %vm257_vm0, %v10834_v60 }
  0x94   : > { %8818 = vmatmul.mubr.msk.f32.gmra.mrb[26].mxu0 %vm257_vm0, %v10840_v61 }
  0x95   : > { %8820 = vmatprep.mubr.msk.f32.mxu0 %vm257_vm0, %v10842_v62 }
  0x98   : > { %8821 = vmatmul.mubr.msk.f32.gmra.mrb[28].mxu0 %vm257_vm0, %v10848_v63  ;;  %v11013_v63 = vld [vmem:[#allocation2 + $0x49] sm:$0xff] }
  0x99   : > { %8823 = vmatprep.mubr.msk.f32.mxu0 %vm257_vm0, %v10850_v0  ;;  %v11011_v0 = vld [vmem:[#allocation2 + $0x31] sm:$0xff]  ;;  %12695 = vst [vmem:[#allocation42_spill] sm:$0xff] %v11013_v63 }
  0x9a   : > { %12694 = vst [vmem:[#allocation41_spill] sm:$0xff] %v11011_v0 }
  0x9c   : > { %8824 = vmatmul.mubr.msk.f32.gmra.mrb[30].mxu0 %vm257_vm0, %v10856_v1  ;;  %v11005_v1 = vld [vmem:[%s12517_s1 + $0x20] sm:$0xff] }
  0x9d   : > { %8828 = vmatprep.mubr.msk.f32.mxu0 %vm257_vm0, %v363_v2  ;;  %v10881_v2 = vld [vmem:[#allocation2 + $0x4f] sm:$0xff] }
  0xa0   : > { %8829 = vmatmul.mubr.msk.f32.vlgmr.msra.gmra.mrb[0].mxu0 %vm257_vm0, %v364_v10  ;;  %v10883_v10 = vld [vmem:[#allocation2 + $0x67] sm:$0xff] }
  0xa1   : > { %8877 = vmatpush3.msra.mxu0 %v10608_v9  ;;  %8831 = vmatprep.mubr.msk.f32.mxu0 %vm257_vm0, %v10861_v11  ;;  %v10889_v9 = vld [vmem:[#allocation2 + $0x6f] sm:$0xff] }
  0xa2   : > { %8926 = vmatprep.subr.mxu0 %v10866_v41 }
  0xa4   : > { %8832 = vmatmul.mubr.msk.f32.gmra.mrb[2].mxu0 %vm257_vm0, %v10872_v42 }
  0xa5   : > { %8834 = vmatprep.mubr.msk.f32.mxu0 %vm257_vm0, %v10874_v39 }
  0xa8   : > { %8835 = vmatmul.mubr.msk.f32.gmra.mrb[4].mxu0 %vm257_vm0, %v10881_v2 }
  0xa9   : > { %8837 = vmatprep.mubr.msk.f32.mxu0 %vm257_vm0, %v10883_v10 }
  0xac   : > { %8838 = vmatmul.mubr.msk.f32.gmra.mrb[6].mxu0 %vm257_vm0, %v10889_v9 }
  0xad   : > { %8840 = vmatprep.mubr.msk.f32.mxu0 %vm257_vm0, %v10891_v40 }
  0xb0   : > { %8841 = vmatmul.mubr.msk.f32.gmra.mrb[8].mxu0 %vm257_vm0, %v10897_v37 }
  0xb1   : > { %8843 = vmatprep.mubr.msk.f32.mxu0 %vm257_vm0, %v10899_v38 }
  0xb4   : > { %8844 = vmatmul.mubr.msk.f32.gmra.mrb[10].mxu0 %vm257_vm0, %v10905_v31 }
  0xb5   : > { %8846 = vmatprep.mubr.msk.f32.mxu0 %vm257_vm0, %v10907_v32 }
  0xb8   : > { %8847 = vmatmul.mubr.msk.f32.gmra.mrb[12].mxu0 %vm257_vm0, %v10913_v26 }
  0xb9   : > { %8849 = vmatprep.mubr.msk.f32.mxu0 %vm257_vm0, %v10915_v27 }
  0xbc   : > { %8850 = vmatmul.mubr.msk.f32.gmra.mrb[14].mxu0 %vm257_vm0, %v10921_v24 }
  0xbd   : > { %8852 = vmatprep.mubr.msk.f32.mxu0 %vm257_vm0, %v10923_v25 }
  0xc0   : > { %8853 = vmatmul.mubr.msk.f32.gmra.mrb[16].mxu0 %vm257_vm0, %v10929_v22 }
  0xc1   : > { %8855 = vmatprep.mubr.msk.f32.mxu0 %vm257_vm0, %v10931_v23 }
  0xc4   : > { %8856 = vmatmul.mubr.msk.f32.gmra.mrb[18].mxu0 %vm257_vm0, %v10937_v20 }
  0xc5   : > { %8858 = vmatprep.mubr.msk.f32.mxu0 %vm257_vm0, %v10939_v21 }
  0xc8   : > { %8859 = vmatmul.mubr.msk.f32.gmra.mrb[20].mxu0 %vm257_vm0, %v10945_v18 }
  0xc9   : > { %8861 = vmatprep.mubr.msk.f32.mxu0 %vm257_vm0, %v10947_v19 }
  0xcc   : > { %8862 = vmatmul.mubr.msk.f32.gmra.mrb[22].mxu0 %vm257_vm0, %v10953_v16 }
  0xcd   : > { %8864 = vmatprep.mubr.msk.f32.mxu0 %vm257_vm0, %v10955_v17 }
  0xd0   : > { %8865 = vmatmul.mubr.msk.f32.gmra.mrb[24].mxu0 %vm257_vm0, %v10961_v14 }
  0xd1   : > { %8867 = vmatprep.mubr.msk.f32.mxu0 %vm257_vm0, %v10963_v15 }
  0xd4   : > { %8868 = vmatmul.mubr.msk.f32.gmra.mrb[26].mxu0 %vm257_vm0, %v10969_v12 }
  0xd5   : > { %8870 = vmatprep.mubr.msk.f32.mxu0 %vm257_vm0, %v10971_v13 }
  0xd8   : > { %8871 = vmatmul.mubr.msk.f32.gmra.mrb[28].mxu0 %vm257_vm0, %v10987_v5 }
  0xd9   : > { %8873 = vmatprep.mubr.msk.f32.mxu0 %vm257_vm0, %v10989_v6 }
  0xdc   : > { %8874 = vmatmul.mubr.msk.f32.gmra.mrb[30].mxu0 %vm257_vm0, %v10995_v7 }
  0xdd   : > { %8878 = vmatprep.mubr.msk.f32.mxu0 %vm257_vm0, %v1072_v3  ;;  %v11020_v3 = vld [vmem:[#allocation2 + $0x51] sm:$0xff] }
  0xde   : > { %12696 = vst [vmem:[#allocation43_spill] sm:$0xff] %v11020_v3 }
  0xe0   : > { %8879 = vmatmul.mubr.msk.f32.vlgmr.msra.gmra.mrb[0].mxu0 %vm257_vm0, %v1073_v8  ;;  %v11022_v8 = vld [vmem:[#allocation2 + $0x69] sm:$0xff] }
  0xe1   : > { %8927 = vmatpush3.msra.mxu0 %v10866_v41  ;;  %8881 = vmatprep.mubr.msk.f32.mxu0 %vm257_vm0, %v11000_v4  ;;  %12697 = vst [vmem:[#allocation44_spill] sm:$0xff] %v11022_v8  ;;  %v11028_v41 = vld [vmem:[#allocation2 + $0x71] sm:$0xff]  ;;  %v11030_v4 = vld [vmem:[#allocation2 + $0x89] sm:$0xff] }
  0xe2   : > { %8976 = vmatprep.subr.mxu0 %v11005_v1  ;;  %12698 = vst [vmem:[#allocation45_spill] sm:$0xff] %v11028_v41  ;;  %12699 = vst [vmem:[#allocation46_spill] sm:$0xff] %v11030_v4 }
  0xe4   : > { %8882 = vmatmul.mubr.msk.f32.gmra.mrb[2].mxu0 %vm257_vm0, %v11011_v0  ;;  %v11038_v0 = vld [vmem:[#allocation2 + $0xa9] sm:$0xff] }
  0xe5   : > { %8884 = vmatprep.mubr.msk.f32.mxu0 %vm257_vm0, %v11013_v63  ;;  %v11036_v63 = vld [vmem:[#allocation2 + $0x91] sm:$0xff]  ;;  %12701 = vst [vmem:[#allocation48_spill] sm:$0xff] %v11038_v0 }
  0xe6   : > { %12700 = vst [vmem:[#allocation47_spill] sm:$0xff] %v11036_v63 }
  0xe8   : > { %8885 = vmatmul.mubr.msk.f32.gmra.mrb[4].mxu0 %vm257_vm0, %v11020_v3  ;;  %v11046_v3 = vld [vmem:[#allocation2 + $0xc9] sm:$0xff] }
  0xe9   : > { %8887 = vmatprep.mubr.msk.f32.mxu0 %vm257_vm0, %v11022_v8  ;;  %v11044_v8 = vld [vmem:[#allocation2 + $0xb1] sm:$0xff]  ;;  %12703 = vst [vmem:[#allocation50_spill] sm:$0xff] %v11046_v3 }
  0xea   : > { %12702 = vst [vmem:[#allocation49_spill] sm:$0xff] %v11044_v8 }
  0xec   : > { %8888 = vmatmul.mubr.msk.f32.gmra.mrb[6].mxu0 %vm257_vm0, %v11028_v41  ;;  %v11054_v41 = vld [vmem:[#allocation2 + $0xe9] sm:$0xff] }
  0xed   : > { %8890 = vmatprep.mubr.msk.f32.mxu0 %vm257_vm0, %v11030_v4  ;;  %v11052_v4 = vld [vmem:[#allocation2 + $0xd1] sm:$0xff]  ;;  %12705 = vst [vmem:[#allocation52_spill] sm:$0xff] %v11054_v41 }
  0xee   : > { %12704 = vst [vmem:[#allocation51_spill] sm:$0xff] %v11052_v4 }
  0xf0   : > { %8891 = vmatmul.mubr.msk.f32.gmra.mrb[8].mxu0 %vm257_vm0, %v11036_v63  ;;  %v11062_v63 = vld [vmem:[#allocation2 + $0x109] sm:$0xff] }
  0xf1   : > { %8893 = vmatprep.mubr.msk.f32.mxu0 %vm257_vm0, %v11038_v0  ;;  %v11060_v0 = vld [vmem:[#allocation2 + $0xf1] sm:$0xff]  ;;  %12707 = vst [vmem:[#allocation54_spill] sm:$0xff] %v11062_v63 }
  0xf2   : > { %12706 = vst [vmem:[#allocation53_spill] sm:$0xff] %v11060_v0 }
  0xf4   : > { %8894 = vmatmul.mubr.msk.f32.gmra.mrb[10].mxu0 %vm257_vm0, %v11044_v8  ;;  %v11070_v8 = vld [vmem:[#allocation2 + $0x129] sm:$0xff] }
  0xf5   : > { %8896 = vmatprep.mubr.msk.f32.mxu0 %vm257_vm0, %v11046_v3  ;;  %v11068_v3 = vld [vmem:[#allocation2 + $0x111] sm:$0xff]  ;;  %12709 = vst [vmem:[#allocation56_spill] sm:$0xff] %v11070_v8 }
  0xf6   : > { %12708 = vst [vmem:[#allocation55_spill] sm:$0xff] %v11068_v3 }
  0xf8   : > { %8897 = vmatmul.mubr.msk.f32.gmra.mrb[12].mxu0 %vm257_vm0, %v11052_v4  ;;  %v11078_v4 = vld [vmem:[#allocation2 + $0x149] sm:$0xff] }
  0xf9   : > { %8899 = vmatprep.mubr.msk.f32.mxu0 %vm257_vm0, %v11054_v41  ;;  %v11076_v41 = vld [vmem:[#allocation2 + $0x131] sm:$0xff]  ;;  %12711 = vst [vmem:[#allocation58_spill] sm:$0xff] %v11078_v4 }
  0xfa   : > { %12710 = vst [vmem:[#allocation57_spill] sm:$0xff] %v11076_v41 }
  0xfc   : > { %8900 = vmatmul.mubr.msk.f32.gmra.mrb[14].mxu0 %vm257_vm0, %v11060_v0  ;;  %v11086_v0 = vld [vmem:[#allocation2 + $0x169] sm:$0xff] }
  0xfd   : > { %8902 = vmatprep.mubr.msk.f32.mxu0 %vm257_vm0, %v11062_v63  ;;  %v11084_v63 = vld [vmem:[#allocation2 + $0x151] sm:$0xff]  ;;  %12713 = vst [vmem:[#allocation60_spill] sm:$0xff] %v11086_v0 }
  0xfe   : > { %12712 = vst [vmem:[#allocation59_spill] sm:$0xff] %v11084_v63 }
 0x100   : > { %8903 = vmatmul.mubr.msk.f32.gmra.mrb[16].mxu0 %vm257_vm0, %v11068_v3  ;;  %v11094_v3 = vld [vmem:[#allocation2 + $0x189] sm:$0xff] }
 0x101   : > { %8905 = vmatprep.mubr.msk.f32.mxu0 %vm257_vm0, %v11070_v8  ;;  %v11092_v8 = vld [vmem:[#allocation2 + $0x171] sm:$0xff]  ;;  %12715 = vst [vmem:[#allocation62_spill] sm:$0xff] %v11094_v3 }
 0x102   : > { %12714 = vst [vmem:[#allocation61_spill] sm:$0xff] %v11092_v8 }
 0x104   : > { %8906 = vmatmul.mubr.msk.f32.gmra.mrb[18].mxu0 %vm257_vm0, %v11076_v41  ;;  %v11102_v41 = vld [vmem:[#allocation2 + $0x1a9] sm:$0xff] }
 0x105   : > { %8908 = vmatprep.mubr.msk.f32.mxu0 %vm257_vm0, %v11078_v4  ;;  %v11100_v4 = vld [vmem:[#allocation2 + $0x191] sm:$0xff]  ;;  %12716 = vst [vmem:[#allocation63_spill] sm:$0xff] %v11102_v41 }
 0x108   : > { %8909 = vmatmul.mubr.msk.f32.gmra.mrb[20].mxu0 %vm257_vm0, %v11084_v63  ;;  %v11110_v63 = vld [vmem:[#allocation2 + $0x1c9] sm:$0xff] }
 0x109   : > { %8911 = vmatprep.mubr.msk.f32.mxu0 %vm257_vm0, %v11086_v0  ;;  %v11108_v0 = vld [vmem:[#allocation2 + $0x1b1] sm:$0xff]  ;;  %12717 = vst [vmem:[#allocation64_spill] sm:$0xff] %v11110_v63 }
 0x10c   : > { %8912 = vmatmul.mubr.msk.f32.gmra.mrb[22].mxu0 %vm257_vm0, %v11092_v8  ;;  %v11118_v8 = vld [vmem:[#allocation2 + $0x1e9] sm:$0xff] }
 0x10d   : > { %8914 = vmatprep.mubr.msk.f32.mxu0 %vm257_vm0, %v11094_v3  ;;  %v11116_v3 = vld [vmem:[#allocation2 + $0x1d1] sm:$0xff]  ;;  %12718 = vst [vmem:[#allocation65_spill] sm:$0xff] %v11118_v8 }
 0x110   : > { %8915 = vmatmul.mubr.msk.f32.gmra.mrb[24].mxu0 %vm257_vm0, %v11100_v4 }
 0x111   : > { %8917 = vmatprep.mubr.msk.f32.mxu0 %vm257_vm0, %v11102_v41  ;;  %v11124_v41 = vld [vmem:[#allocation2 + $0x1f1] sm:$0xff] }
 0x114   : > { %8918 = vmatmul.mubr.msk.f32.gmra.mrb[26].mxu0 %vm257_vm0, %v11108_v0 }
 0x115   : > { %8920 = vmatprep.mubr.msk.f32.mxu0 %vm257_vm0, %v11110_v63  ;;  %v7748_v63 = vld [vmem:[%s12517_s1 + $0x28] sm:$0xff] }
 0x118   : > { %8921 = vmatmul.mubr.msk.f32.gmra.mrb[28].mxu0 %vm257_vm0, %v11116_v3 }
 0x119   : > { %8923 = vmatprep.mubr.msk.f32.mxu0 %vm257_vm0, %v11118_v8 }
 0x11c   : > { %8924 = vmatmul.mubr.msk.f32.gmra.mrb[30].mxu0 %vm257_vm0, %v11124_v41 }
 0x11d   : > { %8928 = vmatprep.mubr.msk.f32.mxu0 %vm257_vm0, %v10861_v11  ;;  %v7781_v11 = vld [vmem:[%s12517_s1 + $0x30] sm:$0xff] }
 0x120   : > { %8929 = vmatmul.mubr.msk.f32.vlgmr.msra.gmra.mrb[0].mxu0 %vm257_vm0, %v10872_v42  ;;  %v11190_v42 = vld [vmem:[#allocation2 + $0x207] sm:$0xff] }
 0x121   : > { %8977 = vmatpush3.msra.mxu0 %v11005_v1  ;;  %8931 = vmatprep.mubr.msk.f32.mxu0 %vm257_vm0, %v10874_v39  ;;  %v11196_v1 = vld [vmem:[#allocation2 + $0x20f] sm:$0xff] }
 0x122   : > { %9026 = vmatprep.subr.mxu0 %v7748_v63 }
 0x124   : > { %8932 = vmatmul.mubr.msk.f32.gmra.mrb[2].mxu0 %vm257_vm0, %v10881_v2 }
 0x125   : > { %8934 = vmatprep.mubr.msk.f32.mxu0 %vm257_vm0, %v10883_v10 }
 0x128   : > { %8935 = vmatmul.mubr.msk.f32.gmra.mrb[4].mxu0 %vm257_vm0, %v10889_v9 }
 0x129   : > { %8937 = vmatprep.mubr.msk.f32.mxu0 %vm257_vm0, %v10891_v40 }
 0x12c   : > { %8938 = vmatmul.mubr.msk.f32.gmra.mrb[6].mxu0 %vm257_vm0, %v10897_v37 }
 0x12d   : > { %8940 = vmatprep.mubr.msk.f32.mxu0 %vm257_vm0, %v10899_v38 }
 0x130   : > { %8941 = vmatmul.mubr.msk.f32.gmra.mrb[8].mxu0 %vm257_vm0, %v10905_v31 }
 0x131   : > { %8943 = vmatprep.mubr.msk.f32.mxu0 %vm257_vm0, %v10907_v32 }
 0x134   : > { %8944 = vmatmul.mubr.msk.f32.gmra.mrb[10].mxu0 %vm257_vm0, %v10913_v26 }
 0x135   : > { %8946 = vmatprep.mubr.msk.f32.mxu0 %vm257_vm0, %v10915_v27 }
 0x138   : > { %8947 = vmatmul.mubr.msk.f32.gmra.mrb[12].mxu0 %vm257_vm0, %v10921_v24 }
 0x139   : > { %8949 = vmatprep.mubr.msk.f32.mxu0 %vm257_vm0, %v10923_v25 }
 0x13c   : > { %8950 = vmatmul.mubr.msk.f32.gmra.mrb[14].mxu0 %vm257_vm0, %v10929_v22 }
 0x13d   : > { %8952 = vmatprep.mubr.msk.f32.mxu0 %vm257_vm0, %v10931_v23 }
 0x140   : > { %8953 = vmatmul.mubr.msk.f32.gmra.mrb[16].mxu0 %vm257_vm0, %v10937_v20 }
 0x141   : > { %8955 = vmatprep.mubr.msk.f32.mxu0 %vm257_vm0, %v10939_v21 }
 0x144   : > { %8956 = vmatmul.mubr.msk.f32.gmra.mrb[18].mxu0 %vm257_vm0, %v10945_v18 }
 0x145   : > { %8958 = vmatprep.mubr.msk.f32.mxu0 %vm257_vm0, %v10947_v19 }
 0x148   : > { %8959 = vmatmul.mubr.msk.f32.gmra.mrb[20].mxu0 %vm257_vm0, %v10953_v16 }
 0x149   : > { %8961 = vmatprep.mubr.msk.f32.mxu0 %vm257_vm0, %v10955_v17 }
 0x14c   : > { %8962 = vmatmul.mubr.msk.f32.gmra.mrb[22].mxu0 %vm257_vm0, %v10961_v14 }
 0x14d   : > { %8964 = vmatprep.mubr.msk.f32.mxu0 %vm257_vm0, %v10963_v15 }
 0x150   : > { %8965 = vmatmul.mubr.msk.f32.gmra.mrb[24].mxu0 %vm257_vm0, %v10969_v12 }
 0x151   : > { %8967 = vmatprep.mubr.msk.f32.mxu0 %vm257_vm0, %v10971_v13 }
 0x154   : > { %8968 = vmatmul.mubr.msk.f32.gmra.mrb[26].mxu0 %vm257_vm0, %v10987_v5 }
 0x155   : > { %8970 = vmatprep.mubr.msk.f32.mxu0 %vm257_vm0, %v10989_v6 }
 0x158   : > { %8971 = vmatmul.mubr.msk.f32.gmra.mrb[28].mxu0 %vm257_vm0, %v10995_v7 }
 0x159   : > { %8973 = vmatprep.mubr.msk.f32.mxu0 %vm257_vm0, %v11190_v42 }
 0x15c   : > { %8974 = vmatmul.mubr.msk.f32.gmra.mrb[30].mxu0 %vm257_vm0, %v11196_v1 }
 0x15d   : > { %8978 = vmatprep.mubr.msk.f32.mxu0 %vm257_vm0, %v10694_v28  ;;  %v12719_v28 = vld [vmem:[#allocation35_spill] sm:$0xff] }
 0x160   : > { %8979 = vmatmul.mubr.msk.f32.vlgmr.msra.gmra.mrb[0].mxu0 %vm257_vm0, %v10696_v29  ;;  %v12720_v29 = vld [vmem:[#allocation36_spill] sm:$0xff] }
 0x161   : > { %9027 = vmatpush3.msra.mxu0 %v7748_v63  ;;  %8981 = vmatprep.mubr.msk.f32.mxu0 %vm257_vm0, %v10698_v30  ;;  %v11261_v30 = vld [vmem:[#allocation2 + $0x208] sm:$0xff]  ;;  %v7814_v63 = vld [vmem:[%s12517_s1 + $0x38] sm:$0xff] }
 0x162   : > { %9076 = vmatprep.subr.mxu0 %v7781_v11  ;;  %12721 = vst [vmem:[#allocation66_spill] sm:$0xff] %v11261_v30 }
 0x164   : > { %8982 = vmatmul.mubr.msk.f32.gmra.mrb[2].mxu0 %vm257_vm0, %v10718_v33  ;;  %v12722_v33 = vld [vmem:[#allocation37_spill] sm:$0xff] }
 0x165   : > { %8984 = vmatprep.mubr.msk.f32.mxu0 %vm257_vm0, %v10724_v34  ;;  %v11267_v34 = vld [vmem:[#allocation2 + $0x210] sm:$0xff] }
 0x166   : > { %12723 = vst [vmem:[#allocation67_spill] sm:$0xff] %v11267_v34 }
 0x168   : > { %8985 = vmatmul.mubr.msk.f32.gmra.mrb[4].mxu0 %vm257_vm0, %v10730_v35  ;;  %v12724_v35 = vld [vmem:[#allocation40_spill] sm:$0xff] }
 0x169   : > { %8987 = vmatprep.mubr.msk.f32.mxu0 %vm257_vm0, %v10732_v36 }
 0x16c   : > { %8988 = vmatmul.mubr.msk.f32.gmra.mrb[6].mxu0 %vm257_vm0, %v10768_v43 }
 0x16d   : > { %8990 = vmatprep.mubr.msk.f32.mxu0 %vm257_vm0, %v10770_v44 }
 0x170   : > { %8991 = vmatmul.mubr.msk.f32.gmra.mrb[8].mxu0 %vm257_vm0, %v10776_v45 }
 0x171   : > { %8993 = vmatprep.mubr.msk.f32.mxu0 %vm257_vm0, %v10778_v46 }
 0x174   : > { %8994 = vmatmul.mubr.msk.f32.gmra.mrb[10].mxu0 %vm257_vm0, %v10784_v47 }
 0x175   : > { %8996 = vmatprep.mubr.msk.f32.mxu0 %vm257_vm0, %v10786_v48 }
 0x178   : > { %8997 = vmatmul.mubr.msk.f32.gmra.mrb[12].mxu0 %vm257_vm0, %v10792_v49 }
 0x179   : > { %8999 = vmatprep.mubr.msk.f32.mxu0 %vm257_vm0, %v10794_v50 }
 0x17c   : > { %9000 = vmatmul.mubr.msk.f32.gmra.mrb[14].mxu0 %vm257_vm0, %v10800_v51 }
 0x17d   : > { %9002 = vmatprep.mubr.msk.f32.mxu0 %vm257_vm0, %v10802_v52 }
 0x180   : > { %9003 = vmatmul.mubr.msk.f32.gmra.mrb[16].mxu0 %vm257_vm0, %v10808_v53 }
 0x181   : > { %9005 = vmatprep.mubr.msk.f32.mxu0 %vm257_vm0, %v10810_v54 }
 0x184   : > { %9006 = vmatmul.mubr.msk.f32.gmra.mrb[18].mxu0 %vm257_vm0, %v10816_v55 }
 0x185   : > { %9008 = vmatprep.mubr.msk.f32.mxu0 %vm257_vm0, %v10818_v56 }
 0x188   : > { %9009 = vmatmul.mubr.msk.f32.gmra.mrb[20].mxu0 %vm257_vm0, %v10824_v57 }
 0x189   : > { %9011 = vmatprep.mubr.msk.f32.mxu0 %vm257_vm0, %v10826_v58 }
 0x18c   : > { %9012 = vmatmul.mubr.msk.f32.gmra.mrb[22].mxu0 %vm257_vm0, %v10832_v59 }
 0x18d   : > { %9014 = vmatprep.mubr.msk.f32.mxu0 %vm257_vm0, %v10834_v60 }
 0x190   : > { %9015 = vmatmul.mubr.msk.f32.gmra.mrb[24].mxu0 %vm257_vm0, %v10840_v61 }
 0x191   : > { %9017 = vmatprep.mubr.msk.f32.mxu0 %vm257_vm0, %v10842_v62  ;;  %v12731_v62 = vld [vmem:[#allocation47_spill] sm:$0xff] }
 0x194   : > { %9018 = vmatmul.mubr.msk.f32.gmra.mrb[26].mxu0 %vm257_vm0, %v12719_v28  ;;  %v12728_v28 = vld [vmem:[#allocation44_spill] sm:$0xff] }
 0x195   : > { %9020 = vmatprep.mubr.msk.f32.mxu0 %vm257_vm0, %v12720_v29  ;;  %v12725_v29 = vld [vmem:[#allocation41_spill] sm:$0xff] }
 0x198   : > { %9021 = vmatmul.mubr.msk.f32.gmra.mrb[28].mxu0 %vm257_vm0, %v12722_v33  ;;  %v12726_v33 = vld [vmem:[#allocation42_spill] sm:$0xff] }
 0x199   : > { %9023 = vmatprep.mubr.msk.f32.mxu0 %vm257_vm0, %v11261_v30  ;;  %v12727_v30 = vld [vmem:[#allocation43_spill] sm:$0xff] }
 0x19c   : > { %9024 = vmatmul.mubr.msk.f32.gmra.mrb[30].mxu0 %vm257_vm0, %v11267_v34  ;;  %v12729_v34 = vld [vmem:[#allocation45_spill] sm:$0xff] }
 0x19d   : > { %9028 = vmatprep.mubr.msk.f32.mxu0 %vm257_vm0, %v12724_v35  ;;  %v12730_v35 = vld [vmem:[#allocation46_spill] sm:$0xff] }
 0x1a0   : > { %9029 = vmatmul.mubr.msk.f32.vlgmr.msra.gmra.mrb[0].mxu0 %vm257_vm0, %v12725_v29  ;;  %v12733_v29 = vld [vmem:[#allocation49_spill] sm:$0xff] }
 0x1a1   : > { %9077 = vmatpush3.msra.mxu0 %v7781_v11  ;;  %9031 = vmatprep.mubr.msk.f32.mxu0 %vm257_vm0, %v12726_v33  ;;  %v12732_v11 = vld [vmem:[#allocation48_spill] sm:$0xff]  ;;  %v12734_v33 = vld [vmem:[#allocation50_spill] sm:$0xff] }
 0x1a2   : > { %9126 = vmatprep.subr.mxu0 %v7814_v63 }
 0x1a4   : > { %9032 = vmatmul.mubr.msk.f32.gmra.mrb[2].mxu0 %vm257_vm0, %v12727_v30  ;;  %v12735_v30 = vld [vmem:[#allocation51_spill] sm:$0xff] }
 0x1a5   : > { %9034 = vmatprep.mubr.msk.f32.mxu0 %vm257_vm0, %v12728_v28  ;;  %v12736_v28 = vld [vmem:[#allocation52_spill] sm:$0xff] }
 0x1a8   : > { %9035 = vmatmul.mubr.msk.f32.gmra.mrb[4].mxu0 %vm257_vm0, %v12729_v34  ;;  %v12737_v34 = vld [vmem:[#allocation53_spill] sm:$0xff] }
 0x1a9   : > { %9037 = vmatprep.mubr.msk.f32.mxu0 %vm257_vm0, %v12730_v35  ;;  %v12738_v35 = vld [vmem:[#allocation54_spill] sm:$0xff] }
 0x1ac   : > { %9038 = vmatmul.mubr.msk.f32.gmra.mrb[6].mxu0 %vm257_vm0, %v12731_v62  ;;  %v12739_v62 = vld [vmem:[#allocation55_spill] sm:$0xff] }
 0x1ad   : > { %9040 = vmatprep.mubr.msk.f32.mxu0 %vm257_vm0, %v12732_v11  ;;  %v12740_v11 = vld [vmem:[#allocation56_spill] sm:$0xff] }
 0x1b0   : > { %9041 = vmatmul.mubr.msk.f32.gmra.mrb[8].mxu0 %vm257_vm0, %v12733_v29  ;;  %v12741_v29 = vld [vmem:[#allocation57_spill] sm:$0xff] }
 0x1b1   : > { %9043 = vmatprep.mubr.msk.f32.mxu0 %vm257_vm0, %v12734_v33  ;;  %v12742_v33 = vld [vmem:[#allocation58_spill] sm:$0xff] }
 0x1b4   : > { %9044 = vmatmul.mubr.msk.f32.gmra.mrb[10].mxu0 %vm257_vm0, %v12735_v30  ;;  %v12743_v30 = vld [vmem:[#allocation59_spill] sm:$0xff] }
 0x1b5   : > { %9046 = vmatprep.mubr.msk.f32.mxu0 %vm257_vm0, %v12736_v28  ;;  %v12744_v28 = vld [vmem:[#allocation60_spill] sm:$0xff] }
 0x1b8   : > { %9047 = vmatmul.mubr.msk.f32.gmra.mrb[12].mxu0 %vm257_vm0, %v12737_v34  ;;  %v12745_v34 = vld [vmem:[#allocation61_spill] sm:$0xff] }
 0x1b9   : > { %9049 = vmatprep.mubr.msk.f32.mxu0 %vm257_vm0, %v12738_v35  ;;  %v12746_v35 = vld [vmem:[#allocation62_spill] sm:$0xff] }
 0x1bc   : > { %9050 = vmatmul.mubr.msk.f32.gmra.mrb[14].mxu0 %vm257_vm0, %v12739_v62 }
 0x1bd   : > { %9052 = vmatprep.mubr.msk.f32.mxu0 %vm257_vm0, %v12740_v11  ;;  %v12747_v11 = vld [vmem:[#allocation63_spill] sm:$0xff] }
 0x1c0   : > { %9053 = vmatmul.mubr.msk.f32.gmra.mrb[16].mxu0 %vm257_vm0, %v12741_v29 }
 0x1c1   : > { %9055 = vmatprep.mubr.msk.f32.mxu0 %vm257_vm0, %v12742_v33  ;;  %v12748_v33 = vld [vmem:[#allocation64_spill] sm:$0xff] }
 0x1c4   : > { %9056 = vmatmul.mubr.msk.f32.gmra.mrb[18].mxu0 %vm257_vm0, %v12743_v30 }
 0x1c5   : > { %9058 = vmatprep.mubr.msk.f32.mxu0 %vm257_vm0, %v12744_v28 }
 0x1c8   : > { %9059 = vmatmul.mubr.msk.f32.gmra.mrb[20].mxu0 %vm257_vm0, %v12745_v34  ;;  %v11332_v34 = vld [vmem:[#allocation2 + $0x209] sm:$0xff] }
 0x1c9   : > { %9061 = vmatprep.mubr.msk.f32.mxu0 %vm257_vm0, %v12746_v35 }
 0x1cc   : > { %9062 = vmatmul.mubr.msk.f32.gmra.mrb[22].mxu0 %vm257_vm0, %v11100_v4 }
 0x1cd   : > { %9064 = vmatprep.mubr.msk.f32.mxu0 %vm257_vm0, %v12747_v11  ;;  %v11338_v11 = vld [vmem:[#allocation2 + $0x211] sm:$0xff] }
 0x1d0   : > { %9065 = vmatmul.mubr.msk.f32.gmra.mrb[24].mxu0 %vm257_vm0, %v11108_v0 }
 0x1d1   : > { %9067 = vmatprep.mubr.msk.f32.mxu0 %vm257_vm0, %v12748_v33 }
 0x1d4   : > { %9068 = vmatmul.mubr.msk.f32.gmra.mrb[26].mxu0 %vm257_vm0, %v11116_v3 }
 0x1d5   : > { %9070 = vmatprep.mubr.msk.f32.mxu0 %vm257_vm0, %v11118_v8  ;;  %v7847_v8 = vld [vmem:[%s12517_s1 + $0x40] sm:$0xff] }
 0x1d8   : > { %9071 = vmatmul.mubr.msk.f32.gmra.mrb[28].mxu0 %vm257_vm0, %v11124_v41 }
 0x1d9   : > { %9073 = vmatprep.mubr.msk.f32.mxu0 %vm257_vm0, %v11332_v34 }
 0x1dc   : > { %9074 = vmatmul.mubr.msk.f32.gmra.mrb[30].mxu0 %vm257_vm0, %v11338_v11 }
 0x1dd   : > { %9078 = vmatprep.mubr.msk.f32.mxu0 %vm257_vm0, %v10874_v39  ;;  %v12765_v39 = vld [vmem:[#allocation52_spill] sm:$0xff] }
 0x1e0   : > { %9079 = vmatmul.mubr.msk.f32.vlgmr.msra.gmra.mrb[0].mxu0 %vm257_vm0, %v10881_v2 }
 0x1e1   : > { %9127 = vmatpush3.msra.mxu0 %v7814_v63  ;;  %9081 = vmatprep.mubr.msk.f32.mxu0 %vm257_vm0, %v10883_v10 }
 0x1e2   : > { %9176 = vmatprep.subr.mxu0 %v7847_v8 }
 0x1e4   : > { %9082 = vmatmul.mubr.msk.f32.gmra.mrb[2].mxu0 %vm257_vm0, %v10889_v9 }
 0x1e5   : > { %9084 = vmatprep.mubr.msk.f32.mxu0 %vm257_vm0, %v10891_v40  ;;  %v12766_v40 = vld [vmem:[#allocation53_spill] sm:$0xff] }
 0x1e8   : > { %9085 = vmatmul.mubr.msk.f32.gmra.mrb[4].mxu0 %vm257_vm0, %v10897_v37  ;;  %v12763_v37 = vld [vmem:[#allocation50_spill] sm:$0xff] }
 0x1e9   : > { %9087 = vmatprep.mubr.msk.f32.mxu0 %vm257_vm0, %v10899_v38  ;;  %v12764_v38 = vld [vmem:[#allocation51_spill] sm:$0xff] }
 0x1ec   : > { %9088 = vmatmul.mubr.msk.f32.gmra.mrb[6].mxu0 %vm257_vm0, %v10905_v31  ;;  %v12760_v31 = vld [vmem:[#allocation47_spill] sm:$0xff] }
 0x1ed   : > { %9090 = vmatprep.mubr.msk.f32.mxu0 %vm257_vm0, %v10907_v32  ;;  %v12761_v32 = vld [vmem:[#allocation48_spill] sm:$0xff] }
 0x1f0   : > { %9091 = vmatmul.mubr.msk.f32.gmra.mrb[8].mxu0 %vm257_vm0, %v10913_v26  ;;  %v12758_v26 = vld [vmem:[#allocation45_spill] sm:$0xff] }
 0x1f1   : > { %9093 = vmatprep.mubr.msk.f32.mxu0 %vm257_vm0, %v10915_v27  ;;  %v12759_v27 = vld [vmem:[#allocation46_spill] sm:$0xff] }
 0x1f4   : > { %9094 = vmatmul.mubr.msk.f32.gmra.mrb[10].mxu0 %vm257_vm0, %v10921_v24  ;;  %v12756_v24 = vld [vmem:[#allocation43_spill] sm:$0xff] }
 0x1f5   : > { %9096 = vmatprep.mubr.msk.f32.mxu0 %vm257_vm0, %v10923_v25  ;;  %v12757_v25 = vld [vmem:[#allocation44_spill] sm:$0xff] }
 0x1f8   : > { %9097 = vmatmul.mubr.msk.f32.gmra.mrb[12].mxu0 %vm257_vm0, %v10929_v22  ;;  %v3039_v22 = vld [vmem:[#allocation2 + $0x230] sm:$0xff] }
 0x1f9   : > { %9099 = vmatprep.mubr.msk.f32.mxu0 %vm257_vm0, %v10931_v23  ;;  %v12755_v23 = vld [vmem:[#allocation42_spill] sm:$0xff] }
 0x1fc   : > { %9100 = vmatmul.mubr.msk.f32.gmra.mrb[14].mxu0 %vm257_vm0, %v10937_v20  ;;  %v3038_v20 = vld [vmem:[#allocation2 + $0x228] sm:$0xff] }
 0x1fd   : > { %9102 = vmatprep.mubr.msk.f32.mxu0 %vm257_vm0, %v10939_v21  ;;  %v12754_v21 = vld [vmem:[#allocation67_spill] sm:$0xff] }
 0x200   : > { %9103 = vmatmul.mubr.msk.f32.gmra.mrb[16].mxu0 %vm257_vm0, %v10945_v18  ;;  %v12752_v18 = vld [vmem:[#allocation37_spill] sm:$0xff] }
 0x201   : > { %9105 = vmatprep.mubr.msk.f32.mxu0 %vm257_vm0, %v10947_v19  ;;  %v12753_v19 = vld [vmem:[#allocation66_spill] sm:$0xff] }
 0x204   : > { %9106 = vmatmul.mubr.msk.f32.gmra.mrb[18].mxu0 %vm257_vm0, %v10953_v16  ;;  %v12750_v16 = vld [vmem:[#allocation35_spill] sm:$0xff] }
 0x205   : > { %9108 = vmatprep.mubr.msk.f32.mxu0 %vm257_vm0, %v10955_v17  ;;  %v12751_v17 = vld [vmem:[#allocation36_spill] sm:$0xff] }
 0x208   : > { %9109 = vmatmul.mubr.msk.f32.gmra.mrb[20].mxu0 %vm257_vm0, %v10961_v14  ;;  %v2651_v14 = vld [vmem:[#allocation2 + $0x227] sm:$0xff] }
 0x209   : > { %9111 = vmatprep.mubr.msk.f32.mxu0 %vm257_vm0, %v10963_v15  ;;  %v12749_v15 = vld [vmem:[#allocation34_spill] sm:$0xff] }
 0x20c   : > { %9112 = vmatmul.mubr.msk.f32.gmra.mrb[22].mxu0 %vm257_vm0, %v10969_v12  ;;  %v2652_v12 = vld [vmem:[#allocation2 + $0x22f] sm:$0xff] }
 0x20d   : > { %9114 = vmatprep.mubr.msk.f32.mxu0 %vm257_vm0, %v10971_v13  ;;  %v3008_v13 = vld [vmem:[#allocation2 + $0x48] sm:$0xff] }
 0x210   : > { %9115 = vmatmul.mubr.msk.f32.gmra.mrb[24].mxu0 %vm257_vm0, %v10987_v5  ;;  %v3009_v5 = vld [vmem:[#allocation2 + $0x50] sm:$0xff] }
 0x211   : > { %9117 = vmatprep.mubr.msk.f32.mxu0 %vm257_vm0, %v10989_v6  ;;  %v3010_v6 = vld [vmem:[#allocation2 + $0x68] sm:$0xff] }
 0x214   : > { %9118 = vmatmul.mubr.msk.f32.gmra.mrb[26].mxu0 %vm257_vm0, %v10995_v7  ;;  %v3011_v7 = vld [vmem:[#allocation2 + $0x70] sm:$0xff] }
 0x215   : > { %9120 = vmatprep.mubr.msk.f32.mxu0 %vm257_vm0, %v11190_v42 }
 0x218   : > { %9121 = vmatmul.mubr.msk.f32.gmra.mrb[28].mxu0 %vm257_vm0, %v11196_v1 }
 0x219   : > { %9123 = vmatprep.mubr.msk.f32.mxu0 %vm257_vm0, %v2651_v14 }
 0x21c   : > { %9124 = vmatmul.mubr.msk.f32.gmra.mrb[30].mxu0 %vm257_vm0, %v2652_v12 }
 0x21d   : > { %9128 = vmatprep.mubr.msk.f32.mxu0 %vm257_vm0, %v3008_v13 }
 0x220   : > { %9129 = vmatmul.mubr.msk.f32.vlgmr.msra.gmra.mrb[0].mxu0 %vm257_vm0, %v3009_v5 }
 0x221   : > { %9177 = vmatpush3.msra.mxu0 %v7847_v8  ;;  %9131 = vmatprep.mubr.msk.f32.mxu0 %vm257_vm0, %v3010_v6 }
 0x224   : > { %9132 = vmatmul.mubr.msk.f32.gmra.mrb[2].mxu0 %vm257_vm0, %v3011_v7 }
 0x225   : > { %9134 = vmatprep.mubr.msk.f32.mxu0 %vm257_vm0, %v10732_v36  ;;  %v12762_v36 = vld [vmem:[#allocation49_spill] sm:$0xff] }
 0x228   : > { %9135 = vmatmul.mubr.msk.f32.gmra.mrb[4].mxu0 %vm257_vm0, %v10768_v43  ;;  %v12767_v43 = vld [vmem:[#allocation54_spill] sm:$0xff] }
 0x229   : > { %9137 = vmatprep.mubr.msk.f32.mxu0 %vm257_vm0, %v10770_v44  ;;  %v12768_v44 = vld [vmem:[#allocation56_spill] sm:$0xff] }
 0x22c   : > { %9138 = vmatmul.mubr.msk.f32.gmra.mrb[6].mxu0 %vm257_vm0, %v10776_v45  ;;  %v12769_v45 = vld [vmem:[#allocation58_spill] sm:$0xff] }
 0x22d   : > { %9140 = vmatprep.mubr.msk.f32.mxu0 %vm257_vm0, %v10778_v46  ;;  %v12770_v46 = vld [vmem:[#allocation61_spill] sm:$0xff] }
 0x230   : > { %9141 = vmatmul.mubr.msk.f32.gmra.mrb[8].mxu0 %vm257_vm0, %v10784_v47  ;;  %v12771_v47 = vld [vmem:[#allocation63_spill] sm:$0xff] }
 0x231   : > { %9143 = vmatprep.mubr.msk.f32.mxu0 %vm257_vm0, %v10786_v48  ;;  %v12772_v48 = vld [vmem:[#allocation65_spill] sm:$0xff] }
 0x234   : > { %9144 = vmatmul.mubr.msk.f32.gmra.mrb[10].mxu0 %vm257_vm0, %v10792_v49  ;;  %v3426_v49 = vld [vmem:[#allocation2 + $0x231] sm:$0xff] }
 0x235   : > { %9146 = vmatprep.mubr.msk.f32.mxu0 %vm257_vm0, %v10794_v50  ;;  %v7881_v50 = vld [vmem:[%s12519_s3 + $0x8] sm:$0xff] }
 0x236   : > { %9226 = vmatprep.subr.mxu1 %v7881_v50 }
 0x237   : > { %9227 = vmatpush3.msra.mxu1 %v7881_v50 }
 0x238   : > { %9147 = vmatmul.mubr.msk.f32.gmra.mrb[12].mxu0 %vm257_vm0, %v10800_v51  ;;  %v3999_v51 = vld [vmem:[#allocation3 + $0x8] sm:$0xff] }
 0x239   : > { %9149 = vmatprep.mubr.msk.f32.mxu0 %vm257_vm0, %v10802_v52  ;;  %9228 = vmatprep.mubr.msk.f32.mxu1 %vm257_vm0, %v3999_v51  ;;  %v4000_v52 = vld [vmem:[#allocation3 + $0x10] sm:$0xff] }
 0x23a   : > { %9229 = vmatmul.mubr.msk.f32.vlgmr.msra.gmra.mrb[0].mxu1 %vm257_vm0, %v4000_v52 }
 0x23c   : > { %9150 = vmatmul.mubr.msk.f32.gmra.mrb[14].mxu0 %vm257_vm0, %v10808_v53  ;;  %v4001_v53 = vld [vmem:[#allocation3 + $0x28] sm:$0xff] }
 0x23d   : > { %9152 = vmatprep.mubr.msk.f32.mxu0 %vm257_vm0, %v10810_v54  ;;  %v3998_v54 = vld [vmem:[%s12519_s3] sm:$0xff]  ;;  %9231 = vmatprep.mubr.msk.f32.mxu1 %vm257_vm0, %v4001_v53 }
 0x23e   : > { %9276 = vmatprep.subr.mxu1 %v3998_v54 }
 0x23f   : > { %9277 = vmatpush3.msra.mxu1 %v3998_v54 }
 0x240   : > { %9153 = vmatmul.mubr.msk.f32.gmra.mrb[16].mxu0 %vm257_vm0, %v10816_v55  ;;  %v4002_v55 = vld [vmem:[#allocation3 + $0x30] sm:$0xff] }
 0x241   : > { %9155 = vmatprep.mubr.msk.f32.mxu0 %vm257_vm0, %v10818_v56  ;;  %9232 = vmatmul.mubr.msk.f32.gmra.mrb[2].mxu1 %vm257_vm0, %v4002_v55  ;;  %v11540_v56 = vld [vmem:[%s12519_s3 + $0x10] sm:$0xff] }
 0x242   : > { %9326 = vmatprep.subr.mxu1 %v11540_v56 }
 0x244   : > { %9156 = vmatmul.mubr.msk.f32.gmra.mrb[18].mxu0 %vm257_vm0, %v10824_v57  ;;  %v11546_v57 = vld [vmem:[%s12518_s2] ss:$0 sm:$0xff] }
 0x245   : > { %9158 = vmatprep.mubr.msk.f32.mxu0 %vm257_vm0, %v10826_v58 }
 0x248   : > { %9159 = vmatmul.mubr.msk.f32.gmra.mrb[20].mxu0 %vm257_vm0, %v10832_v59 }
 0x249   : > { %9161 = vmatprep.mubr.msk.f32.mxu0 %vm257_vm0, %v10834_v60 }
 0x24c   : > { %9162 = vmatmul.mubr.msk.f32.gmra.mrb[22].mxu0 %vm257_vm0, %v10840_v61 }
 0x24d   : > { %9164 = vmatprep.mubr.msk.f32.mxu0 %vm257_vm0, %v12749_v15 }
 0x250   : > { %9165 = vmatmul.mubr.msk.f32.gmra.mrb[24].mxu0 %vm257_vm0, %v12750_v16 }
 0x251   : > { %9167 = vmatprep.mubr.msk.f32.mxu0 %vm257_vm0, %v12751_v17 }
 0x254   : > { %9168 = vmatmul.mubr.msk.f32.gmra.mrb[26].mxu0 %vm257_vm0, %v12752_v18 }
 0x255   : > { %9170 = vmatprep.mubr.msk.f32.mxu0 %vm257_vm0, %v12753_v19 }
 0x258   : > { %9171 = vmatmul.mubr.msk.f32.gmra.mrb[28].mxu0 %vm257_vm0, %v12754_v21 }
 0x259   : > { %9173 = vmatprep.mubr.msk.f32.mxu0 %vm257_vm0, %v3038_v20 }
 0x25c   : > { %9174 = vmatmul.mubr.msk.f32.gmra.mrb[30].mxu0 %vm257_vm0, %v3039_v22 }
 0x25d   : > { %9178 = vmatprep.mubr.msk.f32.mxu0 %vm257_vm0, %v12755_v23 }
 0x260   : > { %9179 = vmatmul.mubr.msk.f32.vlgmr.msra.gmra.mrb[0].mxu0 %vm257_vm0, %v12756_v24 }
 0x261   : > { %9181 = vmatprep.mubr.msk.f32.mxu0 %vm257_vm0, %v12757_v25 }
 0x264   : > { %9182 = vmatmul.mubr.msk.f32.gmra.mrb[2].mxu0 %vm257_vm0, %v12758_v26 }
 0x265   : > { %9184 = vmatprep.mubr.msk.f32.mxu0 %vm257_vm0, %v12759_v27 }
 0x268   : > { %9185 = vmatmul.mubr.msk.f32.gmra.mrb[4].mxu0 %vm257_vm0, %v12760_v31 }
 0x269   : > { %9187 = vmatprep.mubr.msk.f32.mxu0 %vm257_vm0, %v12761_v32 }
 0x26c   : > { %9188 = vmatmul.mubr.msk.f32.gmra.mrb[6].mxu0 %vm257_vm0, %v12762_v36 }
 0x26d   : > { %9190 = vmatprep.mubr.msk.f32.mxu0 %vm257_vm0, %v12763_v37 }
 0x270   : > { %9191 = vmatmul.mubr.msk.f32.gmra.mrb[8].mxu0 %vm257_vm0, %v12764_v38 }
 0x271   : > { %9193 = vmatprep.mubr.msk.f32.mxu0 %vm257_vm0, %v12765_v39 }
 0x274   : > { %9194 = vmatmul.mubr.msk.f32.gmra.mrb[10].mxu0 %vm257_vm0, %v12766_v40 }
 0x275   : > { %9196 = vmatprep.mubr.msk.f32.mxu0 %vm257_vm0, %v12767_v43 }
 0x278   : > { %9197 = vmatmul.mubr.msk.f32.gmra.mrb[12].mxu0 %vm257_vm0, %v12739_v62 }
 0x279   : > { %9199 = vmatprep.mubr.msk.f32.mxu0 %vm257_vm0, %v12768_v44 }
 0x27c   : > { %9200 = vmatmul.mubr.msk.f32.gmra.mrb[14].mxu0 %vm257_vm0, %v12741_v29 }
 0x27d   : > { %9202 = vmatprep.mubr.msk.f32.mxu0 %vm257_vm0, %v12769_v45 }
 0x280   : > { %9203 = vmatmul.mubr.msk.f32.gmra.mrb[16].mxu0 %vm257_vm0, %v12743_v30 }
 0x281   : > { %9205 = vmatprep.mubr.msk.f32.mxu0 %vm257_vm0, %v12744_v28 }
 0x284   : > { %9206 = vmatmul.mubr.msk.f32.gmra.mrb[18].mxu0 %vm257_vm0, %v12770_v46 }
 0x285   : > { %9208 = vmatprep.mubr.msk.f32.mxu0 %vm257_vm0, %v12746_v35 }
 0x288   : > { %9209 = vmatmul.mubr.msk.f32.gmra.mrb[20].mxu0 %vm257_vm0, %v11100_v4  ;;  %v3425_v4 = vld [vmem:[#allocation2 + $0x229] sm:$0xff] }
 0x289   : > { %9211 = vmatprep.mubr.msk.f32.mxu0 %vm257_vm0, %v12771_v47 }
 0x28c   : > { %9212 = vmatmul.mubr.msk.f32.gmra.mrb[22].mxu0 %vm257_vm0, %v11108_v0 }
 0x28d   : > { %9214 = vmatprep.mubr.msk.f32.mxu0 %vm257_vm0, %v12748_v33 }
 0x290   : > { %9215 = vmatmul.mubr.msk.f32.gmra.mrb[24].mxu0 %vm257_vm0, %v11116_v3 }
 0x291   : > { %9217 = vmatprep.mubr.msk.f32.mxu0 %vm257_vm0, %v12772_v48 }
 0x294   : > { %9218 = vmatmul.mubr.msk.f32.gmra.mrb[26].mxu0 %vm257_vm0, %v11124_v41 }
 0x295   : > { %9220 = vmatprep.mubr.msk.f32.mxu0 %vm257_vm0, %v11332_v34 }
 0x298   : > { %9221 = vmatmul.mubr.msk.f32.gmra.mrb[28].mxu0 %vm257_vm0, %v11338_v11 }
 0x299   : > { %9223 = vmatprep.mubr.msk.f32.mxu0 %vm257_vm0, %v3425_v4 }
 0x29c   : > { %9224 = vmatmul.mubr.msk.f32.gmra.mrb[30].mxu0 %vm257_vm0, %v3426_v49 }
 0x333   : > { %v9180_v58 = vpop.f32.mrb[0].mxu0 }
 0x334   : > { %v3790_v59 = vadd.f32 %v9180_v58, %v11546_v57  ;;  %v3591_v60 = vpop.f32.mrb[1].mxu0 }
 0x335   : > { %v3789_v61 = vadd.f32 %v11546_v57, %v3591_v60 }
 0x336   : > { %v3822_v62 = vmax.f32 %v3790_v59, 0.0 }
 0x337   : > { %v3821_v0 = vmax.f32 %v3789_v61, 0.0  ;;  %v9183_v2 = vpop.f32.mrb[2].mxu0 }
 0x338   : > { %3935 = vst.msk [vmem:[#allocation3 + $0x50] sm:$0xff] %vm257_vm0, %v3822_v62  ;;  %v3792_v10 = vadd.f32 %v9183_v2, %v11546_v57  ;;  %v3601_v9 = vpop.f32.mrb[3].mxu0 }
 0x339   : > { %3934 = vst.msk [vmem:[#allocation3 + $0x48] sm:$0xff] %vm257_vm0, %v3821_v0  ;;  %v3791_v3 = vadd.f32 %v11546_v57, %v3601_v9 }
 0x33a   : > { %v3824_v8 = vmax.f32 %v3792_v10, 0.0 }
 0x33b   : > { %v3823_v41 = vmax.f32 %v3791_v3, 0.0  ;;  %v9186_v42 = vpop.f32.mrb[4].mxu0 }
 0x33c   : > { %3937 = vst.msk [vmem:[#allocation3 + $0x70] sm:$0xff] %vm257_vm0, %v3824_v8  ;;  %v3794_v1 = vadd.f32 %v9186_v42, %v11546_v57  ;;  %v3611_v28 = vpop.f32.mrb[5].mxu0 }
 0x33d   : > { %3936 = vst.msk [vmem:[#allocation3 + $0x68] sm:$0xff] %vm257_vm0, %v3823_v41  ;;  %v3793_v30 = vadd.f32 %v11546_v57, %v3611_v28 }
 0x33e   : > { %v3826_v33 = vmax.f32 %v3794_v1, 0.0 }
 0x33f   : > { %v3825_v34 = vmax.f32 %v3793_v30, 0.0  ;;  %v9189_v63 = vpop.f32.mrb[6].mxu0  ;;  %v11566_v12 = vld [vmem:[#allocation3 + $0x50] sm:$0xff] }
 0x340   : > { %3939 = vst.msk [vmem:[#allocation3 + $0x90] sm:$0xff] %vm257_vm0, %v3826_v33  ;;  %v3796_v35 = vadd.f32 %v9189_v63, %v11546_v57  ;;  %v3621_v11 = vpop.f32.mrb[7].mxu0  ;;  %v11560_v29 = vld [vmem:[#allocation3 + $0x48] sm:$0xff] }
 0x341   : > { %3938 = vst.msk [vmem:[#allocation3 + $0x88] sm:$0xff] %vm257_vm0, %v3825_v34  ;;  %v3795_v14 = vadd.f32 %v11546_v57, %v3621_v11  ;;  %9234 = vmatprep.mubr.msk.f32.mxu1 %vm257_vm0, %v11560_v29 }
 0x342   : > { %v3828_v13 = vmax.f32 %v3796_v35, 0.0  ;;  %9235 = vmatmul.mubr.msk.f32.gmra.mrb[4].mxu1 %vm257_vm0, %v11566_v12 }
 0x343   : > { %v3827_v5 = vmax.f32 %v3795_v14, 0.0  ;;  %v9192_v6 = vpop.f32.mrb[8].mxu0  ;;  %v11578_v18 = vld [vmem:[#allocation3 + $0x70] sm:$0xff] }
 0x344   : > { %3941 = vst.msk [vmem:[#allocation3 + $0xb0] sm:$0xff] %vm257_vm0, %v3828_v13  ;;  %v3798_v7 = vadd.f32 %v9192_v6, %v11546_v57  ;;  %v3631_v15 = vpop.f32.mrb[9].mxu0  ;;  %v11572_v16 = vld [vmem:[#allocation3 + $0x68] sm:$0xff] }
 0x345   : > { %3940 = vst.msk [vmem:[#allocation3 + $0xa8] sm:$0xff] %vm257_vm0, %v3827_v5  ;;  %v3797_v17 = vadd.f32 %v11546_v57, %v3631_v15  ;;  %9237 = vmatprep.mubr.msk.f32.mxu1 %vm257_vm0, %v11572_v16 }
 0x346   : > { %v3830_v19 = vmax.f32 %v3798_v7, 0.0  ;;  %9238 = vmatmul.mubr.msk.f32.gmra.mrb[6].mxu1 %vm257_vm0, %v11578_v18 }
 0x347   : > { %v3829_v20 = vmax.f32 %v3797_v17, 0.0  ;;  %v9195_v21 = vpop.f32.mrb[10].mxu0  ;;  %v11590_v26 = vld [vmem:[#allocation3 + $0x90] sm:$0xff] }
 0x348   : > { %3943 = vst.msk [vmem:[#allocation3 + $0xd0] sm:$0xff] %vm257_vm0, %v3830_v19  ;;  %v3800_v22 = vadd.f32 %v9195_v21, %v11546_v57  ;;  %v3641_v23 = vpop.f32.mrb[11].mxu0  ;;  %v11584_v24 = vld [vmem:[#allocation3 + $0x88] sm:$0xff] }
 0x349   : > { %3942 = vst.msk [vmem:[#allocation3 + $0xc8] sm:$0xff] %vm257_vm0, %v3829_v20  ;;  %v3799_v25 = vadd.f32 %v11546_v57, %v3641_v23  ;;  %9240 = vmatprep.mubr.msk.f32.mxu1 %vm257_vm0, %v11584_v24 }
 0x34a   : > { %v3832_v27 = vmax.f32 %v3800_v22, 0.0  ;;  %9241 = vmatmul.mubr.msk.f32.gmra.mrb[8].mxu1 %vm257_vm0, %v11590_v26 }
 0x34b   : > { %v3831_v31 = vmax.f32 %v3799_v25, 0.0  ;;  %v9198_v32 = vpop.f32.mrb[12].mxu0  ;;  %v11602_v40 = vld [vmem:[#allocation3 + $0xb0] sm:$0xff] }
 0x34c   : > { %3945 = vst.msk [vmem:[#allocation3 + $0xf0] sm:$0xff] %vm257_vm0, %v3832_v27  ;;  %v3802_v36 = vadd.f32 %v9198_v32, %v11546_v57  ;;  %v3651_v37 = vpop.f32.mrb[13].mxu0  ;;  %v11596_v38 = vld [vmem:[#allocation3 + $0xa8] sm:$0xff] }
 0x34d   : > { %3944 = vst.msk [vmem:[#allocation3 + $0xe8] sm:$0xff] %vm257_vm0, %v3831_v31  ;;  %v3801_v39 = vadd.f32 %v11546_v57, %v3651_v37  ;;  %9243 = vmatprep.mubr.msk.f32.mxu1 %vm257_vm0, %v11596_v38 }
 0x34e   : > { %v3834_v43 = vmax.f32 %v3802_v36, 0.0  ;;  %9244 = vmatmul.mubr.msk.f32.gmra.mrb[10].mxu1 %vm257_vm0, %v11602_v40 }
 0x34f   : > { %v3833_v44 = vmax.f32 %v3801_v39, 0.0  ;;  %v9201_v45 = vpop.f32.mrb[14].mxu0  ;;  %v11614_v49 = vld [vmem:[#allocation3 + $0xd0] sm:$0xff] }
 0x350   : > { %3947 = vst.msk [vmem:[#allocation3 + $0x110] sm:$0xff] %vm257_vm0, %v3834_v43  ;;  %v3804_v46 = vadd.f32 %v9201_v45, %v11546_v57  ;;  %v3661_v47 = vpop.f32.mrb[15].mxu0  ;;  %v11608_v48 = vld [vmem:[#allocation3 + $0xc8] sm:$0xff] }
 0x351   : > { %3946 = vst.msk [vmem:[#allocation3 + $0x108] sm:$0xff] %vm257_vm0, %v3833_v44  ;;  %v3803_v4 = vadd.f32 %v11546_v57, %v3661_v47  ;;  %9246 = vmatprep.mubr.msk.f32.mxu1 %vm257_vm0, %v11608_v48 }
 0x352   : > { %v3836_v50 = vmax.f32 %v3804_v46, 0.0  ;;  %9247 = vmatmul.mubr.msk.f32.gmra.mrb[12].mxu1 %vm257_vm0, %v11614_v49 }
 0x353   : > { %v3835_v51 = vmax.f32 %v3803_v4, 0.0  ;;  %v9204_v52 = vpop.f32.mrb[16].mxu0  ;;  %v11626_v59 = vld [vmem:[#allocation3 + $0xf0] sm:$0xff] }
 0x354   : > { %3949 = vst.msk [vmem:[#allocation3 + $0x130] sm:$0xff] %vm257_vm0, %v3836_v50  ;;  %v3806_v53 = vadd.f32 %v9204_v52, %v11546_v57  ;;  %v3671_v54 = vpop.f32.mrb[17].mxu0  ;;  %v11620_v55 = vld [vmem:[#allocation3 + $0xe8] sm:$0xff] }
 0x355   : > { %3948 = vst.msk [vmem:[#allocation3 + $0x128] sm:$0xff] %vm257_vm0, %v3835_v51  ;;  %v3805_v58 = vadd.f32 %v11546_v57, %v3671_v54  ;;  %9249 = vmatprep.mubr.msk.f32.mxu1 %vm257_vm0, %v11620_v55 }
 0x356   : > { %v3838_v60 = vmax.f32 %v3806_v53, 0.0  ;;  %9250 = vmatmul.mubr.msk.f32.gmra.mrb[14].mxu1 %vm257_vm0, %v11626_v59 }
 0x357   : > { %v3837_v61 = vmax.f32 %v3805_v58, 0.0  ;;  %v9207_v62 = vpop.f32.mrb[18].mxu0  ;;  %v11638_v3 = vld [vmem:[#allocation3 + $0x110] sm:$0xff] }
 0x358   : > { %3951 = vst.msk [vmem:[#allocation3 + $0x150] sm:$0xff] %vm257_vm0, %v3838_v60  ;;  %v3808_v0 = vadd.f32 %v9207_v62, %v11546_v57  ;;  %v3681_v2 = vpop.f32.mrb[19].mxu0  ;;  %v11632_v10 = vld [vmem:[#allocation3 + $0x108] sm:$0xff] }
 0x359   : > { %3950 = vst.msk [vmem:[#allocation3 + $0x148] sm:$0xff] %vm257_vm0, %v3837_v61  ;;  %v3807_v9 = vadd.f32 %v11546_v57, %v3681_v2  ;;  %9252 = vmatprep.mubr.msk.f32.mxu1 %vm257_vm0, %v11632_v10 }
 0x35a   : > { %v3840_v8 = vmax.f32 %v3808_v0, 0.0  ;;  %9253 = vmatmul.mubr.msk.f32.gmra.mrb[16].mxu1 %vm257_vm0, %v11638_v3 }
 0x35b   : > { %v3839_v41 = vmax.f32 %v3807_v9, 0.0  ;;  %v9210_v42 = vpop.f32.mrb[20].mxu0  ;;  %v11650_v34 = vld [vmem:[#allocation3 + $0x130] sm:$0xff] }
 0x35c   : > { %3953 = vst.msk [vmem:[#allocation3 + $0x170] sm:$0xff] %vm257_vm0, %v3840_v8  ;;  %v3810_v1 = vadd.f32 %v9210_v42, %v11546_v57  ;;  %v3691_v28 = vpop.f32.mrb[21].mxu0  ;;  %v11644_v30 = vld [vmem:[#allocation3 + $0x128] sm:$0xff] }
 0x35d   : > { %3952 = vst.msk [vmem:[#allocation3 + $0x168] sm:$0xff] %vm257_vm0, %v3839_v41  ;;  %v3809_v33 = vadd.f32 %v11546_v57, %v3691_v28  ;;  %9255 = vmatprep.mubr.msk.f32.mxu1 %vm257_vm0, %v11644_v30  ;;  %v3967_v28 = vld [vmem:[#allocation3 + $0xe] sm:$0xff] }
 0x35e   : > { %v3842_v63 = vmax.f32 %v3810_v1, 0.0  ;;  %9256 = vmatmul.mubr.msk.f32.gmra.mrb[18].mxu1 %vm257_vm0, %v11650_v34  ;;  %v3966_v1 = vld [vmem:[#allocation3 + $0x6] sm:$0xff] }
 0x35f   : > { %v3841_v35 = vmax.f32 %v3809_v33, 0.0  ;;  %v9213_v11 = vpop.f32.mrb[22].mxu0  ;;  %v11662_v7 = vld [vmem:[#allocation3 + $0x150] sm:$0xff]  ;;  %v3968_v33 = vld [vmem:[#allocation3 + $0x26] sm:$0xff] }
 0x360   : > { %3955 = vst.msk [vmem:[#allocation3 + $0x190] sm:$0xff] %vm257_vm0, %v3842_v63  ;;  %v3812_v14 = vadd.f32 %v9213_v11, %v11546_v57  ;;  %v3701_v13 = vpop.f32.mrb[23].mxu0  ;;  %v11656_v5 = vld [vmem:[#allocation3 + $0x148] sm:$0xff]  ;;  %v11728_v63 = vld [vmem:[%s12519_s3 + $0x18] sm:$0xff] }
 0x361   : > { %3954 = vst.msk [vmem:[#allocation3 + $0x188] sm:$0xff] %vm257_vm0, %v3841_v35  ;;  %v3811_v6 = vadd.f32 %v11546_v57, %v3701_v13  ;;  %9258 = vmatprep.mubr.msk.f32.mxu1 %vm257_vm0, %v11656_v5  ;;  %v3969_v35 = vld [vmem:[#allocation3 + $0x2e] sm:$0xff]  ;;  %v11735_v11 = vld [vmem:[#allocation3 + $0x46] sm:$0xff] }
 0x362   : > { %v3844_v15 = vmax.f32 %v3812_v14, 0.0  ;;  %9259 = vmatmul.mubr.msk.f32.gmra.mrb[20].mxu1 %vm257_vm0, %v11662_v7  ;;  %v11739_v14 = vld [vmem:[#allocation3 + $0x4e] sm:$0xff]  ;;  %v11743_v13 = vld [vmem:[#allocation3 + $0x66] sm:$0xff] }
 0x363   : > { %v3843_v17 = vmax.f32 %v3811_v6, 0.0  ;;  %v9216_v19 = vpop.f32.mrb[24].mxu0  ;;  %v11674_v25 = vld [vmem:[#allocation3 + $0x170] sm:$0xff]  ;;  %v11751_v6 = vld [vmem:[#allocation3 + $0x86] sm:$0xff] }
 0x364   : > { %3957 = vst.msk [vmem:[#allocation3 + $0x1b0] sm:$0xff] %vm257_vm0, %v3844_v15  ;;  %v3814_v20 = vadd.f32 %v9216_v19, %v11546_v57  ;;  %v3711_v21 = vpop.f32.mrb[25].mxu0  ;;  %v11668_v22 = vld [vmem:[#allocation3 + $0x168] sm:$0xff] }
 0x365   : > { %3956 = vst.msk [vmem:[#allocation3 + $0x1a8] sm:$0xff] %vm257_vm0, %v3843_v17  ;;  %v3813_v23 = vadd.f32 %v11546_v57, %v3711_v21  ;;  %9261 = vmatprep.mubr.msk.f32.mxu1 %vm257_vm0, %v11668_v22  ;;  %v11755_v15 = vld [vmem:[#allocation3 + $0x8e] sm:$0xff]  ;;  %v11759_v17 = vld [vmem:[#allocation3 + $0xa6] sm:$0xff] }
 0x366   : > { %v3846_v27 = vmax.f32 %v3814_v20, 0.0  ;;  %9262 = vmatmul.mubr.msk.f32.gmra.mrb[22].mxu1 %vm257_vm0, %v11674_v25  ;;  %v11763_v19 = vld [vmem:[#allocation3 + $0xae] sm:$0xff]  ;;  %v11767_v20 = vld [vmem:[#allocation3 + $0xc6] sm:$0xff] }
 0x367   : > { %v3845_v31 = vmax.f32 %v3813_v23, 0.0  ;;  %v9219_v32 = vpop.f32.mrb[26].mxu0  ;;  %v11686_v44 = vld [vmem:[#allocation3 + $0x190] sm:$0xff]  ;;  %v11775_v23 = vld [vmem:[#allocation3 + $0xe6] sm:$0xff] }
 0x368   : > { %3959 = vst.msk [vmem:[#allocation3 + $0x1d0] sm:$0xff] %vm257_vm0, %v3846_v27  ;;  %v3816_v36 = vadd.f32 %v9219_v32, %v11546_v57  ;;  %v3721_v37 = vpop.f32.mrb[27].mxu0  ;;  %v11680_v39 = vld [vmem:[#allocation3 + $0x188] sm:$0xff] }
 0x369   : > { %3958 = vst.msk [vmem:[#allocation3 + $0x1c8] sm:$0xff] %vm257_vm0, %v3845_v31  ;;  %v3815_v43 = vadd.f32 %v11546_v57, %v3721_v37  ;;  %9264 = vmatprep.mubr.msk.f32.mxu1 %vm257_vm0, %v11680_v39  ;;  %v11771_v21 = vld [vmem:[#allocation3 + $0xce] sm:$0xff]  ;;  %v11783_v31 = vld [vmem:[#allocation3 + $0x106] sm:$0xff] }
 0x36a   : > { %v3848_v45 = vmax.f32 %v3816_v36, 0.0  ;;  %9265 = vmatmul.mubr.msk.f32.gmra.mrb[24].mxu1 %vm257_vm0, %v11686_v44  ;;  %v11779_v27 = vld [vmem:[#allocation3 + $0xee] sm:$0xff]  ;;  %v11791_v36 = vld [vmem:[#allocation3 + $0x126] sm:$0xff] }
 0x36b   : > { %v3847_v46 = vmax.f32 %v3815_v43, 0.0  ;;  %v9222_v47 = vpop.f32.mrb[28].mxu0  ;;  %v11698_v53 = vld [vmem:[#allocation3 + $0x1b0] sm:$0xff]  ;;  %v11799_v43 = vld [vmem:[#allocation3 + $0x146] sm:$0xff] }
 0x36c   : > { %3961 = vst.msk [vmem:[#allocation3 + $0x1f0] sm:$0xff] %vm257_vm0, %v3848_v45  ;;  %v3818_v4 = vadd.f32 %v9222_v47, %v11546_v57  ;;  %v3731_v50 = vpop.f32.mrb[29].mxu0  ;;  %v11692_v51 = vld [vmem:[#allocation3 + $0x1a8] sm:$0xff] }
 0x36d   : > { %3960 = vst.msk [vmem:[#allocation3 + $0x1e8] sm:$0xff] %vm257_vm0, %v3847_v46  ;;  %v3817_v52 = vadd.f32 %v11546_v57, %v3731_v50  ;;  %9267 = vmatprep.mubr.msk.f32.mxu1 %vm257_vm0, %v11692_v51  ;;  %v11787_v32 = vld [vmem:[#allocation3 + $0x10e] sm:$0xff]  ;;  %v11807_v46 = vld [vmem:[#allocation3 + $0x166] sm:$0xff] }
 0x36e   : > { %v3850_v54 = vmax.f32 %v3818_v4, 0.0  ;;  %9268 = vmatmul.mubr.msk.f32.gmra.mrb[26].mxu1 %vm257_vm0, %v11698_v53  ;;  %v11795_v37 = vld [vmem:[#allocation3 + $0x12e] sm:$0xff]  ;;  %v11815_v4 = vld [vmem:[#allocation3 + $0x186] sm:$0xff] }
 0x36f   : > { %v3849_v58 = vmax.f32 %v3817_v52, 0.0  ;;  %v9225_v60 = vpop.f32.mrb[30].mxu0  ;;  %v11710_v9 = vld [vmem:[#allocation3 + $0x1d0] sm:$0xff]  ;;  %v11823_v52 = vld [vmem:[#allocation3 + $0x1a6] sm:$0xff] }
 0x370   : > { %3963 = vst.msk [vmem:[#allocation3 + $0x210] sm:$0xff] %vm257_vm0, %v3850_v54  ;;  %v3820_v61 = vadd.f32 %v9225_v60, %v11546_v57  ;;  %v3741_v62 = vpop.f32.mrb[31].mxu0  ;;  %v11704_v0 = vld [vmem:[#allocation3 + $0x1c8] sm:$0xff] }
 0x371   : > { %3962 = vst.msk [vmem:[#allocation3 + $0x208] sm:$0xff] %vm257_vm0, %v3849_v58  ;;  %v3819_v2 = vadd.f32 %v11546_v57, %v3741_v62  ;;  %9270 = vmatprep.mubr.msk.f32.mxu1 %vm257_vm0, %v11704_v0  ;;  %v11803_v45 = vld [vmem:[#allocation3 + $0x14e] sm:$0xff]  ;;  %v11831_v58 = vld [vmem:[#allocation3 + $0x1c6] sm:$0xff] }
 0x372   : > { %v3852_v8 = vmax.f32 %v3820_v61, 0.0  ;;  %9271 = vmatmul.mubr.msk.f32.gmra.mrb[28].mxu1 %vm257_vm0, %v11710_v9  ;;  %v11811_v47 = vld [vmem:[#allocation3 + $0x16e] sm:$0xff] }
 0x373   : > { %v3851_v41 = vmax.f32 %v3819_v2, 0.0  ;;  %v11720_v57 = vld [vmem:[#allocation3 + $0x1f0] sm:$0xff] }
 0x374   : > { %3965 = vst.msk [vmem:[#allocation3 + $0x230] sm:$0xff] %vm257_vm0, %v3852_v8  ;;  %v11715_v42 = vld [vmem:[#allocation3 + $0x1e8] sm:$0xff]  ;;  %v4676_v8 = vld [vmem:[#allocation3 + $0x12] sm:$0xff] }
 0x375   : > { %3964 = vst.msk [vmem:[#allocation3 + $0x228] sm:$0xff] %vm257_vm0, %v3851_v41  ;;  %9273 = vmatprep.mubr.msk.f32.mxu1 %vm257_vm0, %v11715_v42  ;;  %v11819_v50 = vld [vmem:[#allocation3 + $0x18e] sm:$0xff]  ;;  %v11839_v61 = vld [vmem:[#allocation3 + $0x1e6] sm:$0xff] }
 0x376   : > { %9274 = vmatmul.mubr.msk.f32.gmra.mrb[30].mxu1 %vm257_vm0, %v11720_v57  ;;  %v11827_v54 = vld [vmem:[#allocation3 + $0x1ae] sm:$0xff] }
 0x377   : > { %9278 = vmatprep.mubr.msk.f32.mxu1 %vm257_vm0, %v3966_v1  ;;  %v11835_v60 = vld [vmem:[#allocation3 + $0x1ce] sm:$0xff]  ;;  %v11851_v1 = vld [vmem:[%s12519_s3 + $0x20] sm:$0xff] }
 0x378   : > { %v4675_v62 = vld [vmem:[#allocation3 + $0xa] sm:$0xff] }
 0x379   : > { %v11843_v2 = vld [vmem:[#allocation3 + $0x1ee] sm:$0xff] }
 0x37a   : > { %9279 = vmatmul.mubr.msk.f32.vlgmr.msra.gmra.mrb[0].mxu1 %vm257_vm0, %v3967_v28  ;;  %v4677_v41 = vld [vmem:[#allocation3 + $0x2a] sm:$0xff]  ;;  %v4678_v28 = vld [vmem:[#allocation3 + $0x32] sm:$0xff] }
 0x37b   : > { %9327 = vmatpush3.msra.mxu1 %v11540_v56  ;;  %9281 = vmatprep.mubr.msk.f32.mxu1 %vm257_vm0, %v3968_v33  ;;  %v11747_v56 = vld [vmem:[#allocation3 + $0x6e] sm:$0xff] }
 0x37c   : > { %9376 = vmatprep.subr.mxu1 %v11728_v63  ;;  %v11858_v33 = vld [vmem:[#allocation3 + $0x4a] sm:$0xff] }
 0x37e   : > { %9282 = vmatmul.mubr.msk.f32.gmra.mrb[2].mxu1 %vm257_vm0, %v3969_v35  ;;  %v11862_v35 = vld [vmem:[#allocation3 + $0x52] sm:$0xff] }
 0x37f   : > { %9284 = vmatprep.mubr.msk.f32.mxu1 %vm257_vm0, %v11735_v11 }
 0x382   : > { %9285 = vmatmul.mubr.msk.f32.gmra.mrb[4].mxu1 %vm257_vm0, %v11739_v14 }
 0x383   : > { %9287 = vmatprep.mubr.msk.f32.mxu1 %vm257_vm0, %v11743_v13 }
 0x386   : > { %9288 = vmatmul.mubr.msk.f32.gmra.mrb[6].mxu1 %vm257_vm0, %v11747_v56 }
 0x387   : > { %9290 = vmatprep.mubr.msk.f32.mxu1 %vm257_vm0, %v11751_v6 }
 0x38a   : > { %9291 = vmatmul.mubr.msk.f32.gmra.mrb[8].mxu1 %vm257_vm0, %v11755_v15 }
 0x38b   : > { %9293 = vmatprep.mubr.msk.f32.mxu1 %vm257_vm0, %v11759_v17 }
 0x38e   : > { %9294 = vmatmul.mubr.msk.f32.gmra.mrb[10].mxu1 %vm257_vm0, %v11763_v19 }
 0x38f   : > { %9296 = vmatprep.mubr.msk.f32.mxu1 %vm257_vm0, %v11767_v20 }
 0x392   : > { %9297 = vmatmul.mubr.msk.f32.gmra.mrb[12].mxu1 %vm257_vm0, %v11771_v21 }
 0x393   : > { %9299 = vmatprep.mubr.msk.f32.mxu1 %vm257_vm0, %v11775_v23 }
 0x396   : > { %9300 = vmatmul.mubr.msk.f32.gmra.mrb[14].mxu1 %vm257_vm0, %v11779_v27 }
 0x397   : > { %9302 = vmatprep.mubr.msk.f32.mxu1 %vm257_vm0, %v11783_v31 }
 0x39a   : > { %9303 = vmatmul.mubr.msk.f32.gmra.mrb[16].mxu1 %vm257_vm0, %v11787_v32 }
 0x39b   : > { %9305 = vmatprep.mubr.msk.f32.mxu1 %vm257_vm0, %v11791_v36 }
 0x39e   : > { %9306 = vmatmul.mubr.msk.f32.gmra.mrb[18].mxu1 %vm257_vm0, %v11795_v37 }
 0x39f   : > { %9308 = vmatprep.mubr.msk.f32.mxu1 %vm257_vm0, %v11799_v43 }
 0x3a2   : > { %9309 = vmatmul.mubr.msk.f32.gmra.mrb[20].mxu1 %vm257_vm0, %v11803_v45 }
 0x3a3   : > { %9311 = vmatprep.mubr.msk.f32.mxu1 %vm257_vm0, %v11807_v46 }
 0x3a6   : > { %9312 = vmatmul.mubr.msk.f32.gmra.mrb[22].mxu1 %vm257_vm0, %v11811_v47 }
 0x3a7   : > { %9314 = vmatprep.mubr.msk.f32.mxu1 %vm257_vm0, %v11815_v4 }
 0x3aa   : > { %9315 = vmatmul.mubr.msk.f32.gmra.mrb[24].mxu1 %vm257_vm0, %v11819_v50 }
 0x3ab   : > { %9317 = vmatprep.mubr.msk.f32.mxu1 %vm257_vm0, %v11823_v52 }
 0x3ae   : > { %9318 = vmatmul.mubr.msk.f32.gmra.mrb[26].mxu1 %vm257_vm0, %v11827_v54 }
 0x3af   : > { %9320 = vmatprep.mubr.msk.f32.mxu1 %vm257_vm0, %v11831_v58 }
 0x3b2   : > { %9321 = vmatmul.mubr.msk.f32.gmra.mrb[28].mxu1 %vm257_vm0, %v11835_v60 }
 0x3b3   : > { %9323 = vmatprep.mubr.msk.f32.mxu1 %vm257_vm0, %v11839_v61 }
 0x3b6   : > { %9324 = vmatmul.mubr.msk.f32.gmra.mrb[30].mxu1 %vm257_vm0, %v11843_v2 }
 0x3b7   : > { %9328 = vmatprep.mubr.msk.f32.mxu1 %vm257_vm0, %v4675_v62  ;;  %v11866_v62 = vld [vmem:[#allocation3 + $0x6a] sm:$0xff] }
 0x3b8   : > { %12773 = vst [vmem:[#allocation40_spill] sm:$0xff] %v11866_v62 }
 0x3ba   : > { %9329 = vmatmul.mubr.msk.f32.vlgmr.msra.gmra.mrb[0].mxu1 %vm257_vm0, %v4676_v8  ;;  %v11874_v8 = vld [vmem:[#allocation3 + $0x8a] sm:$0xff] }
 0x3bb   : > { %9377 = vmatpush3.msra.mxu1 %v11728_v63  ;;  %9331 = vmatprep.mubr.msk.f32.mxu1 %vm257_vm0, %v4677_v41  ;;  %v11870_v63 = vld [vmem:[#allocation3 + $0x72] sm:$0xff]  ;;  %12775 = vst [vmem:[#allocation55_spill] sm:$0xff] %v11874_v8 }
 0x3bc   : > { %9426 = vmatprep.subr.mxu1 %v11851_v1  ;;  %12774 = vst [vmem:[#allocation41_spill] sm:$0xff] %v11870_v63  ;;  %v11878_v41 = vld [vmem:[#allocation3 + $0x92] sm:$0xff] }
 0x3bd   : > { %12776 = vst [vmem:[#allocation57_spill] sm:$0xff] %v11878_v41 }
 0x3be   : > { %9332 = vmatmul.mubr.msk.f32.gmra.mrb[2].mxu1 %vm257_vm0, %v4678_v28  ;;  %v11882_v28 = vld [vmem:[#allocation3 + $0xaa] sm:$0xff] }
 0x3bf   : > { %9334 = vmatprep.mubr.msk.f32.mxu1 %vm257_vm0, %v11858_v33  ;;  %12777 = vst [vmem:[#allocation59_spill] sm:$0xff] %v11882_v28 }
 0x3c2   : > { %9335 = vmatmul.mubr.msk.f32.gmra.mrb[4].mxu1 %vm257_vm0, %v11862_v35 }
 0x3c3   : > { %9337 = vmatprep.mubr.msk.f32.mxu1 %vm257_vm0, %v11866_v62  ;;  %v11886_v62 = vld [vmem:[#allocation3 + $0xb2] sm:$0xff] }
 0x3c4   : > { %12778 = vst [vmem:[#allocation60_spill] sm:$0xff] %v11886_v62 }
 0x3c6   : > { %9338 = vmatmul.mubr.msk.f32.gmra.mrb[6].mxu1 %vm257_vm0, %v11870_v63  ;;  %v11890_v63 = vld [vmem:[#allocation3 + $0xca] sm:$0xff] }
 0x3c7   : > { %9340 = vmatprep.mubr.msk.f32.mxu1 %vm257_vm0, %v11874_v8  ;;  %12779 = vst [vmem:[#allocation62_spill] sm:$0xff] %v11890_v63  ;;  %v11894_v8 = vld [vmem:[#allocation3 + $0xd2] sm:$0xff] }
 0x3c8   : > { %12780 = vst [vmem:[#allocation64_spill] sm:$0xff] %v11894_v8 }
 0x3ca   : > { %9341 = vmatmul.mubr.msk.f32.gmra.mrb[8].mxu1 %vm257_vm0, %v11878_v41  ;;  %v11898_v41 = vld [vmem:[#allocation3 + $0xea] sm:$0xff] }
 0x3cb   : > { %9343 = vmatprep.mubr.msk.f32.mxu1 %vm257_vm0, %v11882_v28  ;;  %12781 = vst [vmem:[#allocation34_spill] sm:$0xff] %v11898_v41  ;;  %v11902_v28 = vld [vmem:[#allocation3 + $0xf2] sm:$0xff] }
 0x3cc   : > { %12782 = vst [vmem:[#allocation35_spill] sm:$0xff] %v11902_v28 }
 0x3ce   : > { %9344 = vmatmul.mubr.msk.f32.gmra.mrb[10].mxu1 %vm257_vm0, %v11886_v62  ;;  %v11906_v62 = vld [vmem:[#allocation3 + $0x10a] sm:$0xff] }
 0x3cf   : > { %9346 = vmatprep.mubr.msk.f32.mxu1 %vm257_vm0, %v11890_v63  ;;  %12783 = vst [vmem:[#allocation36_spill] sm:$0xff] %v11906_v62  ;;  %v11910_v63 = vld [vmem:[#allocation3 + $0x112] sm:$0xff] }
 0x3d0   : > { %12784 = vst [vmem:[#allocation37_spill] sm:$0xff] %v11910_v63 }
 0x3d2   : > { %9347 = vmatmul.mubr.msk.f32.gmra.mrb[12].mxu1 %vm257_vm0, %v11894_v8  ;;  %v11914_v8 = vld [vmem:[#allocation3 + $0x12a] sm:$0xff] }
 0x3d3   : > { %9349 = vmatprep.mubr.msk.f32.mxu1 %vm257_vm0, %v11898_v41  ;;  %12785 = vst [vmem:[#allocation66_spill] sm:$0xff] %v11914_v8  ;;  %v11918_v41 = vld [vmem:[#allocation3 + $0x132] sm:$0xff] }
 0x3d4   : > { %12786 = vst [vmem:[#allocation67_spill] sm:$0xff] %v11918_v41 }
 0x3d6   : > { %9350 = vmatmul.mubr.msk.f32.gmra.mrb[14].mxu1 %vm257_vm0, %v11902_v28  ;;  %v11922_v28 = vld [vmem:[#allocation3 + $0x14a] sm:$0xff] }
 0x3d7   : > { %9352 = vmatprep.mubr.msk.f32.mxu1 %vm257_vm0, %v11906_v62  ;;  %12787 = vst [vmem:[#allocation42_spill] sm:$0xff] %v11922_v28  ;;  %v11926_v62 = vld [vmem:[#allocation3 + $0x152] sm:$0xff] }
 0x3d8   : > { %12788 = vst [vmem:[#allocation43_spill] sm:$0xff] %v11926_v62 }
 0x3da   : > { %9353 = vmatmul.mubr.msk.f32.gmra.mrb[16].mxu1 %vm257_vm0, %v11910_v63  ;;  %v11930_v63 = vld [vmem:[#allocation3 + $0x16a] sm:$0xff] }
 0x3db   : > { %9355 = vmatprep.mubr.msk.f32.mxu1 %vm257_vm0, %v11914_v8  ;;  %12789 = vst [vmem:[#allocation44_spill] sm:$0xff] %v11930_v63  ;;  %v11934_v8 = vld [vmem:[#allocation3 + $0x172] sm:$0xff] }
 0x3dc   : > { %12790 = vst [vmem:[#allocation45_spill] sm:$0xff] %v11934_v8 }
 0x3de   : > { %9356 = vmatmul.mubr.msk.f32.gmra.mrb[18].mxu1 %vm257_vm0, %v11918_v41  ;;  %v11938_v41 = vld [vmem:[#allocation3 + $0x18a] sm:$0xff] }
 0x3df   : > { %9358 = vmatprep.mubr.msk.f32.mxu1 %vm257_vm0, %v11922_v28  ;;  %12791 = vst [vmem:[#allocation46_spill] sm:$0xff] %v11938_v41  ;;  %v11942_v28 = vld [vmem:[#allocation3 + $0x192] sm:$0xff] }
 0x3e0   : > { %12792 = vst [vmem:[#allocation47_spill] sm:$0xff] %v11942_v28 }
 0x3e2   : > { %9359 = vmatmul.mubr.msk.f32.gmra.mrb[20].mxu1 %vm257_vm0, %v11926_v62  ;;  %v11946_v62 = vld [vmem:[#allocation3 + $0x1aa] sm:$0xff] }
 0x3e3   : > { %9361 = vmatprep.mubr.msk.f32.mxu1 %vm257_vm0, %v11930_v63  ;;  %12793 = vst [vmem:[#allocation48_spill] sm:$0xff] %v11946_v62  ;;  %v11950_v63 = vld [vmem:[#allocation3 + $0x1b2] sm:$0xff] }
 0x3e6   : > { %9362 = vmatmul.mubr.msk.f32.gmra.mrb[22].mxu1 %vm257_vm0, %v11934_v8  ;;  %v11954_v8 = vld [vmem:[#allocation3 + $0x1ca] sm:$0xff] }
 0x3e7   : > { %9364 = vmatprep.mubr.msk.f32.mxu1 %vm257_vm0, %v11938_v41  ;;  %12794 = vst [vmem:[#allocation49_spill] sm:$0xff] %v11954_v8  ;;  %v11958_v41 = vld [vmem:[#allocation3 + $0x1d2] sm:$0xff] }
 0x3e8   : > { %12795 = vst [vmem:[#allocation50_spill] sm:$0xff] %v11958_v41 }
 0x3ea   : > { %9365 = vmatmul.mubr.msk.f32.gmra.mrb[24].mxu1 %vm257_vm0, %v11942_v28  ;;  %v11962_v28 = vld [vmem:[#allocation3 + $0x1ea] sm:$0xff] }
 0x3eb   : > { %9367 = vmatprep.mubr.msk.f32.mxu1 %vm257_vm0, %v11946_v62  ;;  %v11966_v62 = vld [vmem:[#allocation3 + $0x1f2] sm:$0xff] }
 0x3ee   : > { %9368 = vmatmul.mubr.msk.f32.gmra.mrb[26].mxu1 %vm257_vm0, %v11950_v63 }
 0x3ef   : > { %9370 = vmatprep.mubr.msk.f32.mxu1 %vm257_vm0, %v11954_v8  ;;  %v8045_v8 = vld [vmem:[%s12519_s3 + $0x28] sm:$0xff] }
 0x3f2   : > { %9371 = vmatmul.mubr.msk.f32.gmra.mrb[28].mxu1 %vm257_vm0, %v11958_v41 }
 0x3f3   : > { %9373 = vmatprep.mubr.msk.f32.mxu1 %vm257_vm0, %v11962_v28 }
 0x3f6   : > { %9374 = vmatmul.mubr.msk.f32.gmra.mrb[30].mxu1 %vm257_vm0, %v11966_v62 }
 0x3f7   : > { %9378 = vmatprep.mubr.msk.f32.mxu1 %vm257_vm0, %v11735_v11  ;;  %v12030_v11 = vld [vmem:[#allocation3 + $0x206] sm:$0xff] }
 0x3fa   : > { %9379 = vmatmul.mubr.msk.f32.vlgmr.msra.gmra.mrb[0].mxu1 %vm257_vm0, %v11739_v14  ;;  %v12034_v14 = vld [vmem:[#allocation3 + $0x20e] sm:$0xff] }
 0x3fb   : > { %9427 = vmatpush3.msra.mxu1 %v11851_v1  ;;  %9381 = vmatprep.mubr.msk.f32.mxu1 %vm257_vm0, %v11743_v13  ;;  %v12038_v13 = vld [vmem:[#allocation3 + $0x226] sm:$0xff]  ;;  %v8078_v1 = vld [vmem:[%s12519_s3 + $0x30] sm:$0xff] }
 0x3fc   : > { %9476 = vmatprep.subr.mxu1 %v8045_v8 }
 0x3fe   : > { %9382 = vmatmul.mubr.msk.f32.gmra.mrb[2].mxu1 %vm257_vm0, %v11747_v56  ;;  %v12042_v56 = vld [vmem:[#allocation3 + $0x22e] sm:$0xff] }
 0x3ff   : > { %9384 = vmatprep.mubr.msk.f32.mxu1 %vm257_vm0, %v11751_v6 }
 0x402   : > { %9385 = vmatmul.mubr.msk.f32.gmra.mrb[4].mxu1 %vm257_vm0, %v11755_v15 }
 0x403   : > { %9387 = vmatprep.mubr.msk.f32.mxu1 %vm257_vm0, %v11759_v17 }
 0x406   : > { %9388 = vmatmul.mubr.msk.f32.gmra.mrb[6].mxu1 %vm257_vm0, %v11763_v19 }
 0x407   : > { %9390 = vmatprep.mubr.msk.f32.mxu1 %vm257_vm0, %v11767_v20 }
 0x40a   : > { %9391 = vmatmul.mubr.msk.f32.gmra.mrb[8].mxu1 %vm257_vm0, %v11771_v21 }
 0x40b   : > { %9393 = vmatprep.mubr.msk.f32.mxu1 %vm257_vm0, %v11775_v23 }
 0x40e   : > { %9394 = vmatmul.mubr.msk.f32.gmra.mrb[10].mxu1 %vm257_vm0, %v11779_v27 }
 0x40f   : > { %9396 = vmatprep.mubr.msk.f32.mxu1 %vm257_vm0, %v11783_v31 }
 0x412   : > { %9397 = vmatmul.mubr.msk.f32.gmra.mrb[12].mxu1 %vm257_vm0, %v11787_v32 }
 0x413   : > { %9399 = vmatprep.mubr.msk.f32.mxu1 %vm257_vm0, %v11791_v36 }
 0x416   : > { %9400 = vmatmul.mubr.msk.f32.gmra.mrb[14].mxu1 %vm257_vm0, %v11795_v37 }
 0x417   : > { %9402 = vmatprep.mubr.msk.f32.mxu1 %vm257_vm0, %v11799_v43 }
 0x41a   : > { %9403 = vmatmul.mubr.msk.f32.gmra.mrb[16].mxu1 %vm257_vm0, %v11803_v45 }
 0x41b   : > { %9405 = vmatprep.mubr.msk.f32.mxu1 %vm257_vm0, %v11807_v46 }
 0x41e   : > { %9406 = vmatmul.mubr.msk.f32.gmra.mrb[18].mxu1 %vm257_vm0, %v11811_v47 }
 0x41f   : > { %9408 = vmatprep.mubr.msk.f32.mxu1 %vm257_vm0, %v11815_v4 }
 0x422   : > { %9409 = vmatmul.mubr.msk.f32.gmra.mrb[20].mxu1 %vm257_vm0, %v11819_v50 }
 0x423   : > { %9411 = vmatprep.mubr.msk.f32.mxu1 %vm257_vm0, %v11823_v52 }
 0x426   : > { %9412 = vmatmul.mubr.msk.f32.gmra.mrb[22].mxu1 %vm257_vm0, %v11827_v54 }
 0x427   : > { %9414 = vmatprep.mubr.msk.f32.mxu1 %vm257_vm0, %v11831_v58 }
 0x42a   : > { %9415 = vmatmul.mubr.msk.f32.gmra.mrb[24].mxu1 %vm257_vm0, %v11835_v60 }
 0x42b   : > { %9417 = vmatprep.mubr.msk.f32.mxu1 %vm257_vm0, %v11839_v61 }
 0x42e   : > { %9418 = vmatmul.mubr.msk.f32.gmra.mrb[26].mxu1 %vm257_vm0, %v11843_v2 }
 0x42f   : > { %9420 = vmatprep.mubr.msk.f32.mxu1 %vm257_vm0, %v12030_v11 }
 0x432   : > { %9421 = vmatmul.mubr.msk.f32.gmra.mrb[28].mxu1 %vm257_vm0, %v12034_v14 }
 0x433   : > { %9423 = vmatprep.mubr.msk.f32.mxu1 %vm257_vm0, %v12038_v13 }
 0x436   : > { %9424 = vmatmul.mubr.msk.f32.gmra.mrb[30].mxu1 %vm257_vm0, %v12042_v56 }
 0x437   : > { %9428 = vmatprep.mubr.msk.f32.mxu1 %vm257_vm0, %v11560_v29  ;;  %v12105_v29 = vld [vmem:[#allocation3 + $0x208] sm:$0xff] }
 0x43a   : > { %9429 = vmatmul.mubr.msk.f32.vlgmr.msra.gmra.mrb[0].mxu1 %vm257_vm0, %v11566_v12  ;;  %v12109_v12 = vld [vmem:[#allocation3 + $0x210] sm:$0xff] }
 0x43b   : > { %9477 = vmatpush3.msra.mxu1 %v8045_v8  ;;  %9431 = vmatprep.mubr.msk.f32.mxu1 %vm257_vm0, %v11572_v16  ;;  %v12113_v16 = vld [vmem:[#allocation3 + $0x228] sm:$0xff]  ;;  %v12803_v8 = vld [vmem:[#allocation64_spill] sm:$0xff] }
 0x43c   : > { %9526 = vmatprep.subr.mxu1 %v8078_v1 }
 0x43e   : > { %9432 = vmatmul.mubr.msk.f32.gmra.mrb[2].mxu1 %vm257_vm0, %v11578_v18  ;;  %v12117_v18 = vld [vmem:[#allocation3 + $0x230] sm:$0xff] }
 0x43f   : > { %9434 = vmatprep.mubr.msk.f32.mxu1 %vm257_vm0, %v11584_v24  ;;  %v8111_v24 = vld [vmem:[%s12519_s3 + $0x38] sm:$0xff] }
 0x442   : > { %9435 = vmatmul.mubr.msk.f32.gmra.mrb[4].mxu1 %vm257_vm0, %v11590_v26  ;;  %v12796_v26 = vld [vmem:[#allocation40_spill] sm:$0xff] }
 0x443   : > { %9437 = vmatprep.mubr.msk.f32.mxu1 %vm257_vm0, %v11596_v38  ;;  %v12797_v38 = vld [vmem:[#allocation41_spill] sm:$0xff] }
 0x446   : > { %9438 = vmatmul.mubr.msk.f32.gmra.mrb[6].mxu1 %vm257_vm0, %v11602_v40  ;;  %v12798_v40 = vld [vmem:[#allocation55_spill] sm:$0xff] }
 0x447   : > { %9440 = vmatprep.mubr.msk.f32.mxu1 %vm257_vm0, %v11608_v48  ;;  %v12799_v48 = vld [vmem:[#allocation57_spill] sm:$0xff] }
 0x44a   : > { %9441 = vmatmul.mubr.msk.f32.gmra.mrb[8].mxu1 %vm257_vm0, %v11614_v49  ;;  %v12800_v49 = vld [vmem:[#allocation59_spill] sm:$0xff] }
 0x44b   : > { %9443 = vmatprep.mubr.msk.f32.mxu1 %vm257_vm0, %v11620_v55 }
 0x44e   : > { %9444 = vmatmul.mubr.msk.f32.gmra.mrb[10].mxu1 %vm257_vm0, %v11626_v59 }
 0x44f   : > { %9446 = vmatprep.mubr.msk.f32.mxu1 %vm257_vm0, %v11632_v10 }
 0x452   : > { %9447 = vmatmul.mubr.msk.f32.gmra.mrb[12].mxu1 %vm257_vm0, %v11638_v3 }
 0x453   : > { %9449 = vmatprep.mubr.msk.f32.mxu1 %vm257_vm0, %v11644_v30 }
 0x456   : > { %9450 = vmatmul.mubr.msk.f32.gmra.mrb[14].mxu1 %vm257_vm0, %v11650_v34 }
 0x457   : > { %9452 = vmatprep.mubr.msk.f32.mxu1 %vm257_vm0, %v11656_v5 }
 0x45a   : > { %9453 = vmatmul.mubr.msk.f32.gmra.mrb[16].mxu1 %vm257_vm0, %v11662_v7 }
 0x45b   : > { %9455 = vmatprep.mubr.msk.f32.mxu1 %vm257_vm0, %v11668_v22 }
 0x45e   : > { %9456 = vmatmul.mubr.msk.f32.gmra.mrb[18].mxu1 %vm257_vm0, %v11674_v25 }
 0x45f   : > { %9458 = vmatprep.mubr.msk.f32.mxu1 %vm257_vm0, %v11680_v39 }
 0x462   : > { %9459 = vmatmul.mubr.msk.f32.gmra.mrb[20].mxu1 %vm257_vm0, %v11686_v44 }
 0x463   : > { %9461 = vmatprep.mubr.msk.f32.mxu1 %vm257_vm0, %v11692_v51 }
 0x466   : > { %9462 = vmatmul.mubr.msk.f32.gmra.mrb[22].mxu1 %vm257_vm0, %v11698_v53 }
 0x467   : > { %9464 = vmatprep.mubr.msk.f32.mxu1 %vm257_vm0, %v11704_v0 }
 0x46a   : > { %9465 = vmatmul.mubr.msk.f32.gmra.mrb[24].mxu1 %vm257_vm0, %v11710_v9 }
 0x46b   : > { %9467 = vmatprep.mubr.msk.f32.mxu1 %vm257_vm0, %v11715_v42 }
 0x46e   : > { %9468 = vmatmul.mubr.msk.f32.gmra.mrb[26].mxu1 %vm257_vm0, %v11720_v57 }
 0x46f   : > { %9470 = vmatprep.mubr.msk.f32.mxu1 %vm257_vm0, %v12105_v29 }
 0x472   : > { %9471 = vmatmul.mubr.msk.f32.gmra.mrb[28].mxu1 %vm257_vm0, %v12109_v12 }
 0x473   : > { %9473 = vmatprep.mubr.msk.f32.mxu1 %vm257_vm0, %v12113_v16 }
 0x476   : > { %9474 = vmatmul.mubr.msk.f32.gmra.mrb[30].mxu1 %vm257_vm0, %v12117_v18 }
 0x477   : > { %9478 = vmatprep.mubr.msk.f32.mxu1 %vm257_vm0, %v11858_v33  ;;  %v12801_v33 = vld [vmem:[#allocation60_spill] sm:$0xff] }
 0x47a   : > { %9479 = vmatmul.mubr.msk.f32.vlgmr.msra.gmra.mrb[0].mxu1 %vm257_vm0, %v11862_v35  ;;  %v12802_v35 = vld [vmem:[#allocation62_spill] sm:$0xff] }
 0x47b   : > { %9527 = vmatpush3.msra.mxu1 %v8078_v1  ;;  %9481 = vmatprep.mubr.msk.f32.mxu1 %vm257_vm0, %v12796_v26  ;;  %v12804_v1 = vld [vmem:[#allocation34_spill] sm:$0xff]  ;;  %v12805_v26 = vld [vmem:[#allocation35_spill] sm:$0xff] }
 0x47c   : > { %9576 = vmatprep.subr.mxu1 %v8111_v24 }
 0x47e   : > { %9482 = vmatmul.mubr.msk.f32.gmra.mrb[2].mxu1 %vm257_vm0, %v12797_v38  ;;  %v12806_v38 = vld [vmem:[#allocation36_spill] sm:$0xff] }
 0x47f   : > { %9484 = vmatprep.mubr.msk.f32.mxu1 %vm257_vm0, %v12798_v40 }
 0x482   : > { %9485 = vmatmul.mubr.msk.f32.gmra.mrb[4].mxu1 %vm257_vm0, %v12799_v48  ;;  %v12807_v48 = vld [vmem:[#allocation37_spill] sm:$0xff] }
 0x483   : > { %9487 = vmatprep.mubr.msk.f32.mxu1 %vm257_vm0, %v12800_v49  ;;  %v12808_v49 = vld [vmem:[#allocation66_spill] sm:$0xff] }
 0x486   : > { %9488 = vmatmul.mubr.msk.f32.gmra.mrb[6].mxu1 %vm257_vm0, %v12801_v33  ;;  %v12809_v33 = vld [vmem:[#allocation67_spill] sm:$0xff] }
 0x487   : > { %9490 = vmatprep.mubr.msk.f32.mxu1 %vm257_vm0, %v12802_v35  ;;  %v12810_v35 = vld [vmem:[#allocation42_spill] sm:$0xff] }
 0x48a   : > { %9491 = vmatmul.mubr.msk.f32.gmra.mrb[8].mxu1 %vm257_vm0, %v12803_v8  ;;  %v12811_v8 = vld [vmem:[#allocation43_spill] sm:$0xff] }
 0x48b   : > { %9493 = vmatprep.mubr.msk.f32.mxu1 %vm257_vm0, %v12804_v1  ;;  %v12812_v1 = vld [vmem:[#allocation44_spill] sm:$0xff] }
 0x48e   : > { %9494 = vmatmul.mubr.msk.f32.gmra.mrb[10].mxu1 %vm257_vm0, %v12805_v26  ;;  %v12813_v26 = vld [vmem:[#allocation45_spill] sm:$0xff] }
 0x48f   : > { %9496 = vmatprep.mubr.msk.f32.mxu1 %vm257_vm0, %v12806_v38  ;;  %v12814_v38 = vld [vmem:[#allocation46_spill] sm:$0xff] }
 0x492   : > { %9497 = vmatmul.mubr.msk.f32.gmra.mrb[12].mxu1 %vm257_vm0, %v12807_v48  ;;  %v12815_v48 = vld [vmem:[#allocation47_spill] sm:$0xff] }
 0x493   : > { %9499 = vmatprep.mubr.msk.f32.mxu1 %vm257_vm0, %v12808_v49  ;;  %v12816_v49 = vld [vmem:[#allocation48_spill] sm:$0xff] }
 0x496   : > { %9500 = vmatmul.mubr.msk.f32.gmra.mrb[14].mxu1 %vm257_vm0, %v12809_v33 }
 0x497   : > { %9502 = vmatprep.mubr.msk.f32.mxu1 %vm257_vm0, %v12810_v35  ;;  %v12817_v35 = vld [vmem:[#allocation49_spill] sm:$0xff] }
 0x49a   : > { %9503 = vmatmul.mubr.msk.f32.gmra.mrb[16].mxu1 %vm257_vm0, %v12811_v8 }
 0x49b   : > { %9505 = vmatprep.mubr.msk.f32.mxu1 %vm257_vm0, %v12812_v1 }
 0x49e   : > { %9506 = vmatmul.mubr.msk.f32.gmra.mrb[18].mxu1 %vm257_vm0, %v12813_v26 }
 0x49f   : > { %9508 = vmatprep.mubr.msk.f32.mxu1 %vm257_vm0, %v12814_v38  ;;  %v12180_v38 = vld [vmem:[#allocation3 + $0x20a] sm:$0xff] }
 0x4a0   : > { %12818 = vst [vmem:[#allocation51_spill] sm:$0xff] %v12180_v38 }
 0x4a2   : > { %9509 = vmatmul.mubr.msk.f32.gmra.mrb[20].mxu1 %vm257_vm0, %v12815_v48 }
 0x4a3   : > { %9511 = vmatprep.mubr.msk.f32.mxu1 %vm257_vm0, %v12816_v49  ;;  %v12184_v49 = vld [vmem:[#allocation3 + $0x212] sm:$0xff] }
 0x4a6   : > { %9512 = vmatmul.mubr.msk.f32.gmra.mrb[22].mxu1 %vm257_vm0, %v11950_v63 }
 0x4a7   : > { %9514 = vmatprep.mubr.msk.f32.mxu1 %vm257_vm0, %v12817_v35  ;;  %v12188_v35 = vld [vmem:[#allocation3 + $0x22a] sm:$0xff] }
 0x4aa   : > { %9515 = vmatmul.mubr.msk.f32.gmra.mrb[24].mxu1 %vm257_vm0, %v11958_v41  ;;  %v12192_v41 = vld [vmem:[#allocation3 + $0x232] sm:$0xff] }
 0x4ab   : > { %9517 = vmatprep.mubr.msk.f32.mxu1 %vm257_vm0, %v11962_v28 }
 0x4ae   : > { %9518 = vmatmul.mubr.msk.f32.gmra.mrb[26].mxu1 %vm257_vm0, %v11966_v62 }
 0x4af   : > { %9520 = vmatprep.mubr.msk.f32.mxu1 %vm257_vm0, %v12180_v38  ;;  %v8144_v38 = vld [vmem:[%s12519_s3 + $0x40] sm:$0xff] }
 0x4b2   : > { %9521 = vmatmul.mubr.msk.f32.gmra.mrb[28].mxu1 %vm257_vm0, %v12184_v49 }
 0x4b3   : > { %9523 = vmatprep.mubr.msk.f32.mxu1 %vm257_vm0, %v12188_v35 }
 0x4b6   : > { %9524 = vmatmul.mubr.msk.f32.gmra.mrb[30].mxu1 %vm257_vm0, %v12192_v41 }
 0x4b7   : > { %9528 = vmatprep.mubr.msk.f32.mxu1 %vm257_vm0, %v11751_v6  ;;  %v6252_v6 = vld [vmem:[#allocation3 + $0x246] sm:$0xff] }
 0x4ba   : > { %9529 = vmatmul.mubr.msk.f32.vlgmr.msra.gmra.mrb[0].mxu1 %vm257_vm0, %v11755_v15  ;;  %v6253_v15 = vld [vmem:[#allocation3 + $0x24e] sm:$0xff] }
 0x4bb   : > { %9577 = vmatpush3.msra.mxu1 %v8111_v24  ;;  %9531 = vmatprep.mubr.msk.f32.mxu1 %vm257_vm0, %v11759_v17  ;;  %v6254_v17 = vld [vmem:[#allocation3 + $0x266] sm:$0xff] }
 0x4bc   : > { %9626 = vmatprep.subr.mxu1 %v8144_v38 }
 0x4be   : > { %9532 = vmatmul.mubr.msk.f32.gmra.mrb[2].mxu1 %vm257_vm0, %v11763_v19  ;;  %v6255_v19 = vld [vmem:[#allocation3 + $0x26e] sm:$0xff] }
 0x4bf   : > { %9534 = vmatprep.mubr.msk.f32.mxu1 %vm257_vm0, %v11767_v20  ;;  %v6611_v20 = vld [vmem:[#allocation3 + $0x88] sm:$0xff] }
 0x4c2   : > { %9535 = vmatmul.mubr.msk.f32.gmra.mrb[4].mxu1 %vm257_vm0, %v11771_v21  ;;  %v6612_v21 = vld [vmem:[#allocation3 + $0x90] sm:$0xff] }
 0x4c3   : > { %9537 = vmatprep.mubr.msk.f32.mxu1 %vm257_vm0, %v11775_v23  ;;  %v6613_v23 = vld [vmem:[#allocation3 + $0xa8] sm:$0xff] }
 0x4c6   : > { %9538 = vmatmul.mubr.msk.f32.gmra.mrb[6].mxu1 %vm257_vm0, %v11779_v27  ;;  %v6614_v27 = vld [vmem:[#allocation3 + $0xb0] sm:$0xff] }
 0x4c7   : > { %9540 = vmatprep.mubr.msk.f32.mxu1 %vm257_vm0, %v11783_v31  ;;  %v6615_v31 = vld [vmem:[#allocation3 + $0xc8] sm:$0xff] }
 0x4ca   : > { %9541 = vmatmul.mubr.msk.f32.gmra.mrb[8].mxu1 %vm257_vm0, %v11787_v32  ;;  %v6616_v32 = vld [vmem:[#allocation3 + $0xd0] sm:$0xff] }
 0x4cb   : > { %9543 = vmatprep.mubr.msk.f32.mxu1 %vm257_vm0, %v11791_v36  ;;  %v12833_v36 = vld [vmem:[#allocation50_spill] sm:$0xff] }
 0x4ce   : > { %9544 = vmatmul.mubr.msk.f32.gmra.mrb[10].mxu1 %vm257_vm0, %v11795_v37  ;;  %v12834_v37 = vld [vmem:[#allocation51_spill] sm:$0xff] }
 0x4cf   : > { %9546 = vmatprep.mubr.msk.f32.mxu1 %vm257_vm0, %v11799_v43  ;;  %v7026_v43 = vld [vmem:[#allocation3 + $0x24a] sm:$0xff] }
 0x4d2   : > { %9547 = vmatmul.mubr.msk.f32.gmra.mrb[12].mxu1 %vm257_vm0, %v11803_v45  ;;  %v7027_v45 = vld [vmem:[#allocation3 + $0x252] sm:$0xff] }
 0x4d3   : > { %9549 = vmatprep.mubr.msk.f32.mxu1 %vm257_vm0, %v11807_v46  ;;  %v7028_v46 = vld [vmem:[#allocation3 + $0x26a] sm:$0xff] }
 0x4d6   : > { %9550 = vmatmul.mubr.msk.f32.gmra.mrb[14].mxu1 %vm257_vm0, %v11811_v47  ;;  %v7029_v47 = vld [vmem:[#allocation3 + $0x272] sm:$0xff] }
 0x4d7   : > { %9552 = vmatprep.mubr.msk.f32.mxu1 %vm257_vm0, %v11815_v4  ;;  %v12376_v4 = vld [vmem:[%s12520_s4] ss:$0 sm:$0xff] }
 0x4da   : > { %9553 = vmatmul.mubr.msk.f32.gmra.mrb[16].mxu1 %vm257_vm0, %v11819_v50 }
 0x4db   : > { %9555 = vmatprep.mubr.msk.f32.mxu1 %vm257_vm0, %v11823_v52 }
 0x4de   : > { %9556 = vmatmul.mubr.msk.f32.gmra.mrb[18].mxu1 %vm257_vm0, %v11827_v54 }
 0x4df   : > { %9558 = vmatprep.mubr.msk.f32.mxu1 %vm257_vm0, %v11831_v58 }
 0x4e2   : > { %9559 = vmatmul.mubr.msk.f32.gmra.mrb[20].mxu1 %vm257_vm0, %v11835_v60  ;;  %v12835_v60 = vld [vmem:[#allocation5_spill] sm:$0xff] }
 0x4e3   : > { %9561 = vmatprep.mubr.msk.f32.mxu1 %vm257_vm0, %v11839_v61 }
 0x4e6   : > { %9562 = vmatmul.mubr.msk.f32.gmra.mrb[22].mxu1 %vm257_vm0, %v11843_v2  ;;  %v12836_v2 = vld [vmem:[#allocation4_spill] sm:$0xff] }
 0x4e7   : > { %9564 = vmatprep.mubr.msk.f32.mxu1 %vm257_vm0, %v12030_v11 }
 0x4ea   : > { %9565 = vmatmul.mubr.msk.f32.gmra.mrb[24].mxu1 %vm257_vm0, %v12034_v14 }
 0x4eb   : > { %9567 = vmatprep.mubr.msk.f32.mxu1 %vm257_vm0, %v12038_v13 }
 0x4ee   : > { %9568 = vmatmul.mubr.msk.f32.gmra.mrb[26].mxu1 %vm257_vm0, %v12042_v56  ;;  %v12837_v56 = vld [vmem:[#allocation7_spill] sm:$0xff] }
 0x4ef   : > { %9570 = vmatprep.mubr.msk.f32.mxu1 %vm257_vm0, %v6252_v6 }
 0x4f2   : > { %9571 = vmatmul.mubr.msk.f32.gmra.mrb[28].mxu1 %vm257_vm0, %v6253_v15 }
 0x4f3   : > { %9573 = vmatprep.mubr.msk.f32.mxu1 %vm257_vm0, %v6254_v17 }
 0x4f6   : > { %9574 = vmatmul.mubr.msk.f32.gmra.mrb[30].mxu1 %vm257_vm0, %v6255_v19 }
 0x4f7   : > { %9578 = vmatprep.mubr.msk.f32.mxu1 %vm257_vm0, %v6611_v20 }
 0x4fa   : > { %9579 = vmatmul.mubr.msk.f32.vlgmr.msra.gmra.mrb[0].mxu1 %vm257_vm0, %v6612_v21  ;;  %v12841_v21 = vld [vmem:[#allocation11_spill] sm:$0xff] }
 0x4fb   : > { %9627 = vmatpush3.msra.mxu1 %v8144_v38  ;;  %9581 = vmatprep.mubr.msk.f32.mxu1 %vm257_vm0, %v6613_v23 }
 0x4fe   : > { %9582 = vmatmul.mubr.msk.f32.gmra.mrb[2].mxu1 %vm257_vm0, %v6614_v27  ;;  %v12842_v27 = vld [vmem:[#allocation10_spill] sm:$0xff] }
 0x4ff   : > { %9584 = vmatprep.mubr.msk.f32.mxu1 %vm257_vm0, %v6615_v31 }
 0x502   : > { %9585 = vmatmul.mubr.msk.f32.gmra.mrb[4].mxu1 %vm257_vm0, %v6616_v32 }
 0x503   : > { %9587 = vmatprep.mubr.msk.f32.mxu1 %vm257_vm0, %v11620_v55  ;;  %v6639_v55 = vld [vmem:[#allocation3 + $0x248] sm:$0xff] }
 0x506   : > { %9588 = vmatmul.mubr.msk.f32.gmra.mrb[6].mxu1 %vm257_vm0, %v11626_v59  ;;  %v6640_v59 = vld [vmem:[#allocation3 + $0x250] sm:$0xff] }
 0x507   : > { %9590 = vmatprep.mubr.msk.f32.mxu1 %vm257_vm0, %v11632_v10  ;;  %v6641_v10 = vld [vmem:[#allocation3 + $0x268] sm:$0xff] }
 0x50a   : > { %9591 = vmatmul.mubr.msk.f32.gmra.mrb[8].mxu1 %vm257_vm0, %v11638_v3  ;;  %v6642_v3 = vld [vmem:[#allocation3 + $0x270] sm:$0xff] }
 0x50b   : > { %9593 = vmatprep.mubr.msk.f32.mxu1 %vm257_vm0, %v11644_v30  ;;  %v12819_v30 = vld [vmem:[#allocation57_spill] sm:$0xff] }
 0x50e   : > { %9594 = vmatmul.mubr.msk.f32.gmra.mrb[10].mxu1 %vm257_vm0, %v11650_v34  ;;  %v12820_v34 = vld [vmem:[#allocation59_spill] sm:$0xff] }
 0x50f   : > { %9596 = vmatprep.mubr.msk.f32.mxu1 %vm257_vm0, %v11656_v5  ;;  %v12821_v5 = vld [vmem:[#allocation60_spill] sm:$0xff] }
 0x512   : > { %9597 = vmatmul.mubr.msk.f32.gmra.mrb[12].mxu1 %vm257_vm0, %v11662_v7  ;;  %v12822_v7 = vld [vmem:[#allocation62_spill] sm:$0xff] }
 0x513   : > { %9599 = vmatprep.mubr.msk.f32.mxu1 %vm257_vm0, %v11668_v22  ;;  %v12823_v22 = vld [vmem:[#allocation64_spill] sm:$0xff] }
 0x516   : > { %9600 = vmatmul.mubr.msk.f32.gmra.mrb[14].mxu1 %vm257_vm0, %v11674_v25  ;;  %v12824_v25 = vld [vmem:[#allocation34_spill] sm:$0xff] }
 0x517   : > { %9602 = vmatprep.mubr.msk.f32.mxu1 %vm257_vm0, %v11680_v39  ;;  %v12825_v39 = vld [vmem:[#allocation35_spill] sm:$0xff] }
 0x51a   : > { %9603 = vmatmul.mubr.msk.f32.gmra.mrb[16].mxu1 %vm257_vm0, %v11686_v44  ;;  %v12826_v44 = vld [vmem:[#allocation36_spill] sm:$0xff] }
 0x51b   : > { %9605 = vmatprep.mubr.msk.f32.mxu1 %vm257_vm0, %v11692_v51  ;;  %v12827_v51 = vld [vmem:[#allocation37_spill] sm:$0xff] }
 0x51e   : > { %9606 = vmatmul.mubr.msk.f32.gmra.mrb[18].mxu1 %vm257_vm0, %v11698_v53  ;;  %v12828_v53 = vld [vmem:[#allocation66_spill] sm:$0xff] }
 0x51f   : > { %9608 = vmatprep.mubr.msk.f32.mxu1 %vm257_vm0, %v11704_v0  ;;  %v12829_v0 = vld [vmem:[#allocation42_spill] sm:$0xff] }
 0x522   : > { %9609 = vmatmul.mubr.msk.f32.gmra.mrb[20].mxu1 %vm257_vm0, %v11710_v9  ;;  %v12830_v9 = vld [vmem:[#allocation46_spill] sm:$0xff] }
 0x523   : > { %9611 = vmatprep.mubr.msk.f32.mxu1 %vm257_vm0, %v11715_v42  ;;  %v12831_v42 = vld [vmem:[#allocation48_spill] sm:$0xff] }
 0x526   : > { %9612 = vmatmul.mubr.msk.f32.gmra.mrb[22].mxu1 %vm257_vm0, %v11720_v57  ;;  %v12832_v57 = vld [vmem:[#allocation49_spill] sm:$0xff] }
 0x527   : > { %9614 = vmatprep.mubr.msk.f32.mxu1 %vm257_vm0, %v12105_v29 }
 0x52a   : > { %9615 = vmatmul.mubr.msk.f32.gmra.mrb[24].mxu1 %vm257_vm0, %v12109_v12  ;;  %v12838_v12 = vld [vmem:[#allocation6_spill] sm:$0xff] }
 0x52b   : > { %9617 = vmatprep.mubr.msk.f32.mxu1 %vm257_vm0, %v12113_v16 }
 0x52e   : > { %9618 = vmatmul.mubr.msk.f32.gmra.mrb[26].mxu1 %vm257_vm0, %v12117_v18 }
 0x52f   : > { %9620 = vmatprep.mubr.msk.f32.mxu1 %vm257_vm0, %v6639_v55 }
 0x532   : > { %9621 = vmatmul.mubr.msk.f32.gmra.mrb[28].mxu1 %vm257_vm0, %v6640_v59 }
 0x533   : > { %9623 = vmatprep.mubr.msk.f32.mxu1 %vm257_vm0, %v6641_v10 }
 0x536   : > { %9624 = vmatmul.mubr.msk.f32.gmra.mrb[30].mxu1 %vm257_vm0, %v6642_v3 }
 0x537   : > { %9628 = vmatprep.mubr.msk.f32.mxu1 %vm257_vm0, %v12798_v40 }
 0x53a   : > { %9629 = vmatmul.mubr.msk.f32.vlgmr.msra.gmra.mrb[0].mxu1 %vm257_vm0, %v12819_v30 }
 0x53b   : > { %9631 = vmatprep.mubr.msk.f32.mxu1 %vm257_vm0, %v12820_v34  ;;  %v12843_v34 = vld [vmem:[#allocation13_spill] sm:$0xff] }
 0x53e   : > { %9632 = vmatmul.mubr.msk.f32.gmra.mrb[2].mxu1 %vm257_vm0, %v12821_v5 }
 0x53f   : > { %9634 = vmatprep.mubr.msk.f32.mxu1 %vm257_vm0, %v12822_v7  ;;  %v12844_v7 = vld [vmem:[#allocation12_spill] sm:$0xff] }
 0x542   : > { %9635 = vmatmul.mubr.msk.f32.gmra.mrb[4].mxu1 %vm257_vm0, %v12823_v22 }
 0x543   : > { %9637 = vmatprep.mubr.msk.f32.mxu1 %vm257_vm0, %v12824_v25 }
 0x546   : > { %9638 = vmatmul.mubr.msk.f32.gmra.mrb[6].mxu1 %vm257_vm0, %v12825_v39 }
 0x547   : > { %9640 = vmatprep.mubr.msk.f32.mxu1 %vm257_vm0, %v12826_v44 }
 0x54a   : > { %9641 = vmatmul.mubr.msk.f32.gmra.mrb[8].mxu1 %vm257_vm0, %v12827_v51 }
 0x54b   : > { %9643 = vmatprep.mubr.msk.f32.mxu1 %vm257_vm0, %v12828_v53 }
 0x54e   : > { %9644 = vmatmul.mubr.msk.f32.gmra.mrb[10].mxu1 %vm257_vm0, %v12809_v33 }
 0x54f   : > { %9646 = vmatprep.mubr.msk.f32.mxu1 %vm257_vm0, %v12829_v0 }
 0x552   : > { %9647 = vmatmul.mubr.msk.f32.gmra.mrb[12].mxu1 %vm257_vm0, %v12811_v8 }
 0x553   : > { %9649 = vmatprep.mubr.msk.f32.mxu1 %vm257_vm0, %v12812_v1  ;;  %v12840_v1 = vld [vmem:[#allocation8_spill] sm:$0xff] }
 0x556   : > { %9650 = vmatmul.mubr.msk.f32.gmra.mrb[14].mxu1 %vm257_vm0, %v12813_v26 }
 0x557   : > { %9652 = vmatprep.mubr.msk.f32.mxu1 %vm257_vm0, %v12830_v9  ;;  %v12845_v9 = vld [vmem:[#allocation15_spill] sm:$0xff] }
 0x55a   : > { %9653 = vmatmul.mubr.msk.f32.gmra.mrb[16].mxu1 %vm257_vm0, %v12815_v48 }
 0x55b   : > { %9655 = vmatprep.mubr.msk.f32.mxu1 %vm257_vm0, %v12831_v42 }
 0x55e   : > { %9656 = vmatmul.mubr.msk.f32.gmra.mrb[18].mxu1 %vm257_vm0, %v11950_v63 }
 0x55f   : > { %9658 = vmatprep.mubr.msk.f32.mxu1 %vm257_vm0, %v12832_v57  ;;  %v12846_v57 = vld [vmem:[#allocation14_spill] sm:$0xff] }
 0x562   : > { %9659 = vmatmul.mubr.msk.f32.gmra.mrb[20].mxu1 %vm257_vm0, %v12833_v36 }
 0x563   : > { %9661 = vmatprep.mubr.msk.f32.mxu1 %vm257_vm0, %v11962_v28 }
 0x566   : > { %9662 = vmatmul.mubr.msk.f32.gmra.mrb[22].mxu1 %vm257_vm0, %v11966_v62 }
 0x567   : > { %9664 = vmatprep.mubr.msk.f32.mxu1 %vm257_vm0, %v12834_v37 }
 0x56a   : > { %9665 = vmatmul.mubr.msk.f32.gmra.mrb[24].mxu1 %vm257_vm0, %v12184_v49 }
 0x56b   : > { %9667 = vmatprep.mubr.msk.f32.mxu1 %vm257_vm0, %v12188_v35  ;;  %v12839_v35 = vld [vmem:[#allocation9_spill] sm:$0xff] }
 0x56e   : > { %9668 = vmatmul.mubr.msk.f32.gmra.mrb[26].mxu1 %vm257_vm0, %v12192_v41 }
 0x56f   : > { %9670 = vmatprep.mubr.msk.f32.mxu1 %vm257_vm0, %v7026_v43 }
 0x572   : > { %9671 = vmatmul.mubr.msk.f32.gmra.mrb[28].mxu1 %vm257_vm0, %v7027_v45 }
 0x573   : > { %9673 = vmatprep.mubr.msk.f32.mxu1 %vm257_vm0, %v7028_v46 }
 0x576   : > { %9674 = vmatmul.mubr.msk.f32.gmra.mrb[30].mxu1 %vm257_vm0, %v7029_v47 }
 0x60d   : > { %v9630_v50 = vpop.f32.mrb[0].mxu1 }
 0x60e   : > { %v7393_v52 = vadd.f32 %v9630_v50, %v12376_v4  ;;  %v7194_v54 = vpop.f32.mrb[1].mxu1 }
 0x60f   : > { %v7392_v58 = vadd.f32 %v12376_v4, %v7194_v54 }
 0x610   : > { %v7425_v61 = vadd.f32 %v7393_v52, %v12835_v60  ;;  %v12847_v52 = vld [vmem:[#allocation17_spill] sm:$0xff] }
 0x611   : > { %v7424_v62 = vadd.f32 %v7392_v58, %v12836_v2  ;;  %v9633_v63 = vpop.f32.mrb[2].mxu1  ;;  %v12848_v58 = vld [vmem:[#allocation16_spill] sm:$0xff] }
 0x612   : > { %v7457_v41 = vmax.f32 %v7425_v61, 0.0  ;;  %v7395_v28 = vadd.f32 %v9633_v63, %v12376_v4  ;;  %v7204_v11 = vpop.f32.mrb[3].mxu1 }
 0x613   : > { %v7456_v14 = vmax.f32 %v7424_v62, 0.0  ;;  %v7394_v13 = vadd.f32 %v12376_v4, %v7204_v11  ;;  %v12849_v11 = vld [vmem:[#allocation19_spill] sm:$0xff] }
 0x614   : > { %7489 = vst.msk [vmem:[%s12386_s22 + $0x8] sm:$0xff] %vm257_vm0, %v7457_v41  ;;  %v7427_v29 = vadd.f32 %v7395_v28, %v12837_v56 }
 0x615   : > { %7488 = vst.msk [vmem:[%s12386_s22] sm:$0xff] %vm257_vm0, %v7456_v14  ;;  %v7426_v16 = vadd.f32 %v7394_v13, %v12838_v12  ;;  %v9636_v18 = vpop.f32.mrb[4].mxu1  ;;  %v12850_v13 = vld [vmem:[#allocation18_spill] sm:$0xff] }
 0x616   : > { %v7459_v24 = vmax.f32 %v7427_v29, 0.0  ;;  %v7397_v40 = vadd.f32 %v9636_v18, %v12376_v4  ;;  %v7214_v48 = vpop.f32.mrb[5].mxu1 }
 0x617   : > { %v7458_v49 = vmax.f32 %v7426_v16, 0.0  ;;  %v7396_v33 = vadd.f32 %v12376_v4, %v7214_v48  ;;  %v12851_v48 = vld [vmem:[#allocation21_spill] sm:$0xff] }
 0x618   : > { %7491 = vst.msk [vmem:[%s12386_s22 + $0x18] sm:$0xff] %vm257_vm0, %v7459_v24  ;;  %v7429_v8 = vadd.f32 %v7397_v40, %v12839_v35 }
 0x619   : > { %7490 = vst.msk [vmem:[%s12386_s22 + $0x10] sm:$0xff] %vm257_vm0, %v7458_v49  ;;  %v7428_v26 = vadd.f32 %v7396_v33, %v12840_v1  ;;  %v9639_v38 = vpop.f32.mrb[6].mxu1  ;;  %v12852_v33 = vld [vmem:[#allocation20_spill] sm:$0xff] }
 0x61a   : > { %v7461_v6 = vmax.f32 %v7429_v8, 0.0  ;;  %v7399_v15 = vadd.f32 %v9639_v38, %v12376_v4  ;;  %v7224_v17 = vpop.f32.mrb[7].mxu1 }
 0x61b   : > { %v7460_v19 = vmax.f32 %v7428_v26, 0.0  ;;  %v7398_v20 = vadd.f32 %v12376_v4, %v7224_v17  ;;  %v12853_v17 = vld [vmem:[#allocation23_spill] sm:$0xff] }
 0x61c   : > { %7493 = vst.msk [vmem:[%s12386_s22 + $0x28] sm:$0xff] %vm257_vm0, %v7461_v6  ;;  %v7431_v23 = vadd.f32 %v7399_v15, %v12841_v21 }
 0x61d   : > { %7492 = vst.msk [vmem:[%s12386_s22 + $0x20] sm:$0xff] %vm257_vm0, %v7460_v19  ;;  %v7430_v31 = vadd.f32 %v7398_v20, %v12842_v27  ;;  %v9642_v32 = vpop.f32.mrb[8].mxu1  ;;  %v12854_v20 = vld [vmem:[#allocation22_spill] sm:$0xff] }
 0x61e   : > { %v7463_v55 = vmax.f32 %v7431_v23, 0.0  ;;  %v7401_v59 = vadd.f32 %v9642_v32, %v12376_v4  ;;  %v7234_v10 = vpop.f32.mrb[9].mxu1 }
 0x61f   : > { %v7462_v3 = vmax.f32 %v7430_v31, 0.0  ;;  %v7400_v30 = vadd.f32 %v12376_v4, %v7234_v10  ;;  %v12855_v10 = vld [vmem:[#allocation25_spill] sm:$0xff] }
 0x620   : > { %7495 = vst.msk [vmem:[%s12386_s22 + $0x38] sm:$0xff] %vm257_vm0, %v7463_v55  ;;  %v7433_v5 = vadd.f32 %v7401_v59, %v12843_v34 }
 0x621   : > { %7494 = vst.msk [vmem:[%s12386_s22 + $0x30] sm:$0xff] %vm257_vm0, %v7462_v3  ;;  %v7432_v22 = vadd.f32 %v7400_v30, %v12844_v7  ;;  %v9645_v25 = vpop.f32.mrb[10].mxu1  ;;  %v12856_v30 = vld [vmem:[#allocation24_spill] sm:$0xff] }
 0x622   : > { %v7465_v39 = vmax.f32 %v7433_v5, 0.0  ;;  %v7403_v44 = vadd.f32 %v9645_v25, %v12376_v4  ;;  %v7244_v51 = vpop.f32.mrb[11].mxu1 }
 0x623   : > { %v7464_v53 = vmax.f32 %v7432_v22, 0.0  ;;  %v7402_v0 = vadd.f32 %v12376_v4, %v7244_v51  ;;  %v12857_v51 = vld [vmem:[#allocation27_spill] sm:$0xff] }
 0x624   : > { %7497 = vst.msk [vmem:[%s12386_s22 + $0x48] sm:$0xff] %vm257_vm0, %v7465_v39  ;;  %v7435_v42 = vadd.f32 %v7403_v44, %v12845_v9 }
 0x625   : > { %7496 = vst.msk [vmem:[%s12386_s22 + $0x40] sm:$0xff] %vm257_vm0, %v7464_v53  ;;  %v7434_v36 = vadd.f32 %v7402_v0, %v12846_v57  ;;  %v9648_v37 = vpop.f32.mrb[12].mxu1  ;;  %v12858_v0 = vld [vmem:[#allocation26_spill] sm:$0xff] }
 0x626   : > { %v7467_v43 = vmax.f32 %v7435_v42, 0.0  ;;  %v7405_v45 = vadd.f32 %v9648_v37, %v12376_v4  ;;  %v7254_v46 = vpop.f32.mrb[13].mxu1 }
 0x627   : > { %v7466_v47 = vmax.f32 %v7434_v36, 0.0  ;;  %v7404_v50 = vadd.f32 %v12376_v4, %v7254_v46  ;;  %v12859_v46 = vld [vmem:[#allocation29_spill] sm:$0xff] }
 0x628   : > { %7499 = vst.msk [vmem:[%s12386_s22 + $0x58] sm:$0xff] %vm257_vm0, %v7467_v43  ;;  %v7437_v54 = vadd.f32 %v7405_v45, %v12847_v52 }
 0x629   : > { %7498 = vst.msk [vmem:[%s12386_s22 + $0x50] sm:$0xff] %vm257_vm0, %v7466_v47  ;;  %v7436_v60 = vadd.f32 %v7404_v50, %v12848_v58  ;;  %v9651_v61 = vpop.f32.mrb[14].mxu1  ;;  %v12860_v50 = vld [vmem:[#allocation28_spill] sm:$0xff] }
 0x62a   : > { %v7469_v2 = vmax.f32 %v7437_v54, 0.0  ;;  %v7407_v62 = vadd.f32 %v9651_v61, %v12376_v4  ;;  %v7264_v63 = vpop.f32.mrb[15].mxu1 }
 0x62b   : > { %v7468_v41 = vmax.f32 %v7436_v60, 0.0  ;;  %v7406_v28 = vadd.f32 %v12376_v4, %v7264_v63  ;;  %v12861_v63 = vld [vmem:[#allocation31_spill] sm:$0xff] }
 0x62c   : > { %7501 = vst.msk [vmem:[%s12386_s22 + $0x68] sm:$0xff] %vm257_vm0, %v7469_v2  ;;  %v7439_v14 = vadd.f32 %v7407_v62, %v12849_v11 }
 0x62d   : > { %7500 = vst.msk [vmem:[%s12386_s22 + $0x60] sm:$0xff] %vm257_vm0, %v7468_v41  ;;  %v7438_v56 = vadd.f32 %v7406_v28, %v12850_v13  ;;  %v9654_v29 = vpop.f32.mrb[16].mxu1  ;;  %v12862_v28 = vld [vmem:[#allocation30_spill] sm:$0xff] }
 0x62e   : > { %v7471_v12 = vmax.f32 %v7439_v14, 0.0  ;;  %v7409_v16 = vadd.f32 %v9654_v29, %v12376_v4  ;;  %v7274_v18 = vpop.f32.mrb[17].mxu1 }
 0x62f   : > { %v7470_v24 = vmax.f32 %v7438_v56, 0.0  ;;  %v7408_v40 = vadd.f32 %v12376_v4, %v7274_v18  ;;  %v12863_v18 = vld [vmem:[#allocation33_spill] sm:$0xff] }
 0x630   : > { %7503 = vst.msk [vmem:[%s12386_s22 + $0x78] sm:$0xff] %vm257_vm0, %v7471_v12  ;;  %v7441_v49 = vadd.f32 %v7409_v16, %v12851_v48 }
 0x631   : > { %7502 = vst.msk [vmem:[%s12386_s22 + $0x70] sm:$0xff] %vm257_vm0, %v7470_v24  ;;  %v7440_v35 = vadd.f32 %v7408_v40, %v12852_v33  ;;  %v9657_v8 = vpop.f32.mrb[18].mxu1  ;;  %v12864_v40 = vld [vmem:[#allocation32_spill] sm:$0xff] }
 0x632   : > { %v7473_v1 = vmax.f32 %v7441_v49, 0.0  ;;  %v7411_v26 = vadd.f32 %v9657_v8, %v12376_v4  ;;  %v7284_v38 = vpop.f32.mrb[19].mxu1 }
 0x633   : > { %v7472_v6 = vmax.f32 %v7440_v35, 0.0  ;;  %v7410_v15 = vadd.f32 %v12376_v4, %v7284_v38  ;;  %v12865_v38 = vld [vmem:[#allocation39_spill] sm:$0xff] }
 0x634   : > { %7505 = vst.msk [vmem:[%s12386_s22 + $0x88] sm:$0xff] %vm257_vm0, %v7473_v1  ;;  %v7443_v19 = vadd.f32 %v7411_v26, %v12853_v17 }
 0x635   : > { %7504 = vst.msk [vmem:[%s12386_s22 + $0x80] sm:$0xff] %vm257_vm0, %v7472_v6  ;;  %v7442_v21 = vadd.f32 %v7410_v15, %v12854_v20  ;;  %v9660_v23 = vpop.f32.mrb[20].mxu1  ;;  %v12866_v15 = vld [vmem:[#allocation38_spill] sm:$0xff] }
 0x636   : > { %v7475_v27 = vmax.f32 %v7443_v19, 0.0  ;;  %v7413_v31 = vadd.f32 %v9660_v23, %v12376_v4  ;;  %v7294_v32 = vpop.f32.mrb[21].mxu1 }
 0x637   : > { %v7474_v55 = vmax.f32 %v7442_v21, 0.0  ;;  %v7412_v59 = vadd.f32 %v12376_v4, %v7294_v32 }
 0x638   : > { %7507 = vst.msk [vmem:[%s12386_s22 + $0x98] sm:$0xff] %vm257_vm0, %v7475_v27  ;;  %v7445_v3 = vadd.f32 %v7413_v31, %v12855_v10 }
 0x639   : > { %7506 = vst.msk [vmem:[%s12386_s22 + $0x90] sm:$0xff] %vm257_vm0, %v7474_v55  ;;  %v7444_v34 = vadd.f32 %v7412_v59, %v12856_v30  ;;  %v9663_v5 = vpop.f32.mrb[22].mxu1 }
 0x63a   : > { %v7477_v7 = vmax.f32 %v7445_v3, 0.0  ;;  %v7415_v22 = vadd.f32 %v9663_v5, %v12376_v4  ;;  %v7304_v25 = vpop.f32.mrb[23].mxu1 }
 0x63b   : > { %v7476_v39 = vmax.f32 %v7444_v34, 0.0  ;;  %v7414_v44 = vadd.f32 %v12376_v4, %v7304_v25 }
 0x63c   : > { %7509 = vst.msk [vmem:[%s12386_s22 + $0xa8] sm:$0xff] %vm257_vm0, %v7477_v7  ;;  %v7447_v53 = vadd.f32 %v7415_v22, %v12857_v51 }
 0x63d   : > { %7508 = vst.msk [vmem:[%s12386_s22 + $0xa0] sm:$0xff] %vm257_vm0, %v7476_v39  ;;  %v7446_v9 = vadd.f32 %v7414_v44, %v12858_v0  ;;  %v9666_v42 = vpop.f32.mrb[24].mxu1 }
 0x63e   : > { %v7479_v57 = vmax.f32 %v7447_v53, 0.0  ;;  %v7417_v36 = vadd.f32 %v9666_v42, %v12376_v4  ;;  %v7314_v37 = vpop.f32.mrb[25].mxu1 }
 0x63f   : > { %v7478_v43 = vmax.f32 %v7446_v9, 0.0  ;;  %v7416_v45 = vadd.f32 %v12376_v4, %v7314_v37 }
 0x640   : > { %7511 = vst.msk [vmem:[%s12386_s22 + $0xb8] sm:$0xff] %vm257_vm0, %v7479_v57  ;;  %v7449_v47 = vadd.f32 %v7417_v36, %v12859_v46 }
 0x641   : > { %7510 = vst.msk [vmem:[%s12386_s22 + $0xb0] sm:$0xff] %vm257_vm0, %v7478_v43  ;;  %v7448_v52 = vadd.f32 %v7416_v45, %v12860_v50  ;;  %v9669_v54 = vpop.f32.mrb[26].mxu1 }
 0x642   : > { %v7481_v58 = vmax.f32 %v7449_v47, 0.0  ;;  %v7419_v60 = vadd.f32 %v9669_v54, %v12376_v4  ;;  %v7324_v61 = vpop.f32.mrb[27].mxu1 }
 0x643   : > { %v7480_v2 = vmax.f32 %v7448_v52, 0.0  ;;  %v7418_v62 = vadd.f32 %v12376_v4, %v7324_v61 }
 0x644   : > { %7513 = vst.msk [vmem:[%s12386_s22 + $0xc8] sm:$0xff] %vm257_vm0, %v7481_v58  ;;  %v7451_v41 = vadd.f32 %v7419_v60, %v12861_v63 }
 0x645   : > { %7512 = vst.msk [vmem:[%s12386_s22 + $0xc0] sm:$0xff] %vm257_vm0, %v7480_v2  ;;  %v7450_v11 = vadd.f32 %v7418_v62, %v12862_v28  ;;  %v9672_v14 = vpop.f32.mrb[28].mxu1 }
 0x646   : > { %v7483_v13 = vmax.f32 %v7451_v41, 0.0  ;;  %v7421_v56 = vadd.f32 %v9672_v14, %v12376_v4  ;;  %v7334_v29 = vpop.f32.mrb[29].mxu1 }
 0x647   : > { %v7482_v12 = vmax.f32 %v7450_v11, 0.0  ;;  %v7420_v16 = vadd.f32 %v12376_v4, %v7334_v29 }
 0x648   : > { %7515 = vst.msk [vmem:[%s12386_s22 + $0xd8] sm:$0xff] %vm257_vm0, %v7483_v13  ;;  %v7453_v24 = vadd.f32 %v7421_v56, %v12863_v18 }
 0x649   : > { %7514 = vst.msk [vmem:[%s12386_s22 + $0xd0] sm:$0xff] %vm257_vm0, %v7482_v12  ;;  %v7452_v48 = vadd.f32 %v7420_v16, %v12864_v40  ;;  %v9675_v49 = vpop.f32.mrb[30].mxu1 }
 0x64a   : > { %v7485_v33 = vmax.f32 %v7453_v24, 0.0  ;;  %v7423_v35 = vadd.f32 %v9675_v49, %v12376_v4  ;;  %v7344_v8 = vpop.f32.mrb[31].mxu1 }
 0x64b   : > { %v7484_v1 = vmax.f32 %v7452_v48, 0.0  ;;  %v7422_v26 = vadd.f32 %v12376_v4, %v7344_v8 }
 0x64c   : > { %7517 = vst.msk [vmem:[%s12386_s22 + $0xe8] sm:$0xff] %vm257_vm0, %v7485_v33  ;;  %v7455_v6 = vadd.f32 %v7423_v35, %v12865_v38 }
 0x64d   : > { %7516 = vst.msk [vmem:[%s12386_s22 + $0xe0] sm:$0xff] %vm257_vm0, %v7484_v1  ;;  %v7454_v17 = vadd.f32 %v7422_v26, %v12866_v15 }
 0x64e   : > { %v7487_v19 = vmax.f32 %v7455_v6, 0.0 }
 0x64f   : > { %v7486_v20 = vmax.f32 %v7454_v17, 0.0 }
 0x650   : > { %7519 = vst.msk [vmem:[%s12386_s22 + $0xf8] sm:$0xff] %vm257_vm0, %v7487_v19 }
 0x651   : > { %7518 = vst.msk [vmem:[%s12386_s22 + $0xf0] sm:$0xff] %vm257_vm0, %v7486_v20 }
 0x652 PF: > { %s15_s18 = sadd.s32 1, %s10203_s18  }
 0x653   : > { %p12_p4 = scmp.ge.s32.totalorder %s15_s18, 4  }
 0x655   :  { %14 = sbr.rel (!%p12_p4) target bundleno = 1 (0x1), region = 90 }

</bundles_post_ra>
